<compile_context>
chip_gen: v5e
topology: v5e:2x2
jax: 0.10.0
libtpu: 0.0.40
codegen_flags: <defaults>
</compile_context>

<pallas_src>
import functools

import numpy as np
import jax
import jax.numpy as jnp
from jax.experimental import pallas as pl
from jax.experimental.pallas import tpu as pltpu


# ---------------- parameter construction (host-side numpy / JAX glue) ----------------

def dct_mat(size):
    m = [[(np.sqrt(1.0 / size) if i == 0 else np.sqrt(2.0 / size))
          * np.cos((j + 0.5) * np.pi * i / size)
          for j in range(size)] for i in range(size)]
    return np.array(m, dtype=np.float32)


def generate_filter(start, end, size):
    return np.array(
        [[0.0 if (i + j > end or i + j < start) else 1.0 for j in range(size)]
         for i in range(size)],
        dtype=np.float32)


def make_fad_params(size, key):
    """Deterministic synthetic parameters mirroring FAD_Head.__init__."""
    dct = dct_mat(size)                         # _DCT_all
    dct_t = dct.T.copy()                        # _DCT_all_T
    bands = [
        (0.0, size // 2.82),                    # low
        (size // 2.82, size // 2),              # middle
        (size // 2, size * 2),                  # high
        (0.0, size * 2),                        # all
    ]
    bases = np.stack([generate_filter(s, e, size) for (s, e) in bands])     # (4,S,S)
    # learnable ~ N(0, 0.1), deterministic via PRNGKey
    learnable = 0.1 * jax.random.normal(key, (4, size, size), dtype=jnp.float32)
    # effective filter = base + norm_sigma(learnable) = base + 2*sigmoid(l) - 1
    filters = jnp.asarray(bases) + 2.0 * jax.nn.sigmoid(learnable) - 1.0    # (4,S,S)
    return jnp.asarray(dct), jnp.asarray(dct_t), filters


# ---------------- Pallas kernel ----------------

def fad_kernel(w_ref, x_ref, o_ref, *, channels, ss):
    # w_ref : (S*S, 4*S*S)        fused DCT -> band-mask -> iDCT weight,
    #                             band-major column blocks of width S*S
    # x_ref : (block_n, C, S*S)   one flattened (S,S) plane per (image, channel)
    # o_ref : (block_n, 4, C, S*S)  band ahead of channel == torch.cat order
    w = w_ref[...]
    for c in range(channels):                    # static unroll; C is small (RGB)
        xc = x_ref[:, c, :]                                       # (block_n, S*S)
        # single (block_n, 256) @ (256, 1024) MXU matmul; RHS identical for all c
        yc = jnp.dot(xc, w, preferred_element_type=jnp.float32)   # (block_n, 4*S*S)
        for b in range(4):                       # 128-aligned lane slices only
            o_ref[:, b, c, :] = yc[:, b * ss:(b + 1) * ss].astype(o_ref.dtype)


# ---------------- block selection / VMEM accounting ----------------

def _step_vmem_bytes(block_n, channels, ss, itemsize):
    """Per-grid-step VMEM: double-buffered in/out blocks (with the (C, S*S)
    minor dims padded to 8 sublanes in VMEM) + one live matmul intermediate."""
    pad_c = -(-channels // 8) * 8
    x_blk = block_n * pad_c * ss * itemsize
    o_blk = block_n * 4 * pad_c * ss * itemsize
    y_tmp = block_n * 4 * ss * itemsize           # per-channel matmul result
    return 2 * (x_blk + o_blk) + y_tmp


def _choose_block_batch(n, channels, ss, itemsize, budget_bytes):
    fits = [nb for nb in range(1, n + 1)
            if n % nb == 0
            and _step_vmem_bytes(nb, channels, ss, itemsize) <= budget_bytes]
    if not fits:
        return 1
    if n in fits:
        # whole problem resident -> grid=(1,), zero per-step overhead (toy case)
        return n
    # otherwise: largest block that still leaves >= 4 grid steps, so both v7x
    # TensorCores get >= 2 pipelined steps each; fall back to largest fitting.
    geq4 = [nb for nb in fits if (n // nb) >= 4]
    return max(geq4) if geq4 else max(fits)


# ---------------- wrapper ----------------

def fad_head_forward(x, dct, dct_t, filters, *, block_n=None,
                     vmem_budget_bytes=24 << 20):
    """x: (N, C, S, S) float32 -> (N, 4*C, S, S), matching FAD_Head.forward."""
    n, c, s, _ = x.shape
    ss = s * s
    hp = jax.lax.Precision.HIGHEST

    # ---- fused weight: W_b = kron(D^T,D^T) @ diag(filt_b) @ kron(D,D) ----
    w_fwd = jnp.kron(dct_t, dct_t)               # vec(D X D^T) = vec(X) @ w_fwd
    w_inv = jnp.kron(dct, dct)                   # vec(D^T Y D) = vec(Y) @ w_inv
    filt_flat = filters.reshape(4, ss)
    w_bands = jnp.einsum('ik,bk,kj->bij', w_fwd, filt_flat, w_inv, precision=hp)
    w_comb = jnp.transpose(w_bands, (1, 0, 2)).reshape(ss, 4 * ss)   # (S*S, 4*S*S)

    x3 = x.reshape(n, c, ss)                     # metadata-only reshape
    itemsize = jnp.dtype(x.dtype).itemsize
    if block_n is None:
        block_n = _choose_block_batch(n, c, ss, itemsize, vmem_budget_bytes)
    assert n % block_n == 0, (n, block_n)

    weight_bytes = ss * 4 * ss * 4               # f32 fused weight
    needed = (_step_vmem_bytes(block_n, c, ss, itemsize)
              + 2 * weight_bytes                 # default double-buffered RHS
              + (8 << 20))                       # compiler scratch headroom
    vmem_limit = int(min(max(needed, 32 << 20), 56 << 20))   # <=56MiB: v7x-safe

    out4 = pl.pallas_call(
        functools.partial(fad_kernel, channels=c, ss=ss),
        out_shape=jax.ShapeDtypeStruct((n, 4, c, ss), x.dtype),
        grid=(n // block_n,),
        in_specs=[
            pl.BlockSpec((ss, 4 * ss), lambda i: (0, 0)),         # fused weight (resident)
            pl.BlockSpec((block_n, c, ss), lambda i: (i, 0, 0)),  # this batch block
        ],
        out_specs=pl.BlockSpec((block_n, 4, c, ss), lambda i: (i, 0, 0, 0)),
        compiler_params=pltpu.CompilerParams(
            dimension_semantics=("parallel",),
            vmem_limit_bytes=vmem_limit),
    )(w_comb, x3)

    # (N, 4, C, S*S) -> (N, 4*C, S, S): pure metadata reshape (band-major
    # channel order == torch.cat(y_list, dim=1)); no transpose, no HBM copy.
    return out4.reshape(n, 4 * c, s, s)


# ---------------- pure-JAX reference for validation ----------------

def fad_head_reference(x, dct, dct_t, filters):
    hp = jax.lax.Precision.HIGHEST
    freq = jnp.einsum('ij,ncjk,kl->ncil', dct, x, dct_t, precision=hp)
    ys = [jnp.einsum('ij,ncjk,kl->ncil', dct_t, freq * filters[k], dct, precision=hp)
          for k in range(4)]
    return jnp.concatenate(ys, axis=1)


if __name__ == "__main__":
    # F3-Net FAD head on RGB planes (C=3); small batch & DCT size for the test.
    N, C, S = 16, 3, 16
    key = jax.random.PRNGKey(0)
    k_x, k_p = jax.random.split(key)

    x = jax.random.normal(k_x, (N, C, S, S), dtype=jnp.float32)
    dct, dct_t, filters = make_fad_params(S, k_p)

    out = fad_head_forward(x, dct, dct_t, filters)
    out = jax.block_until_ready(out)

    ref = fad_head_reference(x, dct, dct_t, filters)
    assert out.shape == (N, 4 * C, S, S), out.shape
    err = float(jnp.max(jnp.abs(out - ref)))
    assert jnp.allclose(out, ref, atol=1e-3, rtol=1e-3), f"mismatch, max abs err={err}"

    print("KERNEL_OK")
</pallas_src>

<mosaic_0001>
module attributes {stable_mosaic.version = 11 : i64} {
  func.func @fad_kernel(%arg0: i32, %arg1: memref<256x1024xf32, #tpu.memory_space<vmem>>, %arg2: memref<16x3x256xf32, #tpu.memory_space<vmem>>, %arg3: memref<16x4x3x256xf32, #tpu.memory_space<vmem>>) attributes {dimension_semantics = [#tpu.dimension_semantics<parallel>], iteration_bounds = array<i64: 1>, scalar_prefetch = 0 : i64, scratch_operands = 0 : i64, tpu.core_type = #tpu.core_type<tc>, window_params = [{pipeline_mode = #tpu.pipeline_mode<synchronous>, transform_indices = @transform_0, window_bounds = array<i64: 256, 1024>}, {transform_indices = @transform_1, window_bounds = array<i64: 16, 3, 256>}, {transform_indices = @transform_2, window_bounds = array<i64: 16, 4, 3, 256>}]} {
    %c0 = arith.constant 0 : index
    %c0_0 = arith.constant 0 : index
    %0 = vector.load %arg1[%c0, %c0_0] : memref<256x1024xf32, #tpu.memory_space<vmem>>, vector<256x1024xf32>
    %c0_1 = arith.constant 0 : index
    %c0_2 = arith.constant 0 : index
    %c0_3 = arith.constant 0 : index
    %1 = vector.load %arg2[%c0_1, %c0_2, %c0_3] : memref<16x3x256xf32, #tpu.memory_space<vmem>>, vector<16x1x256xf32>
    %2 = vector.shape_cast %1 : vector<16x1x256xf32> to vector<16x256xf32>
    %cst = arith.constant dense<0.000000e+00> : vector<16x1024xf32>
    %3 = tpu.matmul %2, %0, %cst {dimension_numbers = #tpu.dot_dimension_numbers<[1], [0], [0], [1], [0, 0, 1, 1], [], []>} : vector<16x256xf32>, vector<256x1024xf32>, vector<16x1024xf32> -> vector<16x1024xf32>
    %4 = vector.extract_strided_slice %3 {offsets = [0, 0], sizes = [16, 256], strides = [1, 1]} : vector<16x1024xf32> to vector<16x256xf32>
    %c0_4 = arith.constant 0 : index
    %c0_5 = arith.constant 0 : index
    %c0_6 = arith.constant 0 : index
    %c0_7 = arith.constant 0 : index
    %5 = vector.load %arg3[%c0_4, %c0_5, %c0_6, %c0_7] : memref<16x4x3x256xf32, #tpu.memory_space<vmem>>, vector<16x1x1x256xf32>
    %6 = vector.shape_cast %5 : vector<16x1x1x256xf32> to vector<16x256xf32>
    %7 = vector.shape_cast %4 : vector<16x256xf32> to vector<16x1x1x256xf32>
    tpu.vector_store %arg3[%c0_4, %c0_5, %c0_6, %c0_7], %7 {strides = array<i32>} : memref<16x4x3x256xf32, #tpu.memory_space<vmem>>, vector<16x1x1x256xf32>,
    %8 = vector.extract_strided_slice %3 {offsets = [0, 256], sizes = [16, 256], strides = [1, 1]} : vector<16x1024xf32> to vector<16x256xf32>
    %c0_8 = arith.constant 0 : index
    %c1 = arith.constant 1 : index
    %c0_9 = arith.constant 0 : index
    %c0_10 = arith.constant 0 : index
    %9 = vector.load %arg3[%c0_8, %c1, %c0_9, %c0_10] : memref<16x4x3x256xf32, #tpu.memory_space<vmem>>, vector<16x1x1x256xf32>
    %10 = vector.shape_cast %9 : vector<16x1x1x256xf32> to vector<16x256xf32>
    %11 = vector.shape_cast %8 : vector<16x256xf32> to vector<16x1x1x256xf32>
    tpu.vector_store %arg3[%c0_8, %c1, %c0_9, %c0_10], %11 {strides = array<i32>} : memref<16x4x3x256xf32, #tpu.memory_space<vmem>>, vector<16x1x1x256xf32>,
    %12 = vector.extract_strided_slice %3 {offsets = [0, 512], sizes = [16, 256], strides = [1, 1]} : vector<16x1024xf32> to vector<16x256xf32>
    %c0_11 = arith.constant 0 : index
    %c2 = arith.constant 2 : index
    %c0_12 = arith.constant 0 : index
    %c0_13 = arith.constant 0 : index
    %13 = vector.load %arg3[%c0_11, %c2, %c0_12, %c0_13] : memref<16x4x3x256xf32, #tpu.memory_space<vmem>>, vector<16x1x1x256xf32>
    %14 = vector.shape_cast %13 : vector<16x1x1x256xf32> to vector<16x256xf32>
    %15 = vector.shape_cast %12 : vector<16x256xf32> to vector<16x1x1x256xf32>
    tpu.vector_store %arg3[%c0_11, %c2, %c0_12, %c0_13], %15 {strides = array<i32>} : memref<16x4x3x256xf32, #tpu.memory_space<vmem>>, vector<16x1x1x256xf32>,
    %16 = vector.extract_strided_slice %3 {offsets = [0, 768], sizes = [16, 256], strides = [1, 1]} : vector<16x1024xf32> to vector<16x256xf32>
    %c0_14 = arith.constant 0 : index
    %c3 = arith.constant 3 : index
    %c0_15 = arith.constant 0 : index
    %c0_16 = arith.constant 0 : index
    %17 = vector.load %arg3[%c0_14, %c3, %c0_15, %c0_16] : memref<16x4x3x256xf32, #tpu.memory_space<vmem>>, vector<16x1x1x256xf32>
    %18 = vector.shape_cast %17 : vector<16x1x1x256xf32> to vector<16x256xf32>
    %19 = vector.shape_cast %16 : vector<16x256xf32> to vector<16x1x1x256xf32>
    tpu.vector_store %arg3[%c0_14, %c3, %c0_15, %c0_16], %19 {strides = array<i32>} : memref<16x4x3x256xf32, #tpu.memory_space<vmem>>, vector<16x1x1x256xf32>,
    %c0_17 = arith.constant 0 : index
    %c1_18 = arith.constant 1 : index
    %c0_19 = arith.constant 0 : index
    %20 = vector.load %arg2[%c0_17, %c1_18, %c0_19] : memref<16x3x256xf32, #tpu.memory_space<vmem>>, vector<16x1x256xf32>
    %21 = vector.shape_cast %20 : vector<16x1x256xf32> to vector<16x256xf32>
    %cst_20 = arith.constant dense<0.000000e+00> : vector<16x1024xf32>
    %22 = tpu.matmul %21, %0, %cst_20 {dimension_numbers = #tpu.dot_dimension_numbers<[1], [0], [0], [1], [0, 0, 1, 1], [], []>} : vector<16x256xf32>, vector<256x1024xf32>, vector<16x1024xf32> -> vector<16x1024xf32>
    %23 = vector.extract_strided_slice %22 {offsets = [0, 0], sizes = [16, 256], strides = [1, 1]} : vector<16x1024xf32> to vector<16x256xf32>
    %c0_21 = arith.constant 0 : index
    %c0_22 = arith.constant 0 : index
    %c1_23 = arith.constant 1 : index
    %c0_24 = arith.constant 0 : index
    %24 = vector.load %arg3[%c0_21, %c0_22, %c1_23, %c0_24] : memref<16x4x3x256xf32, #tpu.memory_space<vmem>>, vector<16x1x1x256xf32>
    %25 = vector.shape_cast %24 : vector<16x1x1x256xf32> to vector<16x256xf32>
    %26 = vector.shape_cast %23 : vector<16x256xf32> to vector<16x1x1x256xf32>
    tpu.vector_store %arg3[%c0_21, %c0_22, %c1_23, %c0_24], %26 {strides = array<i32>} : memref<16x4x3x256xf32, #tpu.memory_space<vmem>>, vector<16x1x1x256xf32>,
    %27 = vector.extract_strided_slice %22 {offsets = [0, 256], sizes = [16, 256], strides = [1, 1]} : vector<16x1024xf32> to vector<16x256xf32>
    %c0_25 = arith.constant 0 : index
    %c1_26 = arith.constant 1 : index
    %c1_27 = arith.constant 1 : index
    %c0_28 = arith.constant 0 : index
    %28 = vector.load %arg3[%c0_25, %c1_26, %c1_27, %c0_28] : memref<16x4x3x256xf32, #tpu.memory_space<vmem>>, vector<16x1x1x256xf32>
    %29 = vector.shape_cast %28 : vector<16x1x1x256xf32> to vector<16x256xf32>
    %30 = vector.shape_cast %27 : vector<16x256xf32> to vector<16x1x1x256xf32>
    tpu.vector_store %arg3[%c0_25, %c1_26, %c1_27, %c0_28], %30 {strides = array<i32>} : memref<16x4x3x256xf32, #tpu.memory_space<vmem>>, vector<16x1x1x256xf32>,
    %31 = vector.extract_strided_slice %22 {offsets = [0, 512], sizes = [16, 256], strides = [1, 1]} : vector<16x1024xf32> to vector<16x256xf32>
    %c0_29 = arith.constant 0 : index
    %c2_30 = arith.constant 2 : index
    %c1_31 = arith.constant 1 : index
    %c0_32 = arith.constant 0 : index
    %32 = vector.load %arg3[%c0_29, %c2_30, %c1_31, %c0_32] : memref<16x4x3x256xf32, #tpu.memory_space<vmem>>, vector<16x1x1x256xf32>
    %33 = vector.shape_cast %32 : vector<16x1x1x256xf32> to vector<16x256xf32>
    %34 = vector.shape_cast %31 : vector<16x256xf32> to vector<16x1x1x256xf32>
    tpu.vector_store %arg3[%c0_29, %c2_30, %c1_31, %c0_32], %34 {strides = array<i32>} : memref<16x4x3x256xf32, #tpu.memory_space<vmem>>, vector<16x1x1x256xf32>,
    %35 = vector.extract_strided_slice %22 {offsets = [0, 768], sizes = [16, 256], strides = [1, 1]} : vector<16x1024xf32> to vector<16x256xf32>
    %c0_33 = arith.constant 0 : index
    %c3_34 = arith.constant 3 : index
    %c1_35 = arith.constant 1 : index
    %c0_36 = arith.constant 0 : index
    %36 = vector.load %arg3[%c0_33, %c3_34, %c1_35, %c0_36] : memref<16x4x3x256xf32, #tpu.memory_space<vmem>>, vector<16x1x1x256xf32>
    %37 = vector.shape_cast %36 : vector<16x1x1x256xf32> to vector<16x256xf32>
    %38 = vector.shape_cast %35 : vector<16x256xf32> to vector<16x1x1x256xf32>
    tpu.vector_store %arg3[%c0_33, %c3_34, %c1_35, %c0_36], %38 {strides = array<i32>} : memref<16x4x3x256xf32, #tpu.memory_space<vmem>>, vector<16x1x1x256xf32>,
    %c0_37 = arith.constant 0 : index
    %c2_38 = arith.constant 2 : index
    %c0_39 = arith.constant 0 : index
    %39 = vector.load %arg2[%c0_37, %c2_38, %c0_39] : memref<16x3x256xf32, #tpu.memory_space<vmem>>, vector<16x1x256xf32>
    %40 = vector.shape_cast %39 : vector<16x1x256xf32> to vector<16x256xf32>
    %cst_40 = arith.constant dense<0.000000e+00> : vector<16x1024xf32>
    %41 = tpu.matmul %40, %0, %cst_40 {dimension_numbers = #tpu.dot_dimension_numbers<[1], [0], [0], [1], [0, 0, 1, 1], [], []>} : vector<16x256xf32>, vector<256x1024xf32>, vector<16x1024xf32> -> vector<16x1024xf32>
    %42 = vector.extract_strided_slice %41 {offsets = [0, 0], sizes = [16, 256], strides = [1, 1]} : vector<16x1024xf32> to vector<16x256xf32>
    %c0_41 = arith.constant 0 : index
    %c0_42 = arith.constant 0 : index
    %c2_43 = arith.constant 2 : index
    %c0_44 = arith.constant 0 : index
    %43 = vector.load %arg3[%c0_41, %c0_42, %c2_43, %c0_44] : memref<16x4x3x256xf32, #tpu.memory_space<vmem>>, vector<16x1x1x256xf32>
    %44 = vector.shape_cast %43 : vector<16x1x1x256xf32> to vector<16x256xf32>
    %45 = vector.shape_cast %42 : vector<16x256xf32> to vector<16x1x1x256xf32>
    tpu.vector_store %arg3[%c0_41, %c0_42, %c2_43, %c0_44], %45 {strides = array<i32>} : memref<16x4x3x256xf32, #tpu.memory_space<vmem>>, vector<16x1x1x256xf32>,
    %46 = vector.extract_strided_slice %41 {offsets = [0, 256], sizes = [16, 256], strides = [1, 1]} : vector<16x1024xf32> to vector<16x256xf32>
    %c0_45 = arith.constant 0 : index
    %c1_46 = arith.constant 1 : index
    %c2_47 = arith.constant 2 : index
    %c0_48 = arith.constant 0 : index
    %47 = vector.load %arg3[%c0_45, %c1_46, %c2_47, %c0_48] : memref<16x4x3x256xf32, #tpu.memory_space<vmem>>, vector<16x1x1x256xf32>
    %48 = vector.shape_cast %47 : vector<16x1x1x256xf32> to vector<16x256xf32>
    %49 = vector.shape_cast %46 : vector<16x256xf32> to vector<16x1x1x256xf32>
    tpu.vector_store %arg3[%c0_45, %c1_46, %c2_47, %c0_48], %49 {strides = array<i32>} : memref<16x4x3x256xf32, #tpu.memory_space<vmem>>, vector<16x1x1x256xf32>,
    %50 = vector.extract_strided_slice %41 {offsets = [0, 512], sizes = [16, 256], strides = [1, 1]} : vector<16x1024xf32> to vector<16x256xf32>
    %c0_49 = arith.constant 0 : index
    %c2_50 = arith.constant 2 : index
    %c2_51 = arith.constant 2 : index
    %c0_52 = arith.constant 0 : index
    %51 = vector.load %arg3[%c0_49, %c2_50, %c2_51, %c0_52] : memref<16x4x3x256xf32, #tpu.memory_space<vmem>>, vector<16x1x1x256xf32>
    %52 = vector.shape_cast %51 : vector<16x1x1x256xf32> to vector<16x256xf32>
    %53 = vector.shape_cast %50 : vector<16x256xf32> to vector<16x1x1x256xf32>
    tpu.vector_store %arg3[%c0_49, %c2_50, %c2_51, %c0_52], %53 {strides = array<i32>} : memref<16x4x3x256xf32, #tpu.memory_space<vmem>>, vector<16x1x1x256xf32>,
    %54 = vector.extract_strided_slice %41 {offsets = [0, 768], sizes = [16, 256], strides = [1, 1]} : vector<16x1024xf32> to vector<16x256xf32>
    %c0_53 = arith.constant 0 : index
    %c3_54 = arith.constant 3 : index
    %c2_55 = arith.constant 2 : index
    %c0_56 = arith.constant 0 : index
    %55 = vector.load %arg3[%c0_53, %c3_54, %c2_55, %c0_56] : memref<16x4x3x256xf32, #tpu.memory_space<vmem>>, vector<16x1x1x256xf32>
    %56 = vector.shape_cast %55 : vector<16x1x1x256xf32> to vector<16x256xf32>
    %57 = vector.shape_cast %54 : vector<16x256xf32> to vector<16x1x1x256xf32>
    tpu.vector_store %arg3[%c0_53, %c3_54, %c2_55, %c0_56], %57 {strides = array<i32>} : memref<16x4x3x256xf32, #tpu.memory_space<vmem>>, vector<16x1x1x256xf32>,
    return
  }
  func.func @transform_0(%arg0: i32) -> (i32, i32) {
    %c0_i32 = arith.constant 0 : i32
    %c0_i32_0 = arith.constant 0 : i32
    %c0_i32_1 = arith.constant 0 : i32
    return %c0_i32, %c0_i32_0 : i32, i32
  }
  func.func @transform_1(%arg0: i32) -> (i32, i32, i32) {
    %c0_i32 = arith.constant 0 : i32
    %c0_i32_0 = arith.constant 0 : i32
    %c0_i32_1 = arith.constant 0 : i32
    return %arg0, %c0_i32, %c0_i32_0 : i32, i32, i32
  }
  func.func @transform_2(%arg0: i32) -> (i32, i32, i32, i32) {
    %c0_i32 = arith.constant 0 : i32
    %c0_i32_0 = arith.constant 0 : i32
    %c0_i32_1 = arith.constant 0 : i32
    %c0_i32_2 = arith.constant 0 : i32
    return %arg0, %c0_i32, %c0_i32_0, %c0_i32_1 : i32, i32, i32, i32
  }
}

</mosaic_0001>

<bundles_post_ra>
// kernel: tpu_custom_call.1
= control target key start
LH: loop header
LB: loop body
LE: loop exit
PB: predicated region body
PF: predicated region fallthrough
CT: control target
= control target key end

     0   :  { %7 = vsyncpa [#allocation3], 0  ;;  %s3379_s12 = smov [#allocation2]   ;;  %s3380_s14 = smov 1024   ;;  %s5572_s0 = inlined_call_operand.hbm [shape: f32[256,1024], index: 0, kind: input, shape index: {}]   ;;  %s5573_s1 = inlined_call_operand.vmem [shape: f32[16,3,256], index: 1, kind: input, shape index: {}]   ;;  %s5574_s2 = inlined_call_operand.vmem [shape: f32[16,4,3,256], index: 2, kind: output, shape index: {}]  }
   0x1   :  { %s12_s11 = sshll.u32 %s5572_s0, 4  ;;  %s14_s13 = sshll.u32 %s3379_s12, 4  ;;  %s13_s11 = int_to_ptr.hbm [resolvable:$true] %s12_s11  ;;  %s15_s13 = int_to_ptr.vmem [resolvable:$true] %s14_s13 }
   0x2   :  { %s3381_s15 = smov 64  }
   0x3   :  { %20 = dma.hbm_to_vmem [thread:$0]  %s13_s11, 32768, %s15_s13, [#allocation3], %s3380_s14, %s3380_s14, %s3381_s15  }
   0x4   :  { %3377 = dma.done.wait [#allocation3], 32768  }
   0x5   :  { %3378 = vsyncadd [#allocation3], 4294934528  ;;  %v148_v0 = vld [vmem:[#allocation2 + $0x3c8] sm:$0xff]  ;;  %v147_v6 = vld [vmem:[#allocation2 + $0x3c0] sm:$0xff]  ;;  %vm735_vm0 = vcmask 1040384   ;;  %vm737_vm1 = vcmask 1041409  }
   0x6   :  { %v276_v1 = vld [vmem:[#allocation2 + $0x7c8] sm:$0xff]  ;;  %407 = vmatpush.msra.mxu2 %v148_v0  ;;  %v275_v8 = vld [vmem:[#allocation2 + $0x7c0] sm:$0xff]  ;;  %361 = vmatpush.msra.mxu0 %v147_v6  ;;  %v150_v60 = vld [vmem:[#allocation2 + $0x3d8] sm:$0xff]  ;;  %vm740_vm2 = vcmask 1042434   ;;  %vm743_vm3 = vcmask 1043459   ;;  %vm746_vm4 = vcmask 1044484  }
   0x7   :  { %v140_v2 = vld [vmem:[#allocation2 + $0x388] sm:$0xff]  ;;  %430 = vmatpush.msra.mxu3 %v276_v1  ;;  %384 = vmatpush.msra.mxu1 %v275_v8  ;;  %v139_v10 = vld [vmem:[#allocation2 + $0x380] sm:$0xff]  ;;  %v278_v61 = vld [vmem:[#allocation2 + $0x7d8] sm:$0xff]  ;;  %vm749_vm5 = vcmask 1045509   ;;  %vm752_vm7 = vcmask 1046534   ;;  %vm755_vm8 = vcmask 1046528  }
   0x8   :  { %v268_v3 = vld [vmem:[#allocation2 + $0x788] sm:$0xff]  ;;  %408 = vmatpush.msra.mxu2 %v140_v2  ;;  %v267_v11 = vld [vmem:[#allocation2 + $0x780] sm:$0xff]  ;;  %362 = vmatpush.msra.mxu0 %v139_v10  ;;  %v142_v0 = vld [vmem:[#allocation2 + $0x398] sm:$0xff] }
   0x9   :  { %v132_v4 = vld [vmem:[#allocation2 + $0x348] sm:$0xff]  ;;  %431 = vmatpush.msra.mxu3 %v268_v3  ;;  %v131_v12 = vld [vmem:[#allocation2 + $0x340] sm:$0xff]  ;;  %385 = vmatpush.msra.mxu1 %v267_v11  ;;  %v270_v1 = vld [vmem:[#allocation2 + $0x798] sm:$0xff] }
   0xa   :  { %v260_v5 = vld [vmem:[#allocation2 + $0x748] sm:$0xff]  ;;  %409 = vmatpush.msra.mxu2 %v132_v4  ;;  %v259_v13 = vld [vmem:[#allocation2 + $0x740] sm:$0xff]  ;;  %363 = vmatpush.msra.mxu0 %v131_v12  ;;  %v134_v4 = vld [vmem:[#allocation2 + $0x358] sm:$0xff] }
   0xb   :  { %v124_v7 = vld [vmem:[#allocation2 + $0x308] sm:$0xff]  ;;  %432 = vmatpush.msra.mxu3 %v260_v5  ;;  %v123_v16 = vld [vmem:[#allocation2 + $0x300] sm:$0xff]  ;;  %386 = vmatpush.msra.mxu1 %v259_v13  ;;  %v262_v5 = vld [vmem:[#allocation2 + $0x758] sm:$0xff] }
   0xc   :  { %v252_v9 = vld [vmem:[#allocation2 + $0x708] sm:$0xff]  ;;  %410 = vmatpush.msra.mxu2 %v124_v7  ;;  %v251_v17 = vld [vmem:[#allocation2 + $0x700] sm:$0xff]  ;;  %364 = vmatpush.msra.mxu0 %v123_v16  ;;  %v149_v6 = vld [vmem:[#allocation2 + $0x3d0] sm:$0xff] }
   0xd   :  { %v116_v14 = vld [vmem:[#allocation2 + $0x2c8] sm:$0xff]  ;;  %433 = vmatpush.msra.mxu3 %v252_v9  ;;  %v115_v20 = vld [vmem:[#allocation2 + $0x2c0] sm:$0xff]  ;;  %387 = vmatpush.msra.mxu1 %v251_v17  ;;  %v277_v7 = vld [vmem:[#allocation2 + $0x7d0] sm:$0xff] }
   0xe   :  { %v244_v15 = vld [vmem:[#allocation2 + $0x6c8] sm:$0xff]  ;;  %411 = vmatpush.msra.mxu2 %v116_v14  ;;  %v243_v21 = vld [vmem:[#allocation2 + $0x6c0] sm:$0xff]  ;;  %365 = vmatpush.msra.mxu0 %v115_v20  ;;  %v126_v8 = vld [vmem:[#allocation2 + $0x318] sm:$0xff] }
   0xf   :  { %v108_v18 = vld [vmem:[#allocation2 + $0x288] sm:$0xff]  ;;  %434 = vmatpush.msra.mxu3 %v244_v15  ;;  %v107_v24 = vld [vmem:[#allocation2 + $0x280] sm:$0xff]  ;;  %388 = vmatpush.msra.mxu1 %v243_v21  ;;  %v254_v9 = vld [vmem:[#allocation2 + $0x718] sm:$0xff] }
  0x10   :  { %v236_v19 = vld [vmem:[#allocation2 + $0x688] sm:$0xff]  ;;  %412 = vmatpush.msra.mxu2 %v108_v18  ;;  %v235_v25 = vld [vmem:[#allocation2 + $0x680] sm:$0xff]  ;;  %366 = vmatpush.msra.mxu0 %v107_v24  ;;  %v141_v10 = vld [vmem:[#allocation2 + $0x390] sm:$0xff] }
  0x11   :  { %v100_v22 = vld [vmem:[#allocation2 + $0x248] sm:$0xff]  ;;  %435 = vmatpush.msra.mxu3 %v236_v19  ;;  %v99_v28 = vld [vmem:[#allocation2 + $0x240] sm:$0xff]  ;;  %389 = vmatpush.msra.mxu1 %v235_v25  ;;  %v269_v11 = vld [vmem:[#allocation2 + $0x790] sm:$0xff] }
  0x12   :  { %v228_v23 = vld [vmem:[#allocation2 + $0x648] sm:$0xff]  ;;  %413 = vmatpush.msra.mxu2 %v100_v22  ;;  %v227_v29 = vld [vmem:[#allocation2 + $0x640] sm:$0xff]  ;;  %367 = vmatpush.msra.mxu0 %v99_v28  ;;  %v118_v12 = vld [vmem:[#allocation2 + $0x2d8] sm:$0xff] }
  0x13   :  { %v92_v26 = vld [vmem:[#allocation2 + $0x208] sm:$0xff]  ;;  %436 = vmatpush.msra.mxu3 %v228_v23  ;;  %v91_v32 = vld [vmem:[#allocation2 + $0x200] sm:$0xff]  ;;  %390 = vmatpush.msra.mxu1 %v227_v29  ;;  %v246_v13 = vld [vmem:[#allocation2 + $0x6d8] sm:$0xff] }
  0x14   :  { %v220_v27 = vld [vmem:[#allocation2 + $0x608] sm:$0xff]  ;;  %414 = vmatpush.msra.mxu2 %v92_v26  ;;  %v219_v33 = vld [vmem:[#allocation2 + $0x600] sm:$0xff]  ;;  %368 = vmatpush.msra.mxu0 %v91_v32  ;;  %v133_v14 = vld [vmem:[#allocation2 + $0x350] sm:$0xff] }
  0x15   :  { %v84_v30 = vld [vmem:[#allocation2 + $0x1c8] sm:$0xff]  ;;  %437 = vmatpush.msra.mxu3 %v220_v27  ;;  %v83_v36 = vld [vmem:[#allocation2 + $0x1c0] sm:$0xff]  ;;  %391 = vmatpush.msra.mxu1 %v219_v33  ;;  %v261_v15 = vld [vmem:[#allocation2 + $0x750] sm:$0xff] }
  0x16   :  { %v212_v31 = vld [vmem:[#allocation2 + $0x5c8] sm:$0xff]  ;;  %415 = vmatpush.msra.mxu2 %v84_v30  ;;  %v211_v37 = vld [vmem:[#allocation2 + $0x5c0] sm:$0xff]  ;;  %369 = vmatpush.msra.mxu0 %v83_v36  ;;  %v110_v16 = vld [vmem:[#allocation2 + $0x298] sm:$0xff] }
  0x17   :  { %v76_v34 = vld [vmem:[#allocation2 + $0x188] sm:$0xff]  ;;  %438 = vmatpush.msra.mxu3 %v212_v31  ;;  %v75_v40 = vld [vmem:[#allocation2 + $0x180] sm:$0xff]  ;;  %392 = vmatpush.msra.mxu1 %v211_v37  ;;  %v238_v17 = vld [vmem:[#allocation2 + $0x698] sm:$0xff] }
  0x18   :  { %v204_v35 = vld [vmem:[#allocation2 + $0x588] sm:$0xff]  ;;  %416 = vmatpush.msra.mxu2 %v76_v34  ;;  %v203_v41 = vld [vmem:[#allocation2 + $0x580] sm:$0xff]  ;;  %370 = vmatpush.msra.mxu0 %v75_v40  ;;  %v102_v18 = vld [vmem:[#allocation2 + $0x258] sm:$0xff] }
  0x19   :  { %v68_v38 = vld [vmem:[#allocation2 + $0x148] sm:$0xff]  ;;  %439 = vmatpush.msra.mxu3 %v204_v35  ;;  %v67_v44 = vld [vmem:[#allocation2 + $0x140] sm:$0xff]  ;;  %393 = vmatpush.msra.mxu1 %v203_v41  ;;  %v230_v19 = vld [vmem:[#allocation2 + $0x658] sm:$0xff] }
  0x1a   :  { %v196_v39 = vld [vmem:[#allocation2 + $0x548] sm:$0xff]  ;;  %417 = vmatpush.msra.mxu2 %v68_v38  ;;  %v195_v45 = vld [vmem:[#allocation2 + $0x540] sm:$0xff]  ;;  %371 = vmatpush.msra.mxu0 %v67_v44  ;;  %v125_v20 = vld [vmem:[#allocation2 + $0x310] sm:$0xff] }
  0x1b   :  { %v60_v42 = vld [vmem:[#allocation2 + $0x108] sm:$0xff]  ;;  %440 = vmatpush.msra.mxu3 %v196_v39  ;;  %v59_v48 = vld [vmem:[#allocation2 + $0x100] sm:$0xff]  ;;  %394 = vmatpush.msra.mxu1 %v195_v45  ;;  %v253_v21 = vld [vmem:[#allocation2 + $0x710] sm:$0xff] }
  0x1c   :  { %v188_v43 = vld [vmem:[#allocation2 + $0x508] sm:$0xff]  ;;  %418 = vmatpush.msra.mxu2 %v60_v42  ;;  %v187_v49 = vld [vmem:[#allocation2 + $0x500] sm:$0xff]  ;;  %372 = vmatpush.msra.mxu0 %v59_v48  ;;  %v94_v22 = vld [vmem:[#allocation2 + $0x218] sm:$0xff] }
  0x1d   :  { %v52_v46 = vld [vmem:[#allocation2 + $0xc8] sm:$0xff]  ;;  %441 = vmatpush.msra.mxu3 %v188_v43  ;;  %v51_v52 = vld [vmem:[#allocation2 + $0xc0] sm:$0xff]  ;;  %395 = vmatpush.msra.mxu1 %v187_v49  ;;  %v222_v23 = vld [vmem:[#allocation2 + $0x618] sm:$0xff] }
  0x1e   :  { %v180_v47 = vld [vmem:[#allocation2 + $0x4c8] sm:$0xff]  ;;  %419 = vmatpush.msra.mxu2 %v52_v46  ;;  %v179_v53 = vld [vmem:[#allocation2 + $0x4c0] sm:$0xff]  ;;  %373 = vmatpush.msra.mxu0 %v51_v52  ;;  %v283_v24 = vld [vmem:[%s5573_s1] ss:$4 sm:$0x3] }
  0x1f   :  { %v44_v50 = vld [vmem:[#allocation2 + $0x88] sm:$0xff]  ;;  %442 = vmatpush.msra.mxu3 %v180_v47  ;;  %v43_v56 = vld [vmem:[#allocation2 + $0x80] sm:$0xff]  ;;  %396 = vmatpush.msra.mxu1 %v179_v53  ;;  %v3403_v25 = vld [vmem:[#allocation2 + $0x2d0] sm:$0xff]  ;;  %330 = vst [vmem:[#allocation1] ss:$9 sm:$0xff] %v283_v24 }
  0x20   :  { %v172_v51 = vld [vmem:[#allocation2 + $0x488] sm:$0xff]  ;;  %420 = vmatpush.msra.mxu2 %v44_v50  ;;  %v171_v57 = vld [vmem:[#allocation2 + $0x480] sm:$0xff]  ;;  %374 = vmatpush.msra.mxu0 %v43_v56  ;;  %v3405_v26 = vld [vmem:[#allocation2 + $0x6d0] sm:$0xff] }
  0x21   :  { %v36_v54 = vld [vmem:[#allocation2 + $0x48] sm:$0xff]  ;;  %443 = vmatpush.msra.mxu3 %v172_v51  ;;  %397 = vmatpush.msra.mxu1 %v171_v57  ;;  %v35_v62 = vld [vmem:[#allocation2 + $0x40] sm:$0xff]  ;;  %v3410_v28 = vld [vmem:[#allocation2 + $0x1d8] sm:$0xff] }
  0x22   :  { %v164_v55 = vld [vmem:[#allocation2 + $0x448] sm:$0xff]  ;;  %421 = vmatpush.msra.mxu2 %v36_v54  ;;  %v163_v63 = vld [vmem:[#allocation2 + $0x440] sm:$0xff]  ;;  %375 = vmatpush.msra.mxu0 %v35_v62  ;;  %v3412_v29 = vld [vmem:[#allocation2 + $0x5d8] sm:$0xff] }
  0x23   :  { %v28_v58 = vld [vmem:[#allocation2 + $0x8] sm:$0xff]  ;;  %444 = vmatpush.msra.mxu3 %v164_v55  ;;  %v27_v2 = vld [vmem:[#allocation2] sm:$0xff]  ;;  %398 = vmatpush.msra.mxu1 %v163_v63  ;;  %v3414_v30 = vld [vmem:[#allocation2 + $0x290] sm:$0xff] }
  0x24   :  { %v156_v59 = vld [vmem:[#allocation2 + $0x408] sm:$0xff]  ;;  %422 = vmatpush.msra.mxu2 %v28_v58  ;;  %v155_v3 = vld [vmem:[#allocation2 + $0x400] sm:$0xff]  ;;  %376 = vmatpush.msra.mxu0 %v27_v2  ;;  %v3419_v32 = vld [vmem:[#allocation2 + $0x690] sm:$0xff] }
  0x25   :  { %445 = vmatpush.msra.mxu3 %v156_v59  ;;  %399 = vmatpush.msra.mxu1 %v155_v3  ;;  %v2788_v27 = vld [vmem:[%s5573_s1 + $0x8] ss:$4 sm:$0x3]  ;;  %v2789_v31 = vld [vmem:[%s5573_s1 + $0x10] ss:$4 sm:$0x3] }
  0x26   :  { %499 = vmatpush.msrb.mxu2 %v150_v60  ;;  %453 = vmatpush.msrb.mxu0 %v149_v6  ;;  %v2790_v33 = vld [vmem:[%s5573_s1 + $0x18] ss:$4 sm:$0x3]  ;;  %v3426_v34 = vld [vmem:[#allocation2 + $0x198] sm:$0xff]  ;;  %332 = vst [vmem:[#allocation1 + $0x1] ss:$9 sm:$0xff] %v2788_v27 }
  0x27   :  { %522 = vmatpush.msrb.mxu3 %v278_v61  ;;  %476 = vmatpush.msrb.mxu1 %v277_v7  ;;  %v3428_v35 = vld [vmem:[#allocation2 + $0x598] sm:$0xff]  ;;  %v3430_v36 = vld [vmem:[#allocation2 + $0x250] sm:$0xff]  ;;  %v2792_v39 = vld [vmem:[%s5573_s1 + $0x28] ss:$4 sm:$0x3] }
  0x28   :  { %500 = vmatpush.msrb.mxu2 %v142_v0  ;;  %454 = vmatpush.msrb.mxu0 %v141_v10  ;;  %v2791_v37 = vld [vmem:[%s5573_s1 + $0x20] ss:$4 sm:$0x3]  ;;  %v3435_v38 = vld [vmem:[#allocation2 + $0x650] sm:$0xff]  ;;  %334 = vst [vmem:[#allocation1 + $0x2] ss:$9 sm:$0xff] %v2789_v31 }
  0x29   :  { %523 = vmatpush.msrb.mxu3 %v270_v1  ;;  %477 = vmatpush.msrb.mxu1 %v269_v11  ;;  %v3442_v40 = vld [vmem:[#allocation2 + $0x210] sm:$0xff]  ;;  %v2793_v41 = vld [vmem:[%s5573_s1 + $0x30] ss:$4 sm:$0x3]  ;;  %336 = vst [vmem:[#allocation1 + $0x3] ss:$9 sm:$0xff] %v2790_v33 }
  0x2a   :  { %501 = vmatpush.msrb.mxu2 %v134_v4  ;;  %455 = vmatpush.msrb.mxu0 %v133_v14  ;;  %v3449_v42 = vld [vmem:[#allocation2 + $0x610] sm:$0xff]  ;;  %338 = vst [vmem:[#allocation1 + $0x4] ss:$9 sm:$0xff] %v2791_v37  ;;  %v3456_v44 = vld [vmem:[#allocation2 + $0x158] sm:$0xff]  ;;  %v152_v2 = vld [vmem:[#allocation2 + $0x3e8] sm:$0xff] }
  0x2b   :  { %524 = vmatpush.msrb.mxu3 %v262_v5  ;;  %478 = vmatpush.msrb.mxu1 %v261_v15  ;;  %v2794_v43 = vld [vmem:[%s5573_s1 + $0x38] ss:$4 sm:$0x3]  ;;  %v3458_v45 = vld [vmem:[#allocation2 + $0x558] sm:$0xff]  ;;  %340 = vst [vmem:[#allocation1 + $0x5] ss:$9 sm:$0xff] %v2792_v39 }
  0x2c   :  { %502 = vmatpush.msrb.mxu2 %v126_v8  ;;  %456 = vmatpush.msrb.mxu0 %v125_v20  ;;  %v3462_v46 = vld [vmem:[#allocation2 + $0x1d0] sm:$0xff]  ;;  %342 = vst [vmem:[#allocation1 + $0x6] ss:$9 sm:$0xff] %v2793_v41  ;;  %v3468_v48 = vld [vmem:[#allocation2 + $0x118] sm:$0xff]  ;;  %v280_v3 = vld [vmem:[#allocation2 + $0x7e8] sm:$0xff] }
  0x2d   :  { %525 = vmatpush.msrb.mxu3 %v254_v9  ;;  %479 = vmatpush.msrb.mxu1 %v253_v21  ;;  %v3464_v47 = vld [vmem:[#allocation2 + $0x5d0] sm:$0xff]  ;;  %v3470_v49 = vld [vmem:[#allocation2 + $0x518] sm:$0xff]  ;;  %344 = vst [vmem:[#allocation1 + $0x7] ss:$9 sm:$0xff] %v2794_v43  ;;  %v144_v6 = vld [vmem:[#allocation2 + $0x3a8] sm:$0xff] }
  0x2e   :  { %503 = vmatpush.msrb.mxu2 %v118_v12  ;;  %457 = vmatpush.msrb.mxu0 %v3403_v25  ;;  %v3474_v50 = vld [vmem:[#allocation2 + $0x190] sm:$0xff]  ;;  %v3480_v52 = vld [vmem:[#allocation2 + $0xd8] sm:$0xff]  ;;  %v272_v7 = vld [vmem:[#allocation2 + $0x7a8] sm:$0xff] }
  0x2f   :  { %526 = vmatpush.msrb.mxu3 %v246_v13  ;;  %480 = vmatpush.msrb.mxu1 %v3405_v26  ;;  %v3476_v51 = vld [vmem:[#allocation2 + $0x590] sm:$0xff]  ;;  %v3482_v53 = vld [vmem:[#allocation2 + $0x4d8] sm:$0xff]  ;;  %v136_v11 = vld [vmem:[#allocation2 + $0x368] sm:$0xff] }
  0x30   :  { %504 = vmatpush.msrb.mxu2 %v110_v16  ;;  %458 = vmatpush.msrb.mxu0 %v3414_v30  ;;  %v69_v54 = vld [vmem:[#allocation2 + $0x150] sm:$0xff]  ;;  %v3488_v56 = vld [vmem:[#allocation2 + $0x98] sm:$0xff]  ;;  %v264_v12 = vld [vmem:[#allocation2 + $0x768] sm:$0xff] }
  0x31   :  { %527 = vmatpush.msrb.mxu3 %v238_v17  ;;  %481 = vmatpush.msrb.mxu1 %v3419_v32  ;;  %v197_v55 = vld [vmem:[#allocation2 + $0x550] sm:$0xff]  ;;  %v3490_v57 = vld [vmem:[#allocation2 + $0x498] sm:$0xff]  ;;  %v2796_v13 = vld [vmem:[%s5573_s1 + $0x48] ss:$4 sm:$0x3] }
  0x32   :  { %505 = vmatpush.msrb.mxu2 %v102_v18  ;;  %459 = vmatpush.msrb.mxu0 %v3430_v36  ;;  %v61_v58 = vld [vmem:[#allocation2 + $0x110] sm:$0xff]  ;;  %v3494_v60 = vld [vmem:[#allocation2 + $0x58] sm:$0xff]  ;;  %v2797_v16 = vld [vmem:[%s5573_s1 + $0x50] ss:$4 sm:$0x3] }
  0x33   :  { %528 = vmatpush.msrb.mxu3 %v230_v19  ;;  %482 = vmatpush.msrb.mxu1 %v3435_v38  ;;  %v189_v59 = vld [vmem:[#allocation2 + $0x510] sm:$0xff]  ;;  %v3496_v61 = vld [vmem:[#allocation2 + $0x458] sm:$0xff]  ;;  %v3517_v17 = vld [vmem:[#allocation2 + $0x328] sm:$0xff] }
  0x34   :  { %506 = vmatpush.msrb.mxu2 %v94_v22  ;;  %460 = vmatpush.msrb.mxu0 %v3442_v40  ;;  %v30_v62 = vld [vmem:[#allocation2 + $0x18] sm:$0xff]  ;;  %v3502_v1 = vld [vmem:[#allocation1 + $0x9] sm:$0xff]  ;;  %v53_v4 = vld [vmem:[#allocation2 + $0xd0] sm:$0xff] }
  0x35   :  { %529 = vmatpush.msrb.mxu3 %v222_v23  ;;  %483 = vmatpush.msrb.mxu1 %v3449_v42  ;;  %v158_v63 = vld [vmem:[#allocation2 + $0x418] sm:$0xff]  ;;  %v181_v5 = vld [vmem:[#allocation2 + $0x4d0] sm:$0xff]  ;;  %v3522_v19 = vld [vmem:[#allocation2 + $0x728] sm:$0xff] }
  0x36   :  { %507 = vmatpush.msrb.mxu2 %v3410_v28  ;;  %461 = vmatpush.msrb.mxu0 %v3462_v46  ;;  %v3500_v0 = vld [vmem:[#allocation1] sm:$0xff]  ;;  %v45_v8 = vld [vmem:[#allocation2 + $0x90] sm:$0xff]  ;;  %v2800_v22 = vld [vmem:[%s5573_s1 + $0x68] ss:$4 sm:$0x3] }
  0x37   :  { %530 = vmatpush.msrb.mxu3 %v3412_v29  ;;  %484 = vmatpush.msrb.mxu1 %v3464_v47  ;;  %v173_v9 = vld [vmem:[#allocation2 + $0x490] sm:$0xff]  ;;  %v2795_v10 = vld [vmem:[%s5573_s1 + $0x40] ss:$4 sm:$0x3]  ;;  %348 = vst [vmem:[#allocation1 + $0x1] ss:$9 sm:$0xff] %v2796_v13 }
  0x38   :  { %508 = vmatpush.msrb.mxu2 %v3426_v34  ;;  %462 = vmatpush.msrb.mxu0 %v3474_v50  ;;  %v37_v14 = vld [vmem:[#allocation2 + $0x50] sm:$0xff]  ;;  %347 = vst [vmem:[#allocation1] ss:$9 sm:$0xff] %v2795_v10  ;;  %v2799_v20 = vld [vmem:[%s5573_s1 + $0x60] ss:$4 sm:$0x3] }
  0x39   :  { %531 = vmatpush.msrb.mxu3 %v3428_v35  ;;  %485 = vmatpush.msrb.mxu1 %v3476_v51  ;;  %v165_v15 = vld [vmem:[#allocation2 + $0x450] sm:$0xff]  ;;  %349 = vst [vmem:[#allocation1 + $0x2] ss:$9 sm:$0xff] %v2797_v16  ;;  %v2801_v24 = vld [vmem:[%s5573_s1 + $0x70] ss:$4 sm:$0x3] }
  0x3a   :  { %509 = vmatpush.msrb.mxu2 %v3456_v44  ;;  %463 = vmatpush.msrb.mxu0 %v69_v54  ;;  %v2798_v18 = vld [vmem:[%s5573_s1 + $0x58] ss:$4 sm:$0x3]  ;;  %351 = vst [vmem:[#allocation1 + $0x4] ss:$9 sm:$0xff] %v2799_v20  ;;  %v3542_v31 = vld [vmem:[#allocation2 + $0x3e0] sm:$0xff] }
  0x3b   :  { %532 = vmatpush.msrb.mxu3 %v3458_v45  ;;  %486 = vmatpush.msrb.mxu1 %v197_v55  ;;  %v3527_v21 = vld [vmem:[#allocation2 + $0x10] sm:$0xff]  ;;  %350 = vst [vmem:[#allocation1 + $0x3] ss:$9 sm:$0xff] %v2798_v18  ;;  %v3544_v33 = vld [vmem:[#allocation2 + $0x7e0] sm:$0xff]  ;;  %v3548_v37 = vld [vmem:[#allocation2 + $0x2e8] sm:$0xff] }
  0x3c   :  { %510 = vmatpush.msrb.mxu2 %v3468_v48  ;;  %464 = vmatpush.msrb.mxu0 %v61_v58  ;;  %v3532_v23 = vld [vmem:[#allocation2 + $0x410] sm:$0xff]  ;;  %352 = vst [vmem:[#allocation1 + $0x5] ss:$9 sm:$0xff] %v2800_v22  ;;  %v3550_v39 = vld [vmem:[#allocation2 + $0x6e8] sm:$0xff]  ;;  %v3554_v41 = vld [vmem:[#allocation2 + $0x3a0] sm:$0xff] }
  0x3d   :  { %533 = vmatpush.msrb.mxu3 %v3470_v49  ;;  %487 = vmatpush.msrb.mxu1 %v189_v59  ;;  %v2802_v27 = vld [vmem:[%s5573_s1 + $0x78] ss:$4 sm:$0x3]  ;;  %353 = vst [vmem:[#allocation1 + $0x6] ss:$9 sm:$0xff] %v2801_v24  ;;  %v3556_v43 = vld [vmem:[#allocation2 + $0x7a0] sm:$0xff] }
  0x3e   :  { %511 = vmatpush.msrb.mxu2 %v3480_v52  ;;  %446 = vmatmul.f32.vlgmr.msra.gmra.mxu3 %v3502_v1  ;;  %354 = vst [vmem:[#allocation1 + $0x7] ss:$9 sm:$0xff] %v2802_v27  ;;  %v3560_v54 = vld [vmem:[#allocation2 + $0x2a8] sm:$0xff]  ;;  %v3566_v58 = vld [vmem:[#allocation2 + $0x360] sm:$0xff] }
  0x3f   :  { %534 = vmatpush.msrb.mxu3 %v3482_v53  ;;  %423 = vmatmul.f32.vlgmr.msra.gmra.mxu2 %v3500_v0  ;;  %v3562_v55 = vld [vmem:[#allocation2 + $0x6a8] sm:$0xff]  ;;  %v3568_v59 = vld [vmem:[#allocation2 + $0x760] sm:$0xff] }
  0x40   :  { %512 = vmatpush.msrb.mxu2 %v3488_v56  ;;  %465 = vmatpush.msrb.mxu0 %v53_v4  ;;  %v3584_v4 = vld [vmem:[#allocation2 + $0x228] sm:$0xff]  ;;  %v3602_v10 = vld [vmem:[#allocation2 + $0x2a0] sm:$0xff] }
  0x41   :  { %535 = vmatpush.msrb.mxu3 %v3490_v57  ;;  %488 = vmatpush.msrb.mxu1 %v181_v5  ;;  %v3586_v5 = vld [vmem:[#allocation2 + $0x628] sm:$0xff]  ;;  %5717 = vst [vmem:[#allocation7_spill] sm:$0xff] %v3602_v10  ;;  %v3626_v20 = vld [vmem:[#allocation2 + $0x220] sm:$0xff] }
  0x42   :  { %513 = vmatpush.msrb.mxu2 %v3494_v60  ;;  %466 = vmatpush.msrb.mxu0 %v45_v8  ;;  %v3596_v8 = vld [vmem:[#allocation2 + $0x1e8] sm:$0xff]  ;;  %5725 = vst [vmem:[#allocation15_spill] sm:$0xff] %v3626_v20  ;;  %v3628_v22 = vld [vmem:[#allocation2 + $0x620] sm:$0xff] }
  0x43   :  { %536 = vmatpush.msrb.mxu3 %v3496_v61  ;;  %489 = vmatpush.msrb.mxu1 %v173_v9  ;;  %5715 = vst [vmem:[#allocation5_spill] sm:$0xff] %v3596_v8  ;;  %v3598_v9 = vld [vmem:[#allocation2 + $0x5e8] sm:$0xff] }
  0x44   :  { %514 = vmatpush.msrb.mxu2 %v30_v62  ;;  %467 = vmatpush.msrb.mxu0 %v37_v14  ;;  %v3572_v62 = vld [vmem:[#allocation2 + $0x268] sm:$0xff]  ;;  %5716 = vst [vmem:[#allocation6_spill] sm:$0xff] %v3598_v9  ;;  %v3614_v14 = vld [vmem:[#allocation2 + $0x260] sm:$0xff] }
  0x45   :  { %537 = vmatpush.msrb.mxu3 %v158_v63  ;;  %490 = vmatpush.msrb.mxu1 %v165_v15  ;;  %v3574_v63 = vld [vmem:[#allocation2 + $0x668] sm:$0xff]  ;;  %5721 = vst [vmem:[#allocation11_spill] sm:$0xff] %v3614_v14  ;;  %v3616_v15 = vld [vmem:[#allocation2 + $0x660] sm:$0xff] }
  0x46   :  { %591 = vmatpush.msra.mxu2 %v152_v2  ;;  %468 = vmatpush.msrb.mxu0 %v3527_v21  ;;  %v3578_v2 = vld [vmem:[#allocation2 + $0x320] sm:$0xff]  ;;  %v3610_v13 = vld [vmem:[#allocation2 + $0x5a8] sm:$0xff]  ;;  %5722 = vst [vmem:[#allocation12_spill] sm:$0xff] %v3616_v15 }
  0x47   :  { %614 = vmatpush.msra.mxu3 %v280_v3  ;;  %491 = vmatpush.msrb.mxu1 %v3532_v23  ;;  %v3580_v3 = vld [vmem:[#allocation2 + $0x720] sm:$0xff]  ;;  %5720 = vst [vmem:[#allocation10_spill] sm:$0xff] %v3610_v13  ;;  %v3620_v16 = vld [vmem:[#allocation2 + $0x168] sm:$0xff] }
  0x48   :  { %592 = vmatpush.msra.mxu2 %v144_v6  ;;  %377 = vmatmul.f32.vlgmr.msra.gmra.mxu0 %v3500_v0  ;;  %v3590_v6 = vld [vmem:[#allocation2 + $0x2e0] sm:$0xff]  ;;  %5723 = vst [vmem:[#allocation13_spill] sm:$0xff] %v3620_v16  ;;  %v3622_v18 = vld [vmem:[#allocation2 + $0x568] sm:$0xff] }
  0x49   :  { %615 = vmatpush.msra.mxu3 %v272_v7  ;;  %400 = vmatmul.f32.vlgmr.msra.gmra.mxu1 %v3502_v1  ;;  %v3592_v7 = vld [vmem:[#allocation2 + $0x6e0] sm:$0xff]  ;;  %5724 = vst [vmem:[#allocation14_spill] sm:$0xff] %v3622_v18  ;;  %v3632_v24 = vld [vmem:[#allocation2 + $0x128] sm:$0xff] }
  0x4a   :  { %593 = vmatpush.msra.mxu2 %v136_v11  ;;  %545 = vmatpush.msra.mxu0 %v3542_v31  ;;  %v3604_v11 = vld [vmem:[#allocation2 + $0x6a0] sm:$0xff]  ;;  %5726 = vst [vmem:[#allocation16_spill] sm:$0xff] %v3628_v22  ;;  %v3634_v27 = vld [vmem:[#allocation2 + $0x528] sm:$0xff] }
  0x4b   :  { %616 = vmatpush.msra.mxu3 %v264_v12  ;;  %568 = vmatpush.msra.mxu1 %v3544_v33  ;;  %5718 = vst [vmem:[#allocation8_spill] sm:$0xff] %v3604_v11  ;;  %v3608_v12 = vld [vmem:[#allocation2 + $0x1a8] sm:$0xff] }
  0x4c   :  { %594 = vmatpush.msra.mxu2 %v3517_v17  ;;  %546 = vmatpush.msra.mxu0 %v3554_v41  ;;  %5719 = vst [vmem:[#allocation9_spill] sm:$0xff] %v3608_v12 }
  0x4d   :  { %617 = vmatpush.msra.mxu3 %v3522_v19  ;;  %569 = vmatpush.msra.mxu1 %v3556_v43  ;;  %5727 = vst [vmem:[#allocation17_spill] sm:$0xff] %v3632_v24 }
  0x4e   :  { %595 = vmatpush.msra.mxu2 %v3548_v37  ;;  %547 = vmatpush.msra.mxu0 %v3566_v58  ;;  %5728 = vst [vmem:[#allocation18_spill] sm:$0xff] %v3634_v27 }
  0x4f   :  { %618 = vmatpush.msra.mxu3 %v3550_v39  ;;  %570 = vmatpush.msra.mxu1 %v3568_v59 }
  0x50   :  { %596 = vmatpush.msra.mxu2 %v3560_v54  ;;  %548 = vmatpush.msra.mxu0 %v3578_v2 }
  0x51   :  { %619 = vmatpush.msra.mxu3 %v3562_v55  ;;  %571 = vmatpush.msra.mxu1 %v3580_v3 }
  0x52   :  { %597 = vmatpush.msra.mxu2 %v3572_v62  ;;  %549 = vmatpush.msra.mxu0 %v3590_v6 }
  0x53   :  { %620 = vmatpush.msra.mxu3 %v3574_v63  ;;  %572 = vmatpush.msra.mxu1 %v3592_v7 }
  0x54   :  { %598 = vmatpush.msra.mxu2 %v3584_v4  ;;  %550 = vmatpush.msra.mxu0 %v3602_v10  ;;  %v3670_v10 = vld [vmem:[#allocation2 + $0x560] sm:$0xff] }
  0x55   :  { %621 = vmatpush.msra.mxu3 %v3586_v5  ;;  %573 = vmatpush.msra.mxu1 %v3604_v11  ;;  %v3638_v11 = vld [vmem:[#allocation1] sm:$0xff]  ;;  %5738 = vst [vmem:[#allocation28_spill] sm:$0xff] %v3670_v10 }
  0x56   :  { %599 = vmatpush.msra.mxu2 %v3596_v8  ;;  %551 = vmatpush.msra.mxu0 %v3614_v14  ;;  %v3646_v14 = vld [vmem:[#allocation2 + $0x5e0] sm:$0xff] }
  0x57   :  { %622 = vmatpush.msra.mxu3 %v3598_v9  ;;  %574 = vmatpush.msra.mxu1 %v3616_v15  ;;  %5730 = vst [vmem:[#allocation20_spill] sm:$0xff] %v3646_v14  ;;  %v3650_v15 = vld [vmem:[#allocation2 + $0xe8] sm:$0xff]  ;;  %v3096_v8 = vld [vmem:[#allocation2 + $0x440] sm:$0xff] }
  0x58   :  { %600 = vmatpush.msra.mxu2 %v3608_v12  ;;  %v3640_v12 = vld [vmem:[#allocation1 + $0x9] sm:$0xff]  ;;  %552 = vmatpush.msra.mxu0 %v3626_v20  ;;  %5731 = vst [vmem:[#allocation21_spill] sm:$0xff] %v3650_v15 }
  0x59   :  { %623 = vmatpush.msra.mxu3 %v3610_v13  ;;  %575 = vmatpush.msra.mxu1 %v3628_v22  ;;  %v3644_v13 = vld [vmem:[#allocation2 + $0x1e0] sm:$0xff]  ;;  %v3662_v22 = vld [vmem:[#allocation2 + $0xa8] sm:$0xff] }
  0x5a   :  { %601 = vmatpush.msra.mxu2 %v3620_v16  ;;  %5729 = vst [vmem:[#allocation19_spill] sm:$0xff] %v3644_v13  ;;  %v3652_v16 = vld [vmem:[#allocation2 + $0x4e8] sm:$0xff]  ;;  %449 = vmatmul.f32.gmra.mxu3 %v3640_v12  ;;  %v3658_v20 = vld [vmem:[#allocation2 + $0x5a0] sm:$0xff] }
  0x5b   :  { %624 = vmatpush.msra.mxu3 %v3622_v18  ;;  %5732 = vst [vmem:[#allocation22_spill] sm:$0xff] %v3652_v16  ;;  %426 = vmatmul.f32.gmra.mxu2 %v3638_v11  ;;  %v3656_v18 = vld [vmem:[#allocation2 + $0x1a0] sm:$0xff]  ;;  %v3674_v9 = vld [vmem:[#allocation2 + $0x68] sm:$0xff] }
  0x5c   :  { %602 = vmatpush.msra.mxu2 %v3632_v24  ;;  %5733 = vst [vmem:[#allocation23_spill] sm:$0xff] %v3656_v18  ;;  %553 = vmatpush.msra.mxu0 %v3644_v13  ;;  %v3664_v24 = vld [vmem:[#allocation2 + $0x4a8] sm:$0xff] }
  0x5d   :  { %625 = vmatpush.msra.mxu3 %v3634_v27  ;;  %5734 = vst [vmem:[#allocation24_spill] sm:$0xff] %v3658_v20  ;;  %576 = vmatpush.msra.mxu1 %v3646_v14  ;;  %v3668_v27 = vld [vmem:[#allocation2 + $0x160] sm:$0xff]  ;;  %v3676_v13 = vld [vmem:[#allocation2 + $0x468] sm:$0xff] }
  0x5e   :  { %5735 = vst [vmem:[#allocation25_spill] sm:$0xff] %v3662_v22  ;;  %603 = vmatpush.msra.mxu2 %v3650_v15  ;;  %554 = vmatpush.msra.mxu0 %v3656_v18  ;;  %v3680_v14 = vld [vmem:[#allocation2 + $0x120] sm:$0xff]  ;;  %v3688_v18 = vld [vmem:[#allocation2 + $0x428] sm:$0xff] }
  0x5f   :  { %5736 = vst [vmem:[#allocation26_spill] sm:$0xff] %v3664_v24  ;;  %626 = vmatpush.msra.mxu3 %v3652_v16  ;;  %577 = vmatpush.msra.mxu1 %v3658_v20  ;;  %v3682_v15 = vld [vmem:[#allocation2 + $0x520] sm:$0xff]  ;;  %v3686_v16 = vld [vmem:[#allocation2 + $0x28] sm:$0xff] }
  0x60   :  { %5737 = vst [vmem:[#allocation27_spill] sm:$0xff] %v3668_v27  ;;  %604 = vmatpush.msra.mxu2 %v3662_v22  ;;  %555 = vmatpush.msra.mxu0 %v3668_v27  ;;  %v3698_v27 = vld [vmem:[#allocation2 + $0x7f8] sm:$0xff]  ;;  %v3726_v20 = vld [vmem:[#allocation2 + $0x60] sm:$0xff] }
  0x61   :  { %5739 = vst [vmem:[#allocation29_spill] sm:$0xff] %v3674_v9  ;;  %627 = vmatpush.msra.mxu3 %v3664_v24  ;;  %578 = vmatpush.msra.mxu1 %v3670_v10  ;;  %v3696_v24 = vld [vmem:[#allocation2 + $0x3f8] sm:$0xff]  ;;  %v3702_v10 = vld [vmem:[#allocation2 + $0xe0] sm:$0xff] }
  0x62   :  { %5740 = vst [vmem:[#allocation30_spill] sm:$0xff] %v3676_v13  ;;  %605 = vmatpush.msra.mxu2 %v3674_v9  ;;  %556 = vmatpush.msra.mxu0 %v3680_v14  ;;  %v3704_v9 = vld [vmem:[#allocation2 + $0x4e0] sm:$0xff]  ;;  %v3722_v22 = vld [vmem:[#allocation2 + $0x778] sm:$0xff] }
  0x63   :  { %5741 = vst [vmem:[#allocation31_spill] sm:$0xff] %v3680_v14  ;;  %628 = vmatpush.msra.mxu3 %v3676_v13  ;;  %579 = vmatpush.msra.mxu1 %v3682_v15  ;;  %v3716_v14 = vld [vmem:[#allocation2 + $0x4a0] sm:$0xff]  ;;  %v3720_v13 = vld [vmem:[#allocation2 + $0x378] sm:$0xff] }
  0x64   :  { %5742 = vst [vmem:[#allocation32_spill] sm:$0xff] %v3682_v15  ;;  %606 = vmatpush.msra.mxu2 %v3686_v16  ;;  %380 = vmatmul.f32.gmra.mxu0 %v3638_v11  ;;  %v3708_v15 = vld [vmem:[#allocation2 + $0x3b8] sm:$0xff] }
  0x65   :  { %5743 = vst [vmem:[#allocation33_spill] sm:$0xff] %v3686_v16  ;;  %629 = vmatpush.msra.mxu3 %v3688_v18  ;;  %403 = vmatmul.f32.gmra.mxu1 %v3640_v12  ;;  %v3710_v16 = vld [vmem:[#allocation2 + $0x7b8] sm:$0xff] }
  0x66   :  { %5744 = vst [vmem:[#allocation34_spill] sm:$0xff] %v3688_v18  ;;  %515 = vmatmul.f32.vlgmr.msrb.gmra.mxu2 %v3500_v0  ;;  %538 = vmatmul.f32.vlgmr.msrb.gmra.mxu3 %v3502_v1  ;;  %v3714_v18 = vld [vmem:[#allocation2 + $0xa0] sm:$0xff] }
  0x67   :  { %5745 = vst [vmem:[#allocation35_spill] sm:$0xff] %v3696_v24  ;;  %683 = vmatpush.msrb.mxu2 %v3696_v24  ;;  %706 = vmatpush.msrb.mxu3 %v3698_v27  ;;  %v3728_v24 = vld [vmem:[#allocation2 + $0x460] sm:$0xff] }
  0x68   :  { %5746 = vst [vmem:[#allocation36_spill] sm:$0xff] %v3698_v27  ;;  %557 = vmatpush.msra.mxu0 %v3702_v10  ;;  %580 = vmatpush.msra.mxu1 %v3704_v9  ;;  %v3732_v27 = vld [vmem:[#allocation2 + $0x338] sm:$0xff] }
  0x69   :  { %5747 = vst [vmem:[#allocation37_spill] sm:$0xff] %v3702_v10  ;;  %684 = vmatpush.msrb.mxu2 %v3708_v15  ;;  %707 = vmatpush.msrb.mxu3 %v3710_v16  ;;  %v3734_v10 = vld [vmem:[#allocation2 + $0x738] sm:$0xff] }
  0x6a   :  { %5748 = vst [vmem:[#allocation38_spill] sm:$0xff] %v3704_v9  ;;  %558 = vmatpush.msra.mxu0 %v3714_v18  ;;  %581 = vmatpush.msra.mxu1 %v3716_v14  ;;  %v3738_v9 = vld [vmem:[#allocation2 + $0x20] sm:$0xff] }
  0x6b   :  { %5749 = vst [vmem:[#allocation39_spill] sm:$0xff] %v3708_v15  ;;  %685 = vmatpush.msrb.mxu2 %v3720_v13  ;;  %708 = vmatpush.msrb.mxu3 %v3722_v22  ;;  %v3740_v15 = vld [vmem:[#allocation2 + $0x420] sm:$0xff] }
  0x6c   :  { %5750 = vst [vmem:[#allocation40_spill] sm:$0xff] %v3710_v16  ;;  %559 = vmatpush.msra.mxu0 %v3726_v20  ;;  %582 = vmatpush.msra.mxu1 %v3728_v24  ;;  %v3776_v16 = vld [vmem:[#allocation2 + $0x278] sm:$0xff] }
  0x6d   :  { %5751 = vst [vmem:[#allocation41_spill] sm:$0xff] %v3714_v18  ;;  %686 = vmatpush.msrb.mxu2 %v3732_v27  ;;  %709 = vmatpush.msrb.mxu3 %v3734_v10  ;;  %v3748_v18 = vld [vmem:[#allocation2 + $0x7f0] sm:$0xff] }
  0x6e   :  { %5752 = vst [vmem:[#allocation42_spill] sm:$0xff] %v3716_v14  ;;  %v3746_v14 = vld [vmem:[#allocation2 + $0x3f0] sm:$0xff]  ;;  %560 = vmatpush.msra.mxu0 %v3738_v9  ;;  %583 = vmatpush.msra.mxu1 %v3740_v15 }
  0x6f   :  { %5753 = vst [vmem:[#allocation43_spill] sm:$0xff] %v3720_v13  ;;  %v3754_v13 = vld [vmem:[#allocation2 + $0x6f8] sm:$0xff]  ;;  %469 = vmatmul.f32.vlgmr.msrb.gmra.mxu0 %v3500_v0  ;;  %492 = vmatmul.f32.vlgmr.msrb.gmra.mxu1 %v3502_v1 }
  0x70   :  { %5754 = vst [vmem:[#allocation44_spill] sm:$0xff] %v3722_v22  ;;  %v3752_v22 = vld [vmem:[#allocation2 + $0x2f8] sm:$0xff]  ;;  %637 = vmatpush.msrb.mxu0 %v3746_v14  ;;  %660 = vmatpush.msrb.mxu1 %v3748_v18 }
  0x71   :  { %5755 = vst [vmem:[#allocation45_spill] sm:$0xff] %v3726_v20  ;;  %687 = vmatpush.msrb.mxu2 %v3752_v22  ;;  %710 = vmatpush.msrb.mxu3 %v3754_v13  ;;  %v3772_v20 = vld [vmem:[#allocation2 + $0x770] sm:$0xff] }
  0x72   :  { %5756 = vst [vmem:[#allocation46_spill] sm:$0xff] %v3728_v24  ;;  %v3758_v24 = vld [vmem:[#allocation2 + $0x3b0] sm:$0xff]  ;;  %518 = vmatmul.f32.gmra.mxu2 %v3638_v11  ;;  %541 = vmatmul.f32.gmra.mxu3 %v3640_v12 }
  0x73   :  { %5757 = vst [vmem:[#allocation47_spill] sm:$0xff] %v3732_v27  ;;  %v3760_v27 = vld [vmem:[#allocation2 + $0x7b0] sm:$0xff]  ;;  %638 = vmatpush.msrb.mxu0 %v3758_v24 }
  0x74   :  { %5758 = vst [vmem:[#allocation48_spill] sm:$0xff] %v3734_v10  ;;  %v3764_v10 = vld [vmem:[#allocation2 + $0x2b8] sm:$0xff]  ;;  %661 = vmatpush.msrb.mxu1 %v3760_v27 }
  0x75   :  { %5759 = vst [vmem:[#allocation49_spill] sm:$0xff] %v3738_v9  ;;  %v3766_v9 = vld [vmem:[#allocation2 + $0x6b8] sm:$0xff]  ;;  %688 = vmatpush.msrb.mxu2 %v3764_v10 }
  0x76   :  { %5760 = vst [vmem:[#allocation50_spill] sm:$0xff] %v3740_v15  ;;  %v3770_v15 = vld [vmem:[#allocation2 + $0x370] sm:$0xff]  ;;  %711 = vmatpush.msrb.mxu3 %v3766_v9  ;;  %662 = vmatpush.msrb.mxu1 %v3772_v20 }
  0x77   :  { %5761 = vst [vmem:[#allocation51_spill] sm:$0xff] %v3746_v14  ;;  %v3778_v14 = vld [vmem:[#allocation2 + $0x678] sm:$0xff]  ;;  %639 = vmatpush.msrb.mxu0 %v3770_v15  ;;  %689 = vmatpush.msrb.mxu2 %v3776_v16 }
  0x78   :  { %5762 = vst [vmem:[#allocation52_spill] sm:$0xff] %v3748_v18  ;;  %v3782_v18 = vld [vmem:[#allocation2 + $0x330] sm:$0xff]  ;;  %712 = vmatpush.msrb.mxu3 %v3778_v14  ;;  %472 = vmatmul.f32.gmra.mxu0 %v3638_v11 }
  0x79   :  { %5763 = vst [vmem:[#allocation53_spill] sm:$0xff] %v3752_v22  ;;  %v3784_v22 = vld [vmem:[#allocation2 + $0x730] sm:$0xff]  ;;  %640 = vmatpush.msrb.mxu0 %v3782_v18  ;;  %495 = vmatmul.f32.gmra.mxu1 %v3640_v12 }
  0x7a   :  { %5764 = vst [vmem:[#allocation54_spill] sm:$0xff] %v3754_v13  ;;  %v3788_v13 = vld [vmem:[#allocation2 + $0x238] sm:$0xff]  ;;  %663 = vmatpush.msrb.mxu1 %v3784_v22  ;;  %607 = vmatmul.f32.vlgmr.msra.gmra.mxu2 %v3500_v0 }
  0x7b   :  { %5765 = vst [vmem:[#allocation55_spill] sm:$0xff] %v3758_v24  ;;  %v3790_v24 = vld [vmem:[#allocation2 + $0x638] sm:$0xff]  ;;  %690 = vmatpush.msrb.mxu2 %v3788_v13  ;;  %630 = vmatmul.f32.vlgmr.msra.gmra.mxu3 %v3502_v1 }
  0x7c   :  { %5766 = vst [vmem:[#allocation56_spill] sm:$0xff] %v3760_v27  ;;  %v3794_v27 = vld [vmem:[#allocation2 + $0x2f0] sm:$0xff]  ;;  %713 = vmatpush.msrb.mxu3 %v3790_v24 }
  0x7d   :  { %5767 = vst [vmem:[#allocation57_spill] sm:$0xff] %v3764_v10  ;;  %v3796_v10 = vld [vmem:[#allocation2 + $0x6f0] sm:$0xff]  ;;  %641 = vmatpush.msrb.mxu0 %v3794_v27 }
  0x7e   :  { %5768 = vst [vmem:[#allocation58_spill] sm:$0xff] %v3766_v9  ;;  %v3800_v9 = vld [vmem:[#allocation2 + $0x1f8] sm:$0xff]  ;;  %664 = vmatpush.msrb.mxu1 %v3796_v10 }
  0x7f   :  { %5769 = vst [vmem:[#allocation59_spill] sm:$0xff] %v3770_v15  ;;  %v3802_v15 = vld [vmem:[#allocation2 + $0x5f8] sm:$0xff]  ;;  %691 = vmatpush.msrb.mxu2 %v3800_v9 }
  0x80   :  { %5770 = vst [vmem:[#allocation60_spill] sm:$0xff] %v3772_v20  ;;  %v3806_v20 = vld [vmem:[#allocation2 + $0x2b0] sm:$0xff]  ;;  %714 = vmatpush.msrb.mxu3 %v3802_v15  ;;  %561 = vmatmul.f32.vlgmr.msra.gmra.mxu0 %v3500_v0 }
  0x81   :  { %5771 = vst [vmem:[#allocation61_spill] sm:$0xff] %v3776_v16  ;;  %v3808_v16 = vld [vmem:[#allocation2 + $0x6b0] sm:$0xff]  ;;  %642 = vmatpush.msrb.mxu0 %v3806_v20  ;;  %584 = vmatmul.f32.vlgmr.msra.gmra.mxu1 %v3502_v1 }
  0x82   :  { %5772 = vst [vmem:[#allocation62_spill] sm:$0xff] %v3778_v14  ;;  %v3812_v14 = vld [vmem:[#allocation2 + $0x1b8] sm:$0xff]  ;;  %665 = vmatpush.msrb.mxu1 %v3808_v16  ;;  %610 = vmatmul.f32.gmra.mxu2 %v3638_v11 }
  0x83   :  { %5773 = vst [vmem:[#allocation63_spill] sm:$0xff] %v3782_v18  ;;  %v3814_v18 = vld [vmem:[#allocation2 + $0x5b8] sm:$0xff]  ;;  %692 = vmatpush.msrb.mxu2 %v3812_v14  ;;  %633 = vmatmul.f32.gmra.mxu3 %v3640_v12 }
  0x84   :  { %5774 = vst [vmem:[#allocation64_spill] sm:$0xff] %v3784_v22  ;;  %v3818_v22 = vld [vmem:[#allocation2 + $0x270] sm:$0xff]  ;;  %715 = vmatpush.msrb.mxu3 %v3814_v18 }
  0x85   :  { %5775 = vst [vmem:[#allocation65_spill] sm:$0xff] %v3788_v13  ;;  %v3820_v13 = vld [vmem:[#allocation2 + $0x670] sm:$0xff]  ;;  %643 = vmatpush.msrb.mxu0 %v3818_v22 }
  0x86   :  { %5776 = vst [vmem:[#allocation66_spill] sm:$0xff] %v3790_v24  ;;  %v3824_v24 = vld [vmem:[#allocation2 + $0x178] sm:$0xff]  ;;  %666 = vmatpush.msrb.mxu1 %v3820_v13 }
  0x87   :  { %5777 = vst [vmem:[#allocation67_spill] sm:$0xff] %v3794_v27  ;;  %v3826_v27 = vld [vmem:[#allocation2 + $0x578] sm:$0xff]  ;;  %693 = vmatpush.msrb.mxu2 %v3824_v24 }
  0x88   :  { %5778 = vst [vmem:[#allocation68_spill] sm:$0xff] %v3796_v10  ;;  %v3830_v10 = vld [vmem:[#allocation2 + $0x230] sm:$0xff]  ;;  %716 = vmatpush.msrb.mxu3 %v3826_v27  ;;  %564 = vmatmul.f32.gmra.mxu0 %v3638_v11 }
  0x89   :  { %5779 = vst [vmem:[#allocation69_spill] sm:$0xff] %v3800_v9  ;;  %v3832_v9 = vld [vmem:[#allocation2 + $0x630] sm:$0xff]  ;;  %644 = vmatpush.msrb.mxu0 %v3830_v10  ;;  %587 = vmatmul.f32.gmra.mxu1 %v3640_v12 }
  0x8a   :  { %5780 = vst [vmem:[#allocation70_spill] sm:$0xff] %v3802_v15  ;;  %v3836_v15 = vld [vmem:[#allocation2 + $0x138] sm:$0xff]  ;;  %667 = vmatpush.msrb.mxu1 %v3832_v9 }
  0x8b   :  { %5781 = vst [vmem:[#allocation71_spill] sm:$0xff] %v3806_v20  ;;  %v3838_v20 = vld [vmem:[#allocation2 + $0x538] sm:$0xff]  ;;  %694 = vmatpush.msrb.mxu2 %v3836_v15 }
  0x8c   :  { %5782 = vst [vmem:[#allocation72_spill] sm:$0xff] %v3808_v16  ;;  %717 = vmatpush.msrb.mxu3 %v3838_v20  ;;  %v3874_v16 = vld [vmem:[#allocation2 + $0x78] sm:$0xff] }
  0x8d   :  { %5783 = vst [vmem:[#allocation73_spill] sm:$0xff] %v3812_v14  ;;  %v3846_v14 = vld [vmem:[#allocation2 + $0x5f0] sm:$0xff] }
  0x8e   :  { %5784 = vst [vmem:[#allocation74_spill] sm:$0xff] %v3814_v18  ;;  %v3844_v18 = vld [vmem:[#allocation2 + $0x1f0] sm:$0xff]  ;;  %668 = vmatpush.msrb.mxu1 %v3846_v14 }
  0x8f   :  { %5785 = vst [vmem:[#allocation75_spill] sm:$0xff] %v3818_v22  ;;  %v3852_v22 = vld [vmem:[#allocation2 + $0x4f8] sm:$0xff]  ;;  %645 = vmatpush.msrb.mxu0 %v3844_v18 }
  0x90   :  { %5786 = vst [vmem:[#allocation76_spill] sm:$0xff] %v3820_v13  ;;  %v3850_v13 = vld [vmem:[#allocation2 + $0xf8] sm:$0xff]  ;;  %718 = vmatpush.msrb.mxu3 %v3852_v22 }
  0x91   :  { %5787 = vst [vmem:[#allocation77_spill] sm:$0xff] %v3824_v24  ;;  %695 = vmatpush.msrb.mxu2 %v3850_v13  ;;  %v3870_v24 = vld [vmem:[#allocation2 + $0x570] sm:$0xff] }
  0x92   :  { %5788 = vst [vmem:[#allocation78_spill] sm:$0xff] %v3826_v27  ;;  %v3856_v27 = vld [vmem:[#allocation2 + $0x1b0] sm:$0xff] }
  0x93   :  { %5789 = vst [vmem:[#allocation79_spill] sm:$0xff] %v3830_v10  ;;  %v3858_v10 = vld [vmem:[#allocation2 + $0x5b0] sm:$0xff]  ;;  %646 = vmatpush.msrb.mxu0 %v3856_v27 }
  0x94   :  { %5790 = vst [vmem:[#allocation80_spill] sm:$0xff] %v3832_v9  ;;  %v3862_v9 = vld [vmem:[#allocation2 + $0xb8] sm:$0xff]  ;;  %669 = vmatpush.msrb.mxu1 %v3858_v10 }
  0x95   :  { %5791 = vst [vmem:[#allocation81_spill] sm:$0xff] %v3836_v15  ;;  %v3864_v15 = vld [vmem:[#allocation2 + $0x4b8] sm:$0xff]  ;;  %696 = vmatpush.msrb.mxu2 %v3862_v9 }
  0x96   :  { %5792 = vst [vmem:[#allocation82_spill] sm:$0xff] %v3838_v20  ;;  %v3868_v20 = vld [vmem:[#allocation2 + $0x170] sm:$0xff]  ;;  %719 = vmatpush.msrb.mxu3 %v3864_v15  ;;  %670 = vmatpush.msrb.mxu1 %v3870_v24 }
  0x97   :  { %5793 = vst [vmem:[#allocation83_spill] sm:$0xff] %v3844_v18  ;;  %v3876_v18 = vld [vmem:[#allocation2 + $0x478] sm:$0xff]  ;;  %647 = vmatpush.msrb.mxu0 %v3868_v20  ;;  %697 = vmatpush.msrb.mxu2 %v3874_v16 }
  0x98   :  { %5794 = vst [vmem:[#allocation84_spill] sm:$0xff] %v3846_v14  ;;  %v3880_v14 = vld [vmem:[#allocation2 + $0x130] sm:$0xff]  ;;  %720 = vmatpush.msrb.mxu3 %v3876_v18 }
  0x99   :  { %5795 = vst [vmem:[#allocation85_spill] sm:$0xff] %v3850_v13  ;;  %v3882_v13 = vld [vmem:[#allocation2 + $0x530] sm:$0xff]  ;;  %648 = vmatpush.msrb.mxu0 %v3880_v14 }
  0x9a   :  { %5796 = vst [vmem:[#allocation86_spill] sm:$0xff] %v3852_v22  ;;  %v3886_v22 = vld [vmem:[#allocation2 + $0x38] sm:$0xff]  ;;  %671 = vmatpush.msrb.mxu1 %v3882_v13 }
  0x9b   :  { %5797 = vst [vmem:[#allocation87_spill] sm:$0xff] %v3856_v27  ;;  %v3888_v27 = vld [vmem:[#allocation2 + $0x438] sm:$0xff]  ;;  %698 = vmatpush.msrb.mxu2 %v3886_v22 }
  0x9c   :  { %5798 = vst [vmem:[#allocation88_spill] sm:$0xff] %v3858_v10  ;;  %721 = vmatpush.msrb.mxu3 %v3888_v27  ;;  %699 = vmatmul.f32.vlgmr.msrb.gmra.mxu2 %v3500_v0  ;;  %v3089_v10 = vld [vmem:[#allocation2 + $0x398] sm:$0xff] }
  0x9d   :  { %5799 = vst [vmem:[#allocation89_spill] sm:$0xff] %v3862_v9  ;;  %v3078_v9 = vld [vmem:[#allocation2 + $0x540] sm:$0xff]  ;;  %722 = vmatmul.f32.vlgmr.msrb.gmra.mxu3 %v3502_v1 }
  0x9e   :  { %5800 = vst [vmem:[#allocation90_spill] sm:$0xff] %v3864_v15  ;;  %v3924_v15 = vld [vmem:[#allocation2 + $0x470] sm:$0xff] }
  0x9f   :  { %5801 = vst [vmem:[#allocation91_spill] sm:$0xff] %v3868_v20  ;;  %v3900_v20 = vld [vmem:[#allocation2 + $0x4f0] sm:$0xff] }
  0xa0   :  { %5802 = vst [vmem:[#allocation92_spill] sm:$0xff] %v3870_v24  ;;  %v3898_v24 = vld [vmem:[#allocation2 + $0xf0] sm:$0xff]  ;;  %672 = vmatpush.msrb.mxu1 %v3900_v20 }
  0xa1   :  { %5803 = vst [vmem:[#allocation93_spill] sm:$0xff] %v3874_v16  ;;  %649 = vmatpush.msrb.mxu0 %v3898_v24  ;;  %v3919_v16 = vld [vmem:[#allocation2 + $0x788] sm:$0xff] }
  0xa2   :  { %5804 = vst [vmem:[#allocation94_spill] sm:$0xff] %v3876_v18  ;;  %v3904_v18 = vld [vmem:[#allocation2 + $0x3c8] sm:$0xff] }
  0xa3   :  { %5805 = vst [vmem:[#allocation95_spill] sm:$0xff] %v3880_v14  ;;  %1201 = vmatpush.msra.mxu2 %v3904_v18  ;;  %v3916_v14 = vld [vmem:[#allocation2 + $0x388] sm:$0xff] }
  0xa4   :  { %5806 = vst [vmem:[#allocation96_spill] sm:$0xff] %v3882_v13  ;;  %v3907_v13 = vld [vmem:[#allocation2 + $0x7c8] sm:$0xff]  ;;  %702 = vmatmul.f32.gmra.mxu2 %v3638_v11 }
  0xa5   :  { %5807 = vst [vmem:[#allocation97_spill] sm:$0xff] %v3886_v22  ;;  %1224 = vmatpush.msra.mxu3 %v3907_v13  ;;  %v3912_v22 = vld [vmem:[#allocation2 + $0x4b0] sm:$0xff]  ;;  %1202 = vmatpush.msra.mxu2 %v3916_v14 }
  0xa6   :  { %5808 = vst [vmem:[#allocation98_spill] sm:$0xff] %v3888_v27  ;;  %v3910_v27 = vld [vmem:[#allocation2 + $0xb0] sm:$0xff]  ;;  %673 = vmatpush.msrb.mxu1 %v3912_v22  ;;  %725 = vmatmul.f32.gmra.mxu3 %v3640_v12 }
  0xa7   :  { %5809 = vst [vmem:[#allocation99_spill] sm:$0xff] %v3898_v24  ;;  %1225 = vmatpush.msra.mxu3 %v3919_v16  ;;  %650 = vmatpush.msrb.mxu0 %v3910_v27  ;;  %v3936_v24 = vld [vmem:[#allocation2 + $0x430] sm:$0xff] }
  0xa8   :  { %5810 = vst [vmem:[#allocation100_spill] sm:$0xff] %v3900_v20  ;;  %v3931_v20 = vld [vmem:[#allocation2 + $0x748] sm:$0xff]  ;;  %674 = vmatpush.msrb.mxu1 %v3924_v15 }
  0xa9   :  { %5811 = vst [vmem:[#allocation101_spill] sm:$0xff] %v3904_v18  ;;  %v3922_v18 = vld [vmem:[#allocation2 + $0x70] sm:$0xff]  ;;  %1226 = vmatpush.msra.mxu3 %v3931_v20 }
  0xaa   :  { %5812 = vst [vmem:[#allocation102_spill] sm:$0xff] %v3907_v13  ;;  %v3928_v13 = vld [vmem:[#allocation2 + $0x348] sm:$0xff]  ;;  %651 = vmatpush.msrb.mxu0 %v3922_v18  ;;  %675 = vmatpush.msrb.mxu1 %v3936_v24 }
  0xab   :  { %5813 = vst [vmem:[#allocation103_spill] sm:$0xff] %v3910_v27  ;;  %1203 = vmatpush.msra.mxu2 %v3928_v13  ;;  %v3074_v27 = vld [vmem:[#allocation2 + $0x580] sm:$0xff]  ;;  %676 = vmatmul.f32.vlgmr.msrb.gmra.mxu1 %v3502_v1  ;;  %v3111_v1 = vld [vmem:[#allocation2 + $0x258] sm:$0xff] }
  0xac   :  { %5814 = vst [vmem:[#allocation104_spill] sm:$0xff] %v3912_v22  ;;  %v3943_v22 = vld [vmem:[#allocation2 + $0x708] sm:$0xff] }
  0xad   :  { %5815 = vst [vmem:[#allocation105_spill] sm:$0xff] %v3916_v14  ;;  %v3934_v14 = vld [vmem:[#allocation2 + $0x30] sm:$0xff]  ;;  %1227 = vmatpush.msra.mxu3 %v3943_v22 }
  0xae   :  { %5816 = vst [vmem:[#allocation106_spill] sm:$0xff] %v3919_v16  ;;  %v3940_v16 = vld [vmem:[#allocation2 + $0x308] sm:$0xff]  ;;  %652 = vmatpush.msrb.mxu0 %v3934_v14 }
  0xaf   :  { %5817 = vst [vmem:[#allocation107_spill] sm:$0xff] %v3922_v18  ;;  %1204 = vmatpush.msra.mxu2 %v3940_v16  ;;  %v3068_v18 = vld [vmem:[#allocation2 + $0x508] sm:$0xff]  ;;  %653 = vmatmul.f32.vlgmr.msrb.gmra.mxu0 %v3500_v0  ;;  %v3110_v0 = vld [vmem:[#allocation2 + $0x750] sm:$0xff] }
  0xb0   :  { %5818 = vst [vmem:[#allocation108_spill] sm:$0xff] %v3924_v15  ;;  %v3953_v15 = vld [vmem:[#allocation2 + $0x7c0] sm:$0xff] }
  0xb1   :  { %5819 = vst [vmem:[#allocation109_spill] sm:$0xff] %v3928_v13  ;;  %1178 = vmatpush.msra.mxu1 %v3953_v15  ;;  %v3072_v13 = vld [vmem:[#allocation2 + $0x4c8] sm:$0xff] }
  0xb2   :  { %5820 = vst [vmem:[#allocation110_spill] sm:$0xff] %v3931_v20  ;;  %v3950_v20 = vld [vmem:[#allocation2 + $0x3c0] sm:$0xff] }
  0xb3   :  { %5821 = vst [vmem:[#allocation111_spill] sm:$0xff] %v3934_v14  ;;  %1155 = vmatpush.msra.mxu0 %v3950_v20  ;;  %v3965_v14 = vld [vmem:[#allocation2 + $0x780] sm:$0xff]  ;;  %679 = vmatmul.f32.gmra.mxu1 %v3640_v12  ;;  %v3123_v12 = vld [vmem:[#allocation2 + $0x3e8] sm:$0xff] }
  0xb4   :  { %5822 = vst [vmem:[#allocation112_spill] sm:$0xff] %v3936_v24  ;;  %v3962_v24 = vld [vmem:[#allocation2 + $0x380] sm:$0xff]  ;;  %1179 = vmatpush.msra.mxu1 %v3965_v14 }
  0xb5   :  { %5823 = vst [vmem:[#allocation113_spill] sm:$0xff] %v3940_v16  ;;  %v3956_v16 = vld [vmem:[#allocation2 + $0x2c8] sm:$0xff]  ;;  %1156 = vmatpush.msra.mxu0 %v3962_v24 }
  0xb6   :  { %5824 = vst [vmem:[#allocation114_spill] sm:$0xff] %v3943_v22  ;;  %1205 = vmatpush.msra.mxu2 %v3956_v16  ;;  %v3959_v22 = vld [vmem:[#allocation2 + $0x6c8] sm:$0xff] }
  0xb7   :  { %5825 = vst [vmem:[#allocation115_spill] sm:$0xff] %v3950_v20  ;;  %1228 = vmatpush.msra.mxu3 %v3959_v22  ;;  %v3968_v20 = vld [vmem:[#allocation2 + $0x288] sm:$0xff]  ;;  %656 = vmatmul.f32.gmra.mxu0 %v3638_v11 }
  0xb8   :  { %5826 = vst [vmem:[#allocation116_spill] sm:$0xff] %v3953_v15  ;;  %1206 = vmatpush.msra.mxu2 %v3968_v20  ;;  %v3971_v15 = vld [vmem:[#allocation2 + $0x688] sm:$0xff] }
  0xb9   :  { %5827 = vst [vmem:[#allocation117_spill] sm:$0xff] %v3956_v16  ;;  %1229 = vmatpush.msra.mxu3 %v3971_v15  ;;  %v3974_v16 = vld [vmem:[#allocation2 + $0x340] sm:$0xff]  ;;  %v2880_v11 = vld [vmem:[%s5573_s1 + $0x71] ss:$4 sm:$0x3] }
  0xba   :  { %5828 = vst [vmem:[#allocation118_spill] sm:$0xff] %v3959_v22  ;;  %1157 = vmatpush.msra.mxu0 %v3974_v16  ;;  %v3977_v22 = vld [vmem:[#allocation2 + $0x740] sm:$0xff] }
  0xbb   :  { %5829 = vst [vmem:[#allocation119_spill] sm:$0xff] %v3962_v24  ;;  %1180 = vmatpush.msra.mxu1 %v3977_v22  ;;  %v3980_v24 = vld [vmem:[#allocation2 + $0x248] sm:$0xff] }
  0xbc   :  { %5830 = vst [vmem:[#allocation120_spill] sm:$0xff] %v3965_v14  ;;  %1207 = vmatpush.msra.mxu2 %v3980_v24  ;;  %v3983_v14 = vld [vmem:[#allocation2 + $0x648] sm:$0xff] }
  0xbd   :  { %5831 = vst [vmem:[#allocation121_spill] sm:$0xff] %v3968_v20  ;;  %1230 = vmatpush.msra.mxu3 %v3983_v14  ;;  %v3986_v20 = vld [vmem:[#allocation2 + $0x300] sm:$0xff] }
  0xbe   :  { %5832 = vst [vmem:[#allocation122_spill] sm:$0xff] %v3971_v15  ;;  %1158 = vmatpush.msra.mxu0 %v3986_v20  ;;  %v3989_v15 = vld [vmem:[#allocation2 + $0x700] sm:$0xff] }
  0xbf   :  { %5833 = vst [vmem:[#allocation123_spill] sm:$0xff] %v3974_v16  ;;  %1181 = vmatpush.msra.mxu1 %v3989_v15  ;;  %v3992_v16 = vld [vmem:[#allocation2 + $0x208] sm:$0xff] }
  0xc0   :  { %5834 = vst [vmem:[#allocation124_spill] sm:$0xff] %v3977_v22  ;;  %1208 = vmatpush.msra.mxu2 %v3992_v16  ;;  %v3995_v22 = vld [vmem:[#allocation2 + $0x608] sm:$0xff] }
  0xc1   :  { %5835 = vst [vmem:[#allocation125_spill] sm:$0xff] %v3980_v24  ;;  %1231 = vmatpush.msra.mxu3 %v3995_v22  ;;  %v3998_v24 = vld [vmem:[#allocation2 + $0x2c0] sm:$0xff] }
  0xc2   :  { %5836 = vst [vmem:[#allocation126_spill] sm:$0xff] %v3983_v14  ;;  %1159 = vmatpush.msra.mxu0 %v3998_v24  ;;  %v4001_v14 = vld [vmem:[#allocation2 + $0x6c0] sm:$0xff] }
  0xc3   :  { %5837 = vst [vmem:[#allocation127_spill] sm:$0xff] %v3986_v20  ;;  %1182 = vmatpush.msra.mxu1 %v4001_v14  ;;  %v4004_v20 = vld [vmem:[#allocation2 + $0x1c8] sm:$0xff] }
  0xc4   :  { %5838 = vst [vmem:[#allocation128_spill] sm:$0xff] %v3989_v15  ;;  %1209 = vmatpush.msra.mxu2 %v4004_v20  ;;  %v4007_v15 = vld [vmem:[#allocation2 + $0x5c8] sm:$0xff] }
  0xc5   :  { %5839 = vst [vmem:[#allocation129_spill] sm:$0xff] %v3992_v16  ;;  %1232 = vmatpush.msra.mxu3 %v4007_v15  ;;  %v4010_v16 = vld [vmem:[#allocation2 + $0x280] sm:$0xff] }
  0xc6   :  { %5840 = vst [vmem:[#allocation130_spill] sm:$0xff] %v3995_v22  ;;  %1160 = vmatpush.msra.mxu0 %v4010_v16  ;;  %v4013_v22 = vld [vmem:[#allocation2 + $0x680] sm:$0xff] }
  0xc7   :  { %5841 = vst [vmem:[#allocation131_spill] sm:$0xff] %v3998_v24  ;;  %1183 = vmatpush.msra.mxu1 %v4013_v22  ;;  %v4016_v24 = vld [vmem:[#allocation2 + $0x188] sm:$0xff] }
  0xc8   :  { %5842 = vst [vmem:[#allocation132_spill] sm:$0xff] %v4001_v14  ;;  %1210 = vmatpush.msra.mxu2 %v4016_v24  ;;  %v4019_v14 = vld [vmem:[#allocation2 + $0x588] sm:$0xff] }
  0xc9   :  { %5843 = vst [vmem:[#allocation133_spill] sm:$0xff] %v4004_v20  ;;  %1233 = vmatpush.msra.mxu3 %v4019_v14  ;;  %v4022_v20 = vld [vmem:[#allocation2 + $0x240] sm:$0xff] }
  0xca   :  { %5844 = vst [vmem:[#allocation134_spill] sm:$0xff] %v4007_v15  ;;  %1161 = vmatpush.msra.mxu0 %v4022_v20  ;;  %v4025_v15 = vld [vmem:[#allocation2 + $0x640] sm:$0xff] }
  0xcb   :  { %5845 = vst [vmem:[#allocation135_spill] sm:$0xff] %v4010_v16  ;;  %1184 = vmatpush.msra.mxu1 %v4025_v15  ;;  %v4028_v16 = vld [vmem:[#allocation2 + $0x148] sm:$0xff] }
  0xcc   :  { %5846 = vst [vmem:[#allocation136_spill] sm:$0xff] %v4013_v22  ;;  %1211 = vmatpush.msra.mxu2 %v4028_v16  ;;  %v4031_v22 = vld [vmem:[#allocation2 + $0x548] sm:$0xff] }
  0xcd   :  { %5847 = vst [vmem:[#allocation137_spill] sm:$0xff] %v4016_v24  ;;  %1234 = vmatpush.msra.mxu3 %v4031_v22  ;;  %v4034_v24 = vld [vmem:[#allocation2 + $0x200] sm:$0xff] }
  0xce   :  { %5848 = vst [vmem:[#allocation138_spill] sm:$0xff] %v4019_v14  ;;  %1162 = vmatpush.msra.mxu0 %v4034_v24  ;;  %v4037_v14 = vld [vmem:[#allocation2 + $0x600] sm:$0xff] }
  0xcf   :  { %5849 = vst [vmem:[#allocation139_spill] sm:$0xff] %v4022_v20  ;;  %1185 = vmatpush.msra.mxu1 %v4037_v14  ;;  %v3067_v20 = vld [vmem:[#allocation2 + $0x108] sm:$0xff]  ;;  %1235 = vmatpush.msra.mxu3 %v3068_v18  ;;  %v3077_v18 = vld [vmem:[#allocation2 + $0x140] sm:$0xff] }
  0xd0   :  { %5850 = vst [vmem:[#allocation140_spill] sm:$0xff] %v4025_v15  ;;  %1212 = vmatpush.msra.mxu2 %v3067_v20  ;;  %v3070_v15 = vld [vmem:[#allocation2 + $0x5c0] sm:$0xff]  ;;  %v3076_v20 = vld [vmem:[#allocation2 + $0x488] sm:$0xff] }
  0xd1   :  { %5851 = vst [vmem:[#allocation141_spill] sm:$0xff] %v4028_v16  ;;  %v3069_v16 = vld [vmem:[#allocation2 + $0x1c0] sm:$0xff]  ;;  %1186 = vmatpush.msra.mxu1 %v3070_v15  ;;  %1236 = vmatpush.msra.mxu3 %v3072_v13  ;;  %v2866_v15 = vld [vmem:[%s5573_s1 + $0x1] ss:$4 sm:$0x3] }
  0xd2   :  { %5852 = vst [vmem:[#allocation142_spill] sm:$0xff] %v4031_v22  ;;  %1163 = vmatpush.msra.mxu0 %v3069_v16  ;;  %v3071_v22 = vld [vmem:[#allocation2 + $0xc8] sm:$0xff]  ;;  %v2867_v13 = vld [vmem:[%s5573_s1 + $0x9] ss:$4 sm:$0x3] }
  0xd3   :  { %5853 = vst [vmem:[#allocation143_spill] sm:$0xff] %v4034_v24  ;;  %1213 = vmatpush.msra.mxu2 %v3071_v22  ;;  %v3073_v24 = vld [vmem:[#allocation2 + $0x180] sm:$0xff]  ;;  %1187 = vmatpush.msra.mxu1 %v3074_v27  ;;  %v3079_v16 = vld [vmem:[#allocation2 + $0x48] sm:$0xff] }
  0xd4   :  { %5854 = vst [vmem:[#allocation144_spill] sm:$0xff] %v4037_v14  ;;  %1164 = vmatpush.msra.mxu0 %v3073_v24  ;;  %v3075_v14 = vld [vmem:[#allocation2 + $0x88] sm:$0xff]  ;;  %1237 = vmatpush.msra.mxu3 %v3076_v20  ;;  %v3081_v24 = vld [vmem:[#allocation2 + $0x100] sm:$0xff] }
  0xd5   :  { %1214 = vmatpush.msra.mxu2 %v3075_v14  ;;  %1188 = vmatpush.msra.mxu1 %v3078_v9  ;;  %v3080_v22 = vld [vmem:[#allocation2 + $0x448] sm:$0xff]  ;;  %v3082_v14 = vld [vmem:[#allocation2 + $0x500] sm:$0xff]  ;;  %1124 = vst [vmem:[#allocation1] ss:$9 sm:$0xff] %v2866_v15  ;;  %v3086_v15 = vld [vmem:[#allocation2 + $0x7d8] sm:$0xff] }
  0xd6   :  { %1165 = vmatpush.msra.mxu0 %v3077_v18  ;;  %1238 = vmatpush.msra.mxu3 %v3080_v22  ;;  %v2868_v9 = vld [vmem:[%s5573_s1 + $0x11] ss:$4 sm:$0x3]  ;;  %v2869_v18 = vld [vmem:[%s5573_s1 + $0x19] ss:$4 sm:$0x3] }
  0xd7   :  { %1215 = vmatpush.msra.mxu2 %v3079_v16  ;;  %1189 = vmatpush.msra.mxu1 %v3082_v14  ;;  %v3083_v27 = vld [vmem:[#allocation2 + $0x8] sm:$0xff]  ;;  %v2870_v16 = vld [vmem:[%s5573_s1 + $0x21] ss:$4 sm:$0x3]  ;;  %1126 = vst [vmem:[#allocation1 + $0x1] ss:$9 sm:$0xff] %v2867_v13 }
  0xd8   :  { %1166 = vmatpush.msra.mxu0 %v3081_v24  ;;  %v3084_v20 = vld [vmem:[#allocation2 + $0x408] sm:$0xff]  ;;  %v2871_v22 = vld [vmem:[%s5573_s1 + $0x29] ss:$4 sm:$0x3]  ;;  %1128 = vst [vmem:[#allocation1 + $0x2] ss:$9 sm:$0xff] %v2868_v9 }
  0xd9   :  { %1216 = vmatpush.msra.mxu2 %v3083_v27  ;;  %1239 = vmatpush.msra.mxu3 %v3084_v20  ;;  %v3085_v24 = vld [vmem:[#allocation2 + $0x3d8] sm:$0xff]  ;;  %v2872_v14 = vld [vmem:[%s5573_s1 + $0x31] ss:$4 sm:$0x3]  ;;  %1130 = vst [vmem:[#allocation1 + $0x3] ss:$9 sm:$0xff] %v2869_v18 }
  0xda   :  { %v3087_v27 = vld [vmem:[#allocation2 + $0xc0] sm:$0xff]  ;;  %v2873_v20 = vld [vmem:[%s5573_s1 + $0x39] ss:$4 sm:$0x3]  ;;  %1132 = vst [vmem:[#allocation1 + $0x4] ss:$9 sm:$0xff] %v2870_v16 }
  0xdb   :  { %1293 = vmatpush.msrb.mxu2 %v3085_v24  ;;  %1316 = vmatpush.msrb.mxu3 %v3086_v15  ;;  %v3088_v13 = vld [vmem:[#allocation2 + $0x4c0] sm:$0xff]  ;;  %v3090_v9 = vld [vmem:[#allocation2 + $0x798] sm:$0xff]  ;;  %1134 = vst [vmem:[#allocation1 + $0x5] ss:$9 sm:$0xff] %v2871_v22 }
  0xdc   :  { %1167 = vmatpush.msra.mxu0 %v3087_v27  ;;  %1190 = vmatpush.msra.mxu1 %v3088_v13  ;;  %v3091_v24 = vld [vmem:[#allocation2 + $0x80] sm:$0xff]  ;;  %1136 = vst [vmem:[#allocation1 + $0x6] ss:$9 sm:$0xff] %v2872_v14  ;;  %v3093_v18 = vld [vmem:[#allocation2 + $0x358] sm:$0xff]  ;;  %v3101_v14 = vld [vmem:[#allocation2 + $0x3d0] sm:$0xff] }
  0xdd   :  { %1294 = vmatpush.msrb.mxu2 %v3089_v10  ;;  %1317 = vmatpush.msrb.mxu3 %v3090_v9  ;;  %v3092_v15 = vld [vmem:[#allocation2 + $0x480] sm:$0xff]  ;;  %v3094_v27 = vld [vmem:[#allocation2 + $0x758] sm:$0xff]  ;;  %1138 = vst [vmem:[#allocation1 + $0x7] ss:$9 sm:$0xff] %v2873_v20 }
  0xde   :  { %1168 = vmatpush.msra.mxu0 %v3091_v24  ;;  %1191 = vmatpush.msra.mxu1 %v3092_v15  ;;  %v3095_v13 = vld [vmem:[#allocation2 + $0x40] sm:$0xff]  ;;  %v3097_v16 = vld [vmem:[#allocation2 + $0x318] sm:$0xff]  ;;  %v3102_v24 = vld [vmem:[#allocation2 + $0x7d0] sm:$0xff] }
  0xdf   :  { %1295 = vmatpush.msrb.mxu2 %v3093_v18  ;;  %1318 = vmatpush.msrb.mxu3 %v3094_v27  ;;  %v3098_v10 = vld [vmem:[#allocation2 + $0x718] sm:$0xff]  ;;  %v3099_v9 = vld [vmem:[#allocation2] sm:$0xff]  ;;  %v3106_v18 = vld [vmem:[#allocation2 + $0x790] sm:$0xff] }
  0xe0   :  { %1169 = vmatpush.msra.mxu0 %v3095_v13  ;;  %1192 = vmatpush.msra.mxu1 %v3096_v8  ;;  %v3100_v22 = vld [vmem:[#allocation2 + $0x400] sm:$0xff]  ;;  %v3103_v20 = vld [vmem:[#allocation2 + $0x2d8] sm:$0xff]  ;;  %v3105_v8 = vld [vmem:[#allocation2 + $0x390] sm:$0xff] }
  0xe1   :  { %1296 = vmatpush.msrb.mxu2 %v3097_v16  ;;  %1319 = vmatpush.msrb.mxu3 %v3098_v10  ;;  %v3104_v15 = vld [vmem:[#allocation2 + $0x6d8] sm:$0xff]  ;;  %v3109_v16 = vld [vmem:[#allocation2 + $0x350] sm:$0xff] }
  0xe2   :  { %1170 = vmatpush.msra.mxu0 %v3099_v9  ;;  %1193 = vmatpush.msra.mxu1 %v3100_v22  ;;  %v3107_v27 = vld [vmem:[#allocation2 + $0x298] sm:$0xff]  ;;  %v3113_v9 = vld [vmem:[#allocation2 + $0x310] sm:$0xff] }
  0xe3   :  { %1297 = vmatpush.msrb.mxu2 %v3103_v20  ;;  %1320 = vmatpush.msrb.mxu3 %v3104_v15  ;;  %v3108_v13 = vld [vmem:[#allocation2 + $0x698] sm:$0xff]  ;;  %v3114_v22 = vld [vmem:[#allocation2 + $0x710] sm:$0xff]  ;;  %v424_v20 = vpop.f32.mrf.mxu2 }
  0xe4   :  { %1247 = vmatpush.msrb.mxu0 %v3101_v14  ;;  %1270 = vmatpush.msrb.mxu1 %v3102_v24  ;;  %v3112_v10 = vld [vmem:[#allocation2 + $0x658] sm:$0xff] }
  0xe5   :  { %1298 = vmatpush.msrb.mxu2 %v3107_v27  ;;  %1321 = vmatpush.msrb.mxu3 %v3108_v13  ;;  %v3115_v14 = vld [vmem:[#allocation2 + $0x218] sm:$0xff] }
  0xe6   :  { %1248 = vmatpush.msrb.mxu0 %v3105_v8  ;;  %1271 = vmatpush.msrb.mxu1 %v3106_v18  ;;  %v3116_v24 = vld [vmem:[#allocation2 + $0x618] sm:$0xff]  ;;  %v3118_v18 = vld [vmem:[#allocation2 + $0x550] sm:$0xff] }
  0xe7   :  { %1299 = vmatpush.msrb.mxu2 %v3111_v1  ;;  %1322 = vmatpush.msrb.mxu3 %v3112_v10  ;;  %v3119_v1 = vld [vmem:[#allocation2 + $0x110] sm:$0xff] }
  0xe8   :  { %1249 = vmatpush.msrb.mxu0 %v3109_v16  ;;  %1272 = vmatpush.msrb.mxu1 %v3110_v0  ;;  %v3120_v10 = vld [vmem:[#allocation2 + $0x510] sm:$0xff] }
  0xe9   :  { %1300 = vmatpush.msrb.mxu2 %v3115_v14  ;;  %1323 = vmatpush.msrb.mxu3 %v3116_v24  ;;  %v3124_v14 = vld [vmem:[#allocation2 + $0x7e8] sm:$0xff]  ;;  %v2881_v24 = vld [vmem:[%s5573_s1 + $0x79] ss:$4 sm:$0x3] }
  0xea   :  { %1250 = vmatpush.msrb.mxu0 %v3113_v9  ;;  %1273 = vmatpush.msrb.mxu1 %v3114_v22 }
  0xeb   :  { %1301 = vmatpush.msrb.mxu2 %v3410_v28  ;;  %1324 = vmatpush.msrb.mxu3 %v3412_v29  ;;  %v4087_v28 = vld [vmem:[#allocation1] sm:$0xff]  ;;  %v4089_v29 = vld [vmem:[#allocation1 + $0x9] sm:$0xff] }
  0xec   :  { %1251 = vmatpush.msrb.mxu0 %v3403_v25  ;;  %1274 = vmatpush.msrb.mxu1 %v3405_v26  ;;  %v447_v25 = vpop.f32.mrf.mxu3  ;;  %v2874_v26 = vld [vmem:[%s5573_s1 + $0x41] ss:$4 sm:$0x3]  ;;  %1147 = vst [vmem:[#allocation1 + $0x6] ss:$9 sm:$0xff] %v2880_v11  ;;  %v5873_v11 = vld [vmem:[#allocation21_spill] sm:$0xff] }
  0xed   :  { %1302 = vmatpush.msrb.mxu2 %v3426_v34  ;;  %1325 = vmatpush.msrb.mxu3 %v3428_v35  ;;  %v2875_v34 = vld [vmem:[%s5573_s1 + $0x49] ss:$4 sm:$0x3]  ;;  %v2876_v35 = vld [vmem:[%s5573_s1 + $0x51] ss:$4 sm:$0x3] }
  0xee   :  { %1252 = vmatpush.msrb.mxu0 %v3414_v30  ;;  %1275 = vmatpush.msrb.mxu1 %v3419_v32  ;;  %v448_v30 = vadd.f32 %v447_v25, %v424_v20  ;;  %v789_v32 = vlaneseq  ;;  %1141 = vst [vmem:[#allocation1] ss:$9 sm:$0xff] %v2874_v26  ;;  %v3125_v20 = vld [vmem:[#allocation2 + $0xd0] sm:$0xff]  ;;  %v3127_v26 = vld [vmem:[#allocation2 + $0x3a8] sm:$0xff] }
  0xef   :  { %1303 = vmatpush.msrb.mxu2 %v3456_v44  ;;  %1326 = vmatpush.msrb.mxu3 %v3458_v45  ;;  %v2878_v44 = vld [vmem:[%s5573_s1 + $0x61] ss:$4 sm:$0x3]  ;;  %1142 = vst [vmem:[#allocation1 + $0x1] ss:$9 sm:$0xff] %v2875_v34  ;;  %v3126_v25 = vld [vmem:[#allocation2 + $0x4d0] sm:$0xff] }
  0xf0   :  { %1253 = vmatpush.msrb.mxu0 %v3430_v36  ;;  %1276 = vmatpush.msrb.mxu1 %v3435_v38  ;;  %v733_v36 = vrot.slane %v448_v30, 7  ;;  %v2877_v38 = vld [vmem:[%s5573_s1 + $0x59] ss:$4 sm:$0x3]  ;;  %vm4111_vm6 = vcmp.lt.s32.totalorder %v789_v32, 256  ;;  %v3128_v30 = vld [vmem:[#allocation2 + $0x7a8] sm:$0xff] }
  0xf1   :  { %1304 = vmatpush.msrb.mxu2 %v3468_v48  ;;  %1327 = vmatpush.msrb.mxu3 %v3470_v49  ;;  %1143 = vst [vmem:[#allocation1 + $0x2] ss:$9 sm:$0xff] %v2876_v35  ;;  %v2879_v49 = vld [vmem:[%s5573_s1 + $0x69] ss:$4 sm:$0x3]  ;;  %v3129_v32 = vld [vmem:[#allocation2 + $0x90] sm:$0xff] }
  0xf2   :  { %1254 = vmatpush.msrb.mxu0 %v3442_v40  ;;  %1277 = vmatpush.msrb.mxu1 %v3449_v42  ;;  %v378_v40 = vpop.f32.mrf.mxu0  ;;  %v401_v42 = vpop.f32.mrf.mxu1  ;;  %1144 = vst [vmem:[#allocation1 + $0x3] ss:$9 sm:$0xff] %v2877_v38  ;;  %v3130_v34 = vld [vmem:[#allocation2 + $0x490] sm:$0xff]  ;;  %v3131_v35 = vld [vmem:[#allocation2 + $0x368] sm:$0xff] }
  0xf3   :  { %v402_v45 = vadd.f32 %v401_v42, %v378_v40  ;;  %1305 = vmatpush.msrb.mxu2 %v3480_v52  ;;  %1328 = vmatpush.msrb.mxu3 %v3482_v53  ;;  %1145 = vst [vmem:[#allocation1 + $0x4] ss:$9 sm:$0xff] %v2878_v44  ;;  %v3133_v38 = vld [vmem:[#allocation2 + $0x50] sm:$0xff] }
  0xf4   :  { %1255 = vmatpush.msrb.mxu0 %v3462_v46  ;;  %1278 = vmatpush.msrb.mxu1 %v3464_v47  ;;  %1146 = vst [vmem:[#allocation1 + $0x5] ss:$9 sm:$0xff] %v2879_v49  ;;  %v3134_v40 = vld [vmem:[#allocation2 + $0x450] sm:$0xff]  ;;  %v5864_v49 = vld [vmem:[#allocation12_spill] sm:$0xff] }
  0xf5   :  { %v736_v46 = vsel %vm735_vm0, %v402_v45, %v733_v36  ;;  %v738_v47 = vsel %vm737_vm1, %v402_v45, %v733_v36  ;;  %v741_v15 = vsel %vm740_vm2, %v402_v45, %v733_v36  ;;  %1306 = vmatpush.msrb.mxu2 %v3488_v56  ;;  %1329 = vmatpush.msrb.mxu3 %v3490_v57 }
  0xf6   :  { %1256 = vmatpush.msrb.mxu0 %v3474_v50  ;;  %1279 = vmatpush.msrb.mxu1 %v3476_v51  ;;  %v739_v52 = vrot.slane %v738_v47, 1  ;;  %v742_v53 = vrot.slane %v741_v15, 2  ;;  %v744_v8 = vsel %vm743_vm3, %v402_v45, %v733_v36  ;;  %v747_v50 = vsel %vm746_vm4, %v402_v45, %v733_v36  ;;  %793 = vst.msk [vmem:[%s5574_s2] ss:$4 sm:$0x3] %vm4111_vm6, %v736_v46  ;;  %v3117_v51 = vld [vmem:[#allocation2 + $0x150] sm:$0xff] }
  0xf7   :  { %v745_v27 = vrot.slane %v744_v8, 3  ;;  %v748_v56 = vrot.slane %v747_v50, 4  ;;  %v750_v57 = vsel %vm749_vm5, %v402_v45, %v733_v36  ;;  %v753_v13 = vsel %vm752_vm7, %v402_v45, %v733_v36  ;;  %1307 = vmatpush.msrb.mxu2 %v3494_v60  ;;  %1330 = vmatpush.msrb.mxu3 %v3496_v61  ;;  %v3121_v60 = vld [vmem:[#allocation2 + $0x18] sm:$0xff]  ;;  %1148 = vst [vmem:[#allocation1 + $0x7] ss:$9 sm:$0xff] %v2881_v24  ;;  %v5865_v15 = vld [vmem:[#allocation13_spill] sm:$0xff] }
  0xf8   :  { %1257 = vmatpush.msrb.mxu0 %v3117_v51  ;;  %1280 = vmatpush.msrb.mxu1 %v3118_v18  ;;  %v751_v16 = vrot.slane %v750_v57, 5  ;;  %v756_v0 = vsel %vm755_vm8, %v733_v36, %v402_v45  ;;  %2803 = vst.msk [vmem:[%s5574_s2 + $0x20] ss:$4 sm:$0x3] %vm4111_vm6, %v739_v52  ;;  %v754_v9 = vrot.slane %v753_v13, 6  ;;  %v3122_v61 = vld [vmem:[#allocation2 + $0x418] sm:$0xff] }
  0xf9   :  { %2804 = vst.msk [vmem:[%s5574_s2 + $0x40] ss:$4 sm:$0x3] %vm4111_vm6, %v742_v53  ;;  %1308 = vmatpush.msrb.mxu2 %v3121_v60  ;;  %1331 = vmatpush.msrb.mxu3 %v3122_v61  ;;  %v757_v22 = vrot.slane %v756_v0, 7  ;;  %v3132_v36 = vld [vmem:[#allocation2 + $0x768] sm:$0xff]  ;;  %v5863_v45 = vld [vmem:[#allocation11_spill] sm:$0xff] }
  0xfa   :  { %1258 = vmatpush.msrb.mxu0 %v3119_v1  ;;  %1281 = vmatpush.msrb.mxu1 %v3120_v10  ;;  %2805 = vst.msk [vmem:[%s5574_s2 + $0x60] ss:$4 sm:$0x3] %vm4111_vm6, %v745_v27  ;;  %v5866_v52 = vld [vmem:[#allocation14_spill] sm:$0xff]  ;;  %v5867_v27 = vld [vmem:[#allocation15_spill] sm:$0xff]  ;;  %v5872_v61 = vld [vmem:[#allocation20_spill] sm:$0xff] }
  0xfb   :  { %2806 = vst.msk [vmem:[%s5574_s2 + $0x80] ss:$4 sm:$0x3] %vm4111_vm6, %v748_v56  ;;  %1217 = vmatmul.f32.vlgmr.msra.gmra.mxu2 %v4087_v28  ;;  %1240 = vmatmul.f32.vlgmr.msra.gmra.mxu3 %v4089_v29  ;;  %v5868_v56 = vld [vmem:[#allocation16_spill] sm:$0xff]  ;;  %v5870_v0 = vld [vmem:[#allocation18_spill] sm:$0xff]  ;;  %v5871_v60 = vld [vmem:[#allocation19_spill] sm:$0xff] }
  0xfc   :  { %2807 = vst.msk [vmem:[%s5574_s2 + $0xa0] ss:$4 sm:$0x3] %vm4111_vm6, %v751_v16  ;;  %1385 = vmatpush.msra.mxu2 %v3123_v12  ;;  %1408 = vmatpush.msra.mxu3 %v3124_v14  ;;  %v5869_v16 = vld [vmem:[#allocation17_spill] sm:$0xff]  ;;  %v5874_v12 = vld [vmem:[#allocation22_spill] sm:$0xff]  ;;  %v5875_v14 = vld [vmem:[#allocation23_spill] sm:$0xff] }
  0xfd   :  { %2808 = vst.msk [vmem:[%s5574_s2 + $0xc0] ss:$4 sm:$0x3] %vm4111_vm6, %v754_v9  ;;  %1259 = vmatpush.msrb.mxu0 %v3125_v20  ;;  %1282 = vmatpush.msrb.mxu1 %v3126_v25  ;;  %v5876_v24 = vld [vmem:[#allocation24_spill] sm:$0xff] }
  0xfe   :  { %2809 = vst.msk [vmem:[%s5574_s2 + $0xe0] ss:$4 sm:$0x3] %vm4111_vm6, %v757_v22  ;;  %1386 = vmatpush.msra.mxu2 %v3127_v26  ;;  %1409 = vmatpush.msra.mxu3 %v3128_v30  ;;  %v4236_v53 = vld [vmem:[#allocation1] sm:$0xff]  ;;  %v4238_v8 = vld [vmem:[#allocation1 + $0x9] sm:$0xff] }
  0xff   :  { %1260 = vmatpush.msrb.mxu0 %v3129_v32  ;;  %1283 = vmatpush.msrb.mxu1 %v3130_v34  ;;  %v5877_v30 = vld [vmem:[#allocation25_spill] sm:$0xff]  ;;  %v5878_v32 = vld [vmem:[#allocation26_spill] sm:$0xff] }
 0x100   :  { %1387 = vmatpush.msra.mxu2 %v3131_v35  ;;  %1410 = vmatpush.msra.mxu3 %v3132_v36 }
 0x101   :  { %1261 = vmatpush.msrb.mxu0 %v3133_v38  ;;  %1284 = vmatpush.msrb.mxu1 %v3134_v40  ;;  %v5879_v40 = vld [vmem:[#allocation27_spill] sm:$0xff] }
 0x102   :  { %1388 = vmatpush.msra.mxu2 %v3517_v17  ;;  %1411 = vmatpush.msra.mxu3 %v3522_v19  ;;  %v427_v17 = vpop.f32.mrf.mxu2  ;;  %v450_v19 = vpop.f32.mrf.mxu3 }
 0x103   :  { %1262 = vmatpush.msrb.mxu0 %v3527_v21  ;;  %1285 = vmatpush.msrb.mxu1 %v3532_v23  ;;  %v451_v21 = vadd.f32 %v450_v19, %v427_v17  ;;  %v5880_v17 = vld [vmem:[#allocation28_spill] sm:$0xff] }
 0x104   :  { %1171 = vmatmul.f32.vlgmr.msra.gmra.mxu0 %v4087_v28  ;;  %1194 = vmatmul.f32.vlgmr.msra.gmra.mxu1 %v4089_v29 }
 0x105   :  { %1339 = vmatpush.msra.mxu0 %v3542_v31  ;;  %1362 = vmatpush.msra.mxu1 %v3544_v33  ;;  %v734_v23 = vrot.slane %v451_v21, 7  ;;  %v381_v31 = vpop.f32.mrf.mxu0  ;;  %v404_v33 = vpop.f32.mrf.mxu1 }
 0x106   :  { %1389 = vmatpush.msra.mxu2 %v3548_v37  ;;  %1412 = vmatpush.msra.mxu3 %v3550_v39  ;;  %v405_v37 = vadd.f32 %v404_v33, %v381_v31  ;;  %v5857_v39 = vld [vmem:[#allocation5_spill] sm:$0xff] }
 0x107   :  { %1340 = vmatpush.msra.mxu0 %v3554_v41  ;;  %1363 = vmatpush.msra.mxu1 %v3556_v43  ;;  %v5858_v41 = vld [vmem:[#allocation6_spill] sm:$0xff]  ;;  %v5881_v33 = vld [vmem:[#allocation29_spill] sm:$0xff] }
 0x108   :  { %1390 = vmatpush.msra.mxu2 %v3560_v54  ;;  %1413 = vmatpush.msra.mxu3 %v3562_v55  ;;  %v758_v43 = vsel %vm735_vm0, %v405_v37, %v734_v23  ;;  %v759_v54 = vsel %vm737_vm1, %v405_v37, %v734_v23  ;;  %v761_v55 = vsel %vm740_vm2, %v405_v37, %v734_v23 }
 0x109   :  { %1341 = vmatpush.msra.mxu0 %v3566_v58  ;;  %1364 = vmatpush.msra.mxu1 %v3568_v59  ;;  %v5859_v58 = vld [vmem:[#allocation7_spill] sm:$0xff]  ;;  %v5860_v59 = vld [vmem:[#allocation8_spill] sm:$0xff]  ;;  %2810 = vst.msk [vmem:[%s5574_s2 + $0x100] ss:$4 sm:$0x3] %vm4111_vm6, %v758_v43  ;;  %v767_v42 = vsel %vm749_vm5, %v405_v37, %v734_v23  ;;  %v769_v44 = vsel %vm752_vm7, %v405_v37, %v734_v23 }
 0x10a   :  { %1391 = vmatpush.msra.mxu2 %v3572_v62  ;;  %1414 = vmatpush.msra.mxu3 %v3574_v63  ;;  %v760_v62 = vrot.slane %v759_v54, 1  ;;  %v762_v63 = vrot.slane %v761_v55, 2  ;;  %v768_v46 = vrot.slane %v767_v42, 5  ;;  %v771_v47 = vsel %vm755_vm8, %v734_v23, %v405_v37  ;;  %v516_v51 = vpop.f32.mrf.mxu2  ;;  %v539_v18 = vpop.f32.mrf.mxu3  ;;  %v5883_v43 = vld [vmem:[#allocation31_spill] sm:$0xff]  ;;  %v5884_v54 = vld [vmem:[#allocation32_spill] sm:$0xff]  ;;  %v5894_v42 = vld [vmem:[#allocation42_spill] sm:$0xff] }
 0x10b   :  { %1342 = vmatpush.msra.mxu0 %v3578_v2  ;;  %1365 = vmatpush.msra.mxu1 %v3580_v3  ;;  %v763_v2 = vsel %vm743_vm3, %v405_v37, %v734_v23  ;;  %v765_v3 = vsel %vm746_vm4, %v405_v37, %v734_v23  ;;  %v770_v50 = vrot.slane %v769_v44, 6  ;;  %v772_v57 = vrot.slane %v771_v47, 7  ;;  %v5882_v37 = vld [vmem:[#allocation30_spill] sm:$0xff]  ;;  %v5895_v44 = vld [vmem:[#allocation43_spill] sm:$0xff] }
 0x10c   :  { %1392 = vmatpush.msra.mxu2 %v3584_v4  ;;  %1415 = vmatpush.msra.mxu3 %v3586_v5  ;;  %v5861_v4 = vld [vmem:[#allocation9_spill] sm:$0xff]  ;;  %v5862_v5 = vld [vmem:[#allocation10_spill] sm:$0xff]  ;;  %2811 = vst.msk [vmem:[%s5574_s2 + $0x120] ss:$4 sm:$0x3] %vm4111_vm6, %v760_v62  ;;  %v540_v13 = vadd.f32 %v539_v18, %v516_v51  ;;  %v5899_v47 = vld [vmem:[#allocation47_spill] sm:$0xff] }
 0x10d   :  { %1343 = vmatpush.msra.mxu0 %v3590_v6  ;;  %1366 = vmatpush.msra.mxu1 %v3592_v7  ;;  %v764_v6 = vrot.slane %v763_v2, 3  ;;  %v766_v7 = vrot.slane %v765_v3, 4  ;;  %2812 = vst.msk [vmem:[%s5574_s2 + $0x140] ss:$4 sm:$0x3] %vm4111_vm6, %v762_v63  ;;  %v470_v10 = vpop.f32.mrf.mxu0  ;;  %v493_v9 = vpop.f32.mrf.mxu1  ;;  %v5887_v63 = vld [vmem:[#allocation35_spill] sm:$0xff] }
 0x10e   :  { %1393 = vmatpush.msra.mxu2 %v5857_v39  ;;  %1416 = vmatpush.msra.mxu3 %v5858_v41  ;;  %2815 = vst.msk [vmem:[%s5574_s2 + $0x1a0] ss:$4 sm:$0x3] %vm4111_vm6, %v768_v46  ;;  %v828_v1 = vrot.slane %v540_v13, 7  ;;  %v494_v22 = vadd.f32 %v493_v9, %v470_v10  ;;  %v5888_v2 = vld [vmem:[#allocation36_spill] sm:$0xff]  ;;  %v5889_v3 = vld [vmem:[#allocation37_spill] sm:$0xff] }
 0x10f   :  { %1344 = vmatpush.msra.mxu0 %v5859_v58  ;;  %1367 = vmatpush.msra.mxu1 %v5860_v59  ;;  %2813 = vst.msk [vmem:[%s5574_s2 + $0x160] ss:$4 sm:$0x3] %vm4111_vm6, %v764_v6  ;;  %v5885_v58 = vld [vmem:[#allocation33_spill] sm:$0xff]  ;;  %v5886_v59 = vld [vmem:[#allocation34_spill] sm:$0xff]  ;;  %v5892_v6 = vld [vmem:[#allocation40_spill] sm:$0xff] }
 0x110   :  { %1394 = vmatpush.msra.mxu2 %v5861_v4  ;;  %1417 = vmatpush.msra.mxu3 %v5862_v5  ;;  %2814 = vst.msk [vmem:[%s5574_s2 + $0x180] ss:$4 sm:$0x3] %vm4111_vm6, %v766_v7  ;;  %v830_v20 = vsel %vm735_vm0, %v494_v22, %v828_v1  ;;  %v831_v25 = vsel %vm737_vm1, %v494_v22, %v828_v1  ;;  %v5890_v4 = vld [vmem:[#allocation38_spill] sm:$0xff]  ;;  %v5891_v5 = vld [vmem:[#allocation39_spill] sm:$0xff]  ;;  %v5893_v7 = vld [vmem:[#allocation41_spill] sm:$0xff] }
 0x111   :  { %1345 = vmatpush.msra.mxu0 %v5863_v45  ;;  %1368 = vmatpush.msra.mxu1 %v5864_v49  ;;  %2816 = vst.msk [vmem:[%s5574_s2 + $0x1c0] ss:$4 sm:$0x3] %vm4111_vm6, %v770_v50  ;;  %v833_v26 = vsel %vm740_vm2, %v494_v22, %v828_v1  ;;  %v832_v34 = vrot.slane %v831_v25, 1  ;;  %v835_v36 = vsel %vm743_vm3, %v494_v22, %v828_v1  ;;  %v5896_v45 = vld [vmem:[#allocation44_spill] sm:$0xff]  ;;  %v5897_v49 = vld [vmem:[#allocation45_spill] sm:$0xff] }
 0x112   :  { %1395 = vmatpush.msra.mxu2 %v5865_v15  ;;  %1418 = vmatpush.msra.mxu3 %v5866_v52  ;;  %2817 = vst.msk [vmem:[%s5574_s2 + $0x1e0] ss:$4 sm:$0x3] %vm4111_vm6, %v772_v57  ;;  %v834_v35 = vrot.slane %v833_v26, 2  ;;  %v837_v38 = vsel %vm746_vm4, %v494_v22, %v828_v1  ;;  %v836_v19 = vrot.slane %v835_v36, 3  ;;  %v839_v23 = vsel %vm749_vm5, %v494_v22, %v828_v1  ;;  %v5898_v46 = vld [vmem:[#allocation46_spill] sm:$0xff]  ;;  %v542_v10 = vpop.f32.mrf.mxu3 }
 0x113   :  { %1346 = vmatpush.msra.mxu0 %v5867_v27  ;;  %1369 = vmatpush.msra.mxu1 %v5868_v56  ;;  %2818 = vst.msk [vmem:[%s5574_s2 + $0x8] ss:$4 sm:$0x3] %vm4111_vm6, %v830_v20  ;;  %v838_v21 = vrot.slane %v837_v38, 4  ;;  %v841_v31 = vsel %vm752_vm7, %v494_v22, %v828_v1  ;;  %v840_v39 = vrot.slane %v839_v23, 5  ;;  %v843_v41 = vsel %vm755_vm8, %v828_v1, %v494_v22  ;;  %v5900_v15 = vld [vmem:[#allocation48_spill] sm:$0xff]  ;;  %v519_v1 = vpop.f32.mrf.mxu2 }
 0x114   :  { %1396 = vmatpush.msra.mxu2 %v5869_v16  ;;  %1419 = vmatpush.msra.mxu3 %v5870_v0  ;;  %2819 = vst.msk [vmem:[%s5574_s2 + $0x28] ss:$4 sm:$0x3] %vm4111_vm6, %v832_v34  ;;  %v842_v55 = vrot.slane %v841_v31, 6  ;;  %v844_v62 = vrot.slane %v843_v41, 7  ;;  %v5901_v52 = vld [vmem:[#allocation49_spill] sm:$0xff] }
 0x115   :  { %1220 = vmatmul.f32.gmra.mxu2 %v4236_v53  ;;  %1243 = vmatmul.f32.gmra.mxu3 %v4238_v8  ;;  %2820 = vst.msk [vmem:[%s5574_s2 + $0x48] ss:$4 sm:$0x3] %vm4111_vm6, %v834_v35  ;;  %v5902_v50 = vld [vmem:[#allocation50_spill] sm:$0xff]  ;;  %v5903_v51 = vld [vmem:[#allocation51_spill] sm:$0xff]  ;;  %v5904_v18 = vld [vmem:[#allocation52_spill] sm:$0xff]  ;;  %v473_v20 = vpop.f32.mrf.mxu0  ;;  %v496_v25 = vpop.f32.mrf.mxu1 }
 0x116   :  { %1347 = vmatpush.msra.mxu0 %v5871_v60  ;;  %1370 = vmatpush.msra.mxu1 %v5872_v61  ;;  %2821 = vst.msk [vmem:[%s5574_s2 + $0x68] ss:$4 sm:$0x3] %vm4111_vm6, %v836_v19  ;;  %v5905_v27 = vld [vmem:[#allocation53_spill] sm:$0xff]  ;;  %v5906_v56 = vld [vmem:[#allocation54_spill] sm:$0xff]  ;;  %v5907_v57 = vld [vmem:[#allocation55_spill] sm:$0xff]  ;;  %v543_v61 = vadd.f32 %v542_v10, %v519_v1 }
 0x117   :  { %1397 = vmatpush.msra.mxu2 %v5873_v11  ;;  %1420 = vmatpush.msra.mxu3 %v5874_v12  ;;  %2822 = vst.msk [vmem:[%s5574_s2 + $0x88] ss:$4 sm:$0x3] %vm4111_vm6, %v838_v21  ;;  %v5908_v13 = vld [vmem:[#allocation56_spill] sm:$0xff]  ;;  %v5909_v16 = vld [vmem:[#allocation57_spill] sm:$0xff]  ;;  %v5910_v0 = vld [vmem:[#allocation58_spill] sm:$0xff] }
 0x118   :  { %1348 = vmatpush.msra.mxu0 %v5875_v14  ;;  %1371 = vmatpush.msra.mxu1 %v5876_v24  ;;  %2823 = vst.msk [vmem:[%s5574_s2 + $0xa8] ss:$4 sm:$0x3] %vm4111_vm6, %v840_v39  ;;  %v5911_v9 = vld [vmem:[#allocation59_spill] sm:$0xff]  ;;  %v5912_v60 = vld [vmem:[#allocation60_spill] sm:$0xff]  ;;  %v5913_v22 = vld [vmem:[#allocation61_spill] sm:$0xff] }
 0x119   :  { %1398 = vmatpush.msra.mxu2 %v5877_v30  ;;  %1421 = vmatpush.msra.mxu3 %v5878_v32  ;;  %2824 = vst.msk [vmem:[%s5574_s2 + $0xc8] ss:$4 sm:$0x3] %vm4111_vm6, %v842_v55  ;;  %v5914_v11 = vld [vmem:[#allocation62_spill] sm:$0xff]  ;;  %v5915_v12 = vld [vmem:[#allocation63_spill] sm:$0xff]  ;;  %v5916_v14 = vld [vmem:[#allocation64_spill] sm:$0xff]  ;;  %v497_v32 = vadd.f32 %v496_v25, %v473_v20 }
 0x11a   :  { %1349 = vmatpush.msra.mxu0 %v5879_v40  ;;  %1372 = vmatpush.msra.mxu1 %v5880_v17  ;;  %2825 = vst.msk [vmem:[%s5574_s2 + $0xe8] ss:$4 sm:$0x3] %vm4111_vm6, %v844_v62  ;;  %v829_v24 = vrot.slane %v543_v61, 7  ;;  %v5917_v26 = vld [vmem:[#allocation65_spill] sm:$0xff]  ;;  %v5918_v30 = vld [vmem:[#allocation66_spill] sm:$0xff] }
 0x11b   :  { %1399 = vmatpush.msra.mxu2 %v5881_v33  ;;  %1422 = vmatpush.msra.mxu3 %v5882_v37  ;;  %v5919_v34 = vld [vmem:[#allocation67_spill] sm:$0xff]  ;;  %v5920_v35 = vld [vmem:[#allocation68_spill] sm:$0xff]  ;;  %v5921_v36 = vld [vmem:[#allocation69_spill] sm:$0xff] }
 0x11c   :  { %1350 = vmatpush.msra.mxu0 %v5883_v43  ;;  %1373 = vmatpush.msra.mxu1 %v5884_v54  ;;  %v5922_v38 = vld [vmem:[#allocation70_spill] sm:$0xff]  ;;  %v845_v40 = vsel %vm735_vm0, %v497_v32, %v829_v24  ;;  %v846_v17 = vsel %vm737_vm1, %v497_v32, %v829_v24  ;;  %v848_v19 = vsel %vm740_vm2, %v497_v32, %v829_v24  ;;  %v5923_v21 = vld [vmem:[#allocation71_spill] sm:$0xff]  ;;  %v5924_v23 = vld [vmem:[#allocation72_spill] sm:$0xff] }
 0x11d   :  { %1400 = vmatpush.msra.mxu2 %v5885_v58  ;;  %1423 = vmatpush.msra.mxu3 %v5886_v59  ;;  %v847_v31 = vrot.slane %v846_v17, 1  ;;  %v849_v33 = vrot.slane %v848_v19, 2  ;;  %v850_v37 = vsel %vm743_vm3, %v497_v32, %v829_v24  ;;  %v852_v39 = vsel %vm746_vm4, %v497_v32, %v829_v24  ;;  %2826 = vst.msk [vmem:[%s5574_s2 + $0x108] ss:$4 sm:$0x3] %vm4111_vm6, %v845_v40  ;;  %v5925_v41 = vld [vmem:[#allocation73_spill] sm:$0xff] }
 0x11e   :  { %1174 = vmatmul.f32.gmra.mxu0 %v4236_v53  ;;  %1197 = vmatmul.f32.gmra.mxu1 %v4238_v8  ;;  %v5926_v43 = vld [vmem:[#allocation74_spill] sm:$0xff]  ;;  %v851_v54 = vrot.slane %v850_v37, 3  ;;  %v853_v55 = vrot.slane %v852_v39, 4  ;;  %v854_v58 = vsel %vm749_vm5, %v497_v32, %v829_v24  ;;  %v856_v59 = vsel %vm752_vm7, %v497_v32, %v829_v24  ;;  %v5927_v62 = vld [vmem:[#allocation75_spill] sm:$0xff]  ;;  %v5944_v20 = vld [vmem:[#allocation92_spill] sm:$0xff] }
 0x11f   :  { %1309 = vmatmul.f32.vlgmr.msrb.gmra.mxu2 %v4087_v28  ;;  %1332 = vmatmul.f32.vlgmr.msrb.gmra.mxu3 %v4089_v29  ;;  %2827 = vst.msk [vmem:[%s5574_s2 + $0x128] ss:$4 sm:$0x3] %vm4111_vm6, %v847_v31  ;;  %v5942_v61 = vld [vmem:[#allocation90_spill] sm:$0xff]  ;;  %v5947_v40 = vld [vmem:[#allocation95_spill] sm:$0xff]  ;;  %v5948_v17 = vld [vmem:[#allocation96_spill] sm:$0xff] }
 0x120   :  { %1477 = vmatpush.msrb.mxu2 %v5887_v63  ;;  %1500 = vmatpush.msrb.mxu3 %v5888_v2  ;;  %v5928_v63 = vld [vmem:[#allocation76_spill] sm:$0xff]  ;;  %v855_v2 = vrot.slane %v854_v58, 5  ;;  %2828 = vst.msk [vmem:[%s5574_s2 + $0x148] ss:$4 sm:$0x3] %vm4111_vm6, %v849_v33  ;;  %v5951_v33 = vld [vmem:[#allocation101_spill] sm:$0xff] }
 0x121   :  { %1351 = vmatpush.msra.mxu0 %v5889_v3  ;;  %1374 = vmatpush.msra.mxu1 %v5890_v4  ;;  %v858_v3 = vsel %vm755_vm8, %v829_v24, %v497_v32  ;;  %v5929_v4 = vld [vmem:[#allocation77_spill] sm:$0xff]  ;;  %2829 = vst.msk [vmem:[%s5574_s2 + $0x168] ss:$4 sm:$0x3] %vm4111_vm6, %v851_v54  ;;  %v5943_v24 = vld [vmem:[#allocation91_spill] sm:$0xff]  ;;  %v5952_v37 = vld [vmem:[#allocation102_spill] sm:$0xff] }
 0x122   :  { %1478 = vmatpush.msrb.mxu2 %v5891_v5  ;;  %1501 = vmatpush.msrb.mxu3 %v5892_v6  ;;  %v5930_v5 = vld [vmem:[#allocation78_spill] sm:$0xff]  ;;  %v857_v6 = vrot.slane %v856_v59, 6  ;;  %2830 = vst.msk [vmem:[%s5574_s2 + $0x188] ss:$4 sm:$0x3] %vm4111_vm6, %v853_v55  ;;  %v5953_v39 = vld [vmem:[#allocation99_spill] sm:$0xff] }
 0x123   :  { %1352 = vmatpush.msra.mxu0 %v5893_v7  ;;  %1375 = vmatpush.msra.mxu1 %v5894_v42  ;;  %v608_v7 = vpop.f32.mrf.mxu2  ;;  %v631_v42 = vpop.f32.mrf.mxu3  ;;  %2831 = vst.msk [vmem:[%s5574_s2 + $0x1a8] ss:$4 sm:$0x3] %vm4111_vm6, %v855_v2  ;;  %v5956_v54 = vld [vmem:[#allocation106_spill] sm:$0xff]  ;;  %v5957_v55 = vld [vmem:[#allocation103_spill] sm:$0xff]  ;;  %v5958_v58 = vld [vmem:[#allocation104_spill] sm:$0xff] }
 0x124   :  { %1479 = vmatpush.msrb.mxu2 %v5895_v44  ;;  %1502 = vmatpush.msrb.mxu3 %v5896_v45  ;;  %v5931_v44 = vld [vmem:[#allocation79_spill] sm:$0xff]  ;;  %v5932_v45 = vld [vmem:[#allocation80_spill] sm:$0xff]  ;;  %2832 = vst.msk [vmem:[%s5574_s2 + $0x1c8] ss:$4 sm:$0x3] %vm4111_vm6, %v857_v6  ;;  %v5959_v59 = vld [vmem:[#allocation109_spill] sm:$0xff] }
 0x125   :  { %1353 = vmatpush.msra.mxu0 %v5897_v49  ;;  %1376 = vmatpush.msra.mxu1 %v5898_v46  ;;  %v859_v49 = vrot.slane %v858_v3, 7  ;;  %v632_v46 = vadd.f32 %v631_v42, %v608_v7  ;;  %v5962_v2 = vld [vmem:[#allocation108_spill] sm:$0xff]  ;;  %v5963_v3 = vld [vmem:[#allocation113_spill] sm:$0xff]  ;;  %v5967_v7 = vld [vmem:[#allocation115_spill] sm:$0xff] }
 0x126   :  { %1480 = vmatpush.msrb.mxu2 %v5899_v47  ;;  %1503 = vmatpush.msrb.mxu3 %v5900_v15  ;;  %v5933_v47 = vld [vmem:[#allocation81_spill] sm:$0xff]  ;;  %v5934_v15 = vld [vmem:[#allocation82_spill] sm:$0xff]  ;;  %v5966_v6 = vld [vmem:[#allocation112_spill] sm:$0xff] }
 0x127   :  { %1354 = vmatpush.msra.mxu0 %v5901_v52  ;;  %1377 = vmatpush.msra.mxu1 %v5902_v50  ;;  %v912_v52 = vrot.slane %v632_v46, 7  ;;  %v562_v50 = vpop.f32.mrf.mxu0  ;;  %2833 = vst.msk [vmem:[%s5574_s2 + $0x1e8] ss:$4 sm:$0x3] %vm4111_vm6, %v859_v49  ;;  %v5968_v42 = vld [vmem:[#allocation116_spill] sm:$0xff]  ;;  %v5971_v49 = vld [vmem:[#allocation119_spill] sm:$0xff] }
 0x128   :  { %1263 = vmatmul.f32.vlgmr.msrb.gmra.mxu0 %v4087_v28  ;;  %1286 = vmatmul.f32.vlgmr.msrb.gmra.mxu1 %v4089_v29  ;;  %v5972_v46 = vld [vmem:[#allocation120_spill] sm:$0xff] }
 0x129   :  { %1431 = vmatpush.msrb.mxu0 %v5903_v51  ;;  %1454 = vmatpush.msrb.mxu1 %v5904_v18  ;;  %v585_v51 = vpop.f32.mrf.mxu1  ;;  %v5935_v18 = vld [vmem:[#allocation83_spill] sm:$0xff] }
 0x12a   :  { %1481 = vmatpush.msrb.mxu2 %v5905_v27  ;;  %1504 = vmatpush.msrb.mxu3 %v5906_v56  ;;  %v5936_v27 = vld [vmem:[#allocation84_spill] sm:$0xff]  ;;  %v586_v56 = vadd.f32 %v585_v51, %v562_v50  ;;  %v5975_v51 = vld [vmem:[#allocation123_spill] sm:$0xff] }
 0x12b   :  { %1432 = vmatpush.msrb.mxu0 %v5907_v57  ;;  %1455 = vmatpush.msrb.mxu1 %v5908_v13  ;;  %v5937_v57 = vld [vmem:[#allocation85_spill] sm:$0xff]  ;;  %v5938_v13 = vld [vmem:[#allocation86_spill] sm:$0xff]  ;;  %v634_v50 = vpop.f32.mrf.mxu3 }
 0x12c   :  { %1482 = vmatpush.msrb.mxu2 %v5909_v16  ;;  %1505 = vmatpush.msrb.mxu3 %v5910_v0  ;;  %v5939_v16 = vld [vmem:[#allocation87_spill] sm:$0xff]  ;;  %v5940_v0 = vld [vmem:[#allocation88_spill] sm:$0xff]  ;;  %v914_v1 = vsel %vm735_vm0, %v586_v56, %v912_v52  ;;  %v915_v10 = vsel %vm737_vm1, %v586_v56, %v912_v52  ;;  %v925_v32 = vsel %vm752_vm7, %v586_v56, %v912_v52 }
 0x12d   :  { %1433 = vmatpush.msrb.mxu0 %v5911_v9  ;;  %1456 = vmatpush.msrb.mxu1 %v5912_v60  ;;  %v917_v9 = vsel %vm740_vm2, %v586_v56, %v912_v52  ;;  %v5941_v60 = vld [vmem:[#allocation89_spill] sm:$0xff]  ;;  %2834 = vst.msk [vmem:[%s5574_s2 + $0x10] ss:$4 sm:$0x3] %vm4111_vm6, %v914_v1  ;;  %v926_v19 = vrot.slane %v925_v32, 6 }
 0x12e   :  { %1483 = vmatpush.msrb.mxu2 %v5913_v22  ;;  %1506 = vmatpush.msrb.mxu3 %v5914_v11  ;;  %v916_v22 = vrot.slane %v915_v10, 1  ;;  %v918_v11 = vrot.slane %v917_v9, 2  ;;  %v5981_v9 = vld [vmem:[#allocation129_spill] sm:$0xff] }
 0x12f   :  { %1434 = vmatpush.msrb.mxu0 %v5915_v12  ;;  %1457 = vmatpush.msrb.mxu1 %v5916_v14  ;;  %v919_v12 = vsel %vm743_vm3, %v586_v56, %v912_v52  ;;  %v921_v14 = vsel %vm746_vm4, %v586_v56, %v912_v52  ;;  %2840 = vst.msk [vmem:[%s5574_s2 + $0xd0] ss:$4 sm:$0x3] %vm4111_vm6, %v926_v19  ;;  %v565_v1 = vpop.f32.mrf.mxu0 }
 0x130   :  { %1484 = vmatpush.msrb.mxu2 %v5917_v26  ;;  %1507 = vmatpush.msrb.mxu3 %v5918_v30  ;;  %v920_v25 = vrot.slane %v919_v12, 3  ;;  %v922_v26 = vrot.slane %v921_v14, 4  ;;  %v923_v30 = vsel %vm749_vm5, %v586_v56, %v912_v52  ;;  %2835 = vst.msk [vmem:[%s5574_s2 + $0x30] ss:$4 sm:$0x3] %vm4111_vm6, %v916_v22  ;;  %v5983_v22 = vld [vmem:[#allocation131_spill] sm:$0xff] }
 0x131   :  { %1435 = vmatpush.msrb.mxu0 %v5919_v34  ;;  %1458 = vmatpush.msrb.mxu1 %v5920_v35  ;;  %v5945_v34 = vld [vmem:[#allocation93_spill] sm:$0xff]  ;;  %v5946_v35 = vld [vmem:[#allocation94_spill] sm:$0xff]  ;;  %2836 = vst.msk [vmem:[%s5574_s2 + $0x50] ss:$4 sm:$0x3] %vm4111_vm6, %v918_v11  ;;  %v588_v10 = vpop.f32.mrf.mxu1  ;;  %v5984_v11 = vld [vmem:[#allocation132_spill] sm:$0xff] }
 0x132   :  { %1485 = vmatpush.msrb.mxu2 %v5921_v36  ;;  %1508 = vmatpush.msrb.mxu3 %v5922_v38  ;;  %v924_v36 = vrot.slane %v923_v30, 5  ;;  %v927_v38 = vsel %vm755_vm8, %v912_v52, %v586_v56  ;;  %2837 = vst.msk [vmem:[%s5574_s2 + $0x70] ss:$4 sm:$0x3] %vm4111_vm6, %v920_v25  ;;  %v611_v52 = vpop.f32.mrf.mxu2  ;;  %v5977_v56 = vld [vmem:[#allocation125_spill] sm:$0xff]  ;;  %v5986_v14 = vld [vmem:[#allocation134_spill] sm:$0xff] }
 0x133   :  { %1436 = vmatpush.msrb.mxu0 %v5923_v21  ;;  %1459 = vmatpush.msrb.mxu1 %v5924_v23  ;;  %v5949_v21 = vld [vmem:[#allocation97_spill] sm:$0xff]  ;;  %v5950_v23 = vld [vmem:[#allocation98_spill] sm:$0xff]  ;;  %v928_v31 = vrot.slane %v927_v38, 7  ;;  %2838 = vst.msk [vmem:[%s5574_s2 + $0x90] ss:$4 sm:$0x3] %vm4111_vm6, %v922_v26 }
 0x134   :  { %1486 = vmatpush.msrb.mxu2 %v5925_v41  ;;  %1509 = vmatpush.msrb.mxu3 %v5926_v43  ;;  %2839 = vst.msk [vmem:[%s5574_s2 + $0xb0] ss:$4 sm:$0x3] %vm4111_vm6, %v924_v36  ;;  %v5954_v41 = vld [vmem:[#allocation100_spill] sm:$0xff]  ;;  %v5955_v43 = vld [vmem:[#allocation105_spill] sm:$0xff]  ;;  %v5987_v26 = vld [vmem:[#allocation135_spill] sm:$0xff] }
 0x135   :  { %1437 = vmatpush.msrb.mxu0 %v5927_v62  ;;  %1460 = vmatpush.msrb.mxu1 %v5928_v63  ;;  %2841 = vst.msk [vmem:[%s5574_s2 + $0xf0] ss:$4 sm:$0x3] %vm4111_vm6, %v928_v31  ;;  %v5960_v62 = vld [vmem:[#allocation110_spill] sm:$0xff]  ;;  %v5961_v63 = vld [vmem:[#allocation107_spill] sm:$0xff]  ;;  %v5985_v12 = vld [vmem:[#allocation133_spill] sm:$0xff] }
 0x136   :  { %1487 = vmatpush.msrb.mxu2 %v5929_v4  ;;  %1510 = vmatpush.msrb.mxu3 %v5930_v5  ;;  %v5964_v4 = vld [vmem:[#allocation114_spill] sm:$0xff]  ;;  %v5965_v5 = vld [vmem:[#allocation111_spill] sm:$0xff]  ;;  %v5988_v30 = vld [vmem:[#allocation136_spill] sm:$0xff] }
 0x137   :  { %1438 = vmatpush.msrb.mxu0 %v5931_v44  ;;  %1461 = vmatpush.msrb.mxu1 %v5932_v45  ;;  %v5969_v44 = vld [vmem:[#allocation117_spill] sm:$0xff]  ;;  %v5970_v45 = vld [vmem:[#allocation118_spill] sm:$0xff]  ;;  %v5991_v31 = vld [vmem:[#allocation139_spill] sm:$0xff] }
 0x138   :  { %1488 = vmatpush.msrb.mxu2 %v5933_v47  ;;  %1511 = vmatpush.msrb.mxu3 %v5934_v15  ;;  %v5973_v47 = vld [vmem:[#allocation121_spill] sm:$0xff]  ;;  %v5974_v15 = vld [vmem:[#allocation122_spill] sm:$0xff] }
 0x139   :  { %1312 = vmatmul.f32.gmra.mxu2 %v4236_v53  ;;  %1335 = vmatmul.f32.gmra.mxu3 %v4238_v8  ;;  %v5989_v38 = vld [vmem:[#allocation137_spill] sm:$0xff] }
 0x13a   :  { %1439 = vmatpush.msrb.mxu0 %v5935_v18  ;;  %1462 = vmatpush.msrb.mxu1 %v5936_v27  ;;  %v5976_v18 = vld [vmem:[#allocation124_spill] sm:$0xff]  ;;  %v635_v27 = vadd.f32 %v634_v50, %v611_v52 }
 0x13b   :  { %1489 = vmatpush.msrb.mxu2 %v5937_v57  ;;  %1512 = vmatpush.msrb.mxu3 %v5938_v13  ;;  %v5978_v57 = vld [vmem:[#allocation126_spill] sm:$0xff]  ;;  %v5979_v13 = vld [vmem:[#allocation127_spill] sm:$0xff] }
 0x13c   :  { %1440 = vmatpush.msrb.mxu0 %v5939_v16  ;;  %1463 = vmatpush.msrb.mxu1 %v5940_v0  ;;  %v5980_v16 = vld [vmem:[#allocation128_spill] sm:$0xff]  ;;  %v913_v0 = vrot.slane %v635_v27, 7  ;;  %v3144_v27 = vld [vmem:[#allocation2 + $0x488] sm:$0xff] }
 0x13d   :  { %1490 = vmatpush.msrb.mxu2 %v5941_v60  ;;  %1513 = vmatpush.msrb.mxu3 %v5942_v61  ;;  %v5982_v60 = vld [vmem:[#allocation130_spill] sm:$0xff]  ;;  %v589_v61 = vadd.f32 %v588_v10, %v565_v1  ;;  %v3146_v1 = vld [vmem:[#allocation2 + $0x540] sm:$0xff] }
 0x13e   :  { %1441 = vmatpush.msrb.mxu0 %v5943_v24  ;;  %1464 = vmatpush.msrb.mxu1 %v5944_v20 }
 0x13f   :  { %1491 = vmatpush.msrb.mxu2 %v5945_v34  ;;  %1514 = vmatpush.msrb.mxu3 %v5946_v35  ;;  %v929_v24 = vsel %vm735_vm0, %v589_v61, %v913_v0  ;;  %v930_v20 = vsel %vm737_vm1, %v589_v61, %v913_v0  ;;  %v932_v25 = vsel %vm740_vm2, %v589_v61, %v913_v0 }
 0x140   :  { %1442 = vmatpush.msrb.mxu0 %v5947_v40  ;;  %1465 = vmatpush.msrb.mxu1 %v5948_v17  ;;  %v931_v32 = vrot.slane %v930_v20, 1  ;;  %v933_v34 = vrot.slane %v932_v25, 2  ;;  %v934_v35 = vsel %vm743_vm3, %v589_v61, %v913_v0  ;;  %v936_v36 = vsel %vm746_vm4, %v589_v61, %v913_v0  ;;  %2842 = vst.msk [vmem:[%s5574_s2 + $0x110] ss:$4 sm:$0x3] %vm4111_vm6, %v929_v24  ;;  %v5990_v40 = vld [vmem:[#allocation138_spill] sm:$0xff] }
 0x141   :  { %1492 = vmatpush.msrb.mxu2 %v5949_v21  ;;  %1515 = vmatpush.msrb.mxu3 %v5950_v23  ;;  %v935_v17 = vrot.slane %v934_v35, 3  ;;  %v937_v19 = vrot.slane %v936_v36, 4  ;;  %v938_v21 = vsel %vm749_vm5, %v589_v61, %v913_v0  ;;  %v940_v23 = vsel %vm752_vm7, %v589_v61, %v913_v0  ;;  %v3149_v24 = vld [vmem:[#allocation2 + $0x100] sm:$0xff]  ;;  %v3154_v35 = vld [vmem:[#allocation2 + $0x7d8] sm:$0xff] }
 0x142   :  { %1266 = vmatmul.f32.gmra.mxu0 %v4236_v53  ;;  %1289 = vmatmul.f32.gmra.mxu1 %v4238_v8  ;;  %2843 = vst.msk [vmem:[%s5574_s2 + $0x130] ss:$4 sm:$0x3] %vm4111_vm6, %v931_v32  ;;  %v3150_v20 = vld [vmem:[#allocation2 + $0x500] sm:$0xff] }
 0x143   :  { %1401 = vmatmul.f32.vlgmr.msra.gmra.mxu2 %v4087_v28  ;;  %1424 = vmatmul.f32.vlgmr.msra.gmra.mxu3 %v4089_v29  ;;  %2844 = vst.msk [vmem:[%s5574_s2 + $0x150] ss:$4 sm:$0x3] %vm4111_vm6, %v933_v34  ;;  %v3153_v34 = vld [vmem:[#allocation2 + $0x3d8] sm:$0xff] }
 0x144   :  { %1984 = vmatpush.msra.mxu2 %v5951_v33  ;;  %2007 = vmatpush.msra.mxu3 %v5952_v37  ;;  %v5992_v33 = vld [vmem:[#allocation140_spill] sm:$0xff]  ;;  %v939_v37 = vrot.slane %v938_v21, 5  ;;  %2845 = vst.msk [vmem:[%s5574_s2 + $0x170] ss:$4 sm:$0x3] %vm4111_vm6, %v935_v17 }
 0x145   :  { %1443 = vmatpush.msrb.mxu0 %v5953_v39  ;;  %1466 = vmatpush.msrb.mxu1 %v5954_v41  ;;  %v942_v39 = vsel %vm755_vm8, %v913_v0, %v589_v61  ;;  %v5993_v41 = vld [vmem:[#allocation141_spill] sm:$0xff]  ;;  %2846 = vst.msk [vmem:[%s5574_s2 + $0x190] ss:$4 sm:$0x3] %vm4111_vm6, %v937_v19  ;;  %v3157_v19 = vld [vmem:[#allocation2 + $0x398] sm:$0xff] }
 0x146   :  { %1985 = vmatpush.msra.mxu2 %v5955_v43  ;;  %2008 = vmatpush.msra.mxu3 %v5956_v54  ;;  %v5994_v43 = vld [vmem:[#allocation142_spill] sm:$0xff]  ;;  %v941_v54 = vrot.slane %v940_v23, 6  ;;  %2847 = vst.msk [vmem:[%s5574_s2 + $0x1b0] ss:$4 sm:$0x3] %vm4111_vm6, %v939_v37  ;;  %v3145_v0 = vld [vmem:[#allocation2 + $0x140] sm:$0xff] }
 0x147   :  { %1444 = vmatpush.msrb.mxu0 %v5957_v55  ;;  %1467 = vmatpush.msrb.mxu1 %v5958_v58  ;;  %v700_v55 = vpop.f32.mrf.mxu2  ;;  %v723_v58 = vpop.f32.mrf.mxu3  ;;  %v2946_v36 = vld [vmem:[%s5573_s1 + $0x2] ss:$4 sm:$0x3]  ;;  %v2947_v17 = vld [vmem:[%s5573_s1 + $0xa] ss:$4 sm:$0x3] }
 0x148   :  { %1986 = vmatpush.msra.mxu2 %v5959_v59  ;;  %2009 = vmatpush.msra.mxu3 %v5960_v62  ;;  %v5995_v59 = vld [vmem:[#allocation143_spill] sm:$0xff]  ;;  %v5996_v62 = vld [vmem:[#allocation144_spill] sm:$0xff]  ;;  %2848 = vst.msk [vmem:[%s5574_s2 + $0x1d0] ss:$4 sm:$0x3] %vm4111_vm6, %v941_v54  ;;  %v3163_v54 = vld [vmem:[#allocation2 + $0x40] sm:$0xff] }
 0x149   :  { %1445 = vmatpush.msrb.mxu0 %v5961_v63  ;;  %1468 = vmatpush.msrb.mxu1 %v5962_v2  ;;  %v943_v63 = vrot.slane %v942_v39, 7  ;;  %v724_v2 = vadd.f32 %v723_v58, %v700_v55  ;;  %v3158_v21 = vld [vmem:[#allocation2 + $0x798] sm:$0xff]  ;;  %v2948_v23 = vld [vmem:[%s5573_s1 + $0x12] ss:$4 sm:$0x3]  ;;  %v3164_v55 = vld [vmem:[#allocation2 + $0x440] sm:$0xff] }
 0x14a   :  { %1987 = vmatpush.msra.mxu2 %v5963_v3  ;;  %2010 = vmatpush.msra.mxu3 %v5964_v4  ;;  %v3135_v3 = vld [vmem:[#allocation2 + $0x108] sm:$0xff]  ;;  %v2949_v37 = vld [vmem:[%s5573_s1 + $0x1a] ss:$4 sm:$0x3]  ;;  %1907 = vst [vmem:[#allocation1] ss:$9 sm:$0xff] %v2946_v36 }
 0x14b   :  { %1446 = vmatpush.msrb.mxu0 %v5965_v5  ;;  %1469 = vmatpush.msrb.mxu1 %v5966_v6  ;;  %v3136_v4 = vld [vmem:[#allocation2 + $0x508] sm:$0xff]  ;;  %v996_v5 = vrot.slane %v724_v2, 7  ;;  %v654_v6 = vpop.f32.mrf.mxu0  ;;  %2849 = vst.msk [vmem:[%s5574_s2 + $0x1f0] ss:$4 sm:$0x3] %vm4111_vm6, %v943_v63  ;;  %v3161_v39 = vld [vmem:[#allocation2 + $0x358] sm:$0xff] }
 0x14c   :  { %1355 = vmatmul.f32.vlgmr.msra.gmra.mxu0 %v4087_v28  ;;  %1378 = vmatmul.f32.vlgmr.msra.gmra.mxu1 %v4089_v29  ;;  %1909 = vst [vmem:[#allocation1 + $0x1] ss:$9 sm:$0xff] %v2947_v17  ;;  %v2951_v58 = vld [vmem:[%s5573_s1 + $0x2a] ss:$4 sm:$0x3]  ;;  %v3193_v17 = vld [vmem:[#allocation2 + $0x250] sm:$0xff] }
 0x14d   :  { %1938 = vmatpush.msra.mxu0 %v5967_v7  ;;  %1961 = vmatpush.msra.mxu1 %v5968_v42  ;;  %v677_v7 = vpop.f32.mrf.mxu1  ;;  %v3137_v42 = vld [vmem:[#allocation2 + $0x1c0] sm:$0xff]  ;;  %1911 = vst [vmem:[#allocation1 + $0x2] ss:$9 sm:$0xff] %v2948_v23  ;;  %v2952_v63 = vld [vmem:[%s5573_s1 + $0x32] ss:$4 sm:$0x3] }
 0x14e   :  { %1988 = vmatpush.msra.mxu2 %v5969_v44  ;;  %2011 = vmatpush.msra.mxu3 %v5970_v45  ;;  %v3138_v44 = vld [vmem:[#allocation2 + $0x5c0] sm:$0xff]  ;;  %v678_v45 = vadd.f32 %v677_v7, %v654_v6  ;;  %1913 = vst [vmem:[#allocation1 + $0x3] ss:$9 sm:$0xff] %v2949_v37  ;;  %v3170_v6 = vld [vmem:[#allocation2 + $0x7d0] sm:$0xff]  ;;  %v3171_v7 = vld [vmem:[#allocation2 + $0x2d8] sm:$0xff] }
 0x14f   :  { %1939 = vmatpush.msra.mxu0 %v5971_v49  ;;  %1962 = vmatpush.msra.mxu1 %v5972_v46  ;;  %v3139_v49 = vld [vmem:[#allocation2 + $0xc8] sm:$0xff]  ;;  %v3167_v2 = vld [vmem:[#allocation2] sm:$0xff]  ;;  %1917 = vst [vmem:[#allocation1 + $0x5] ss:$9 sm:$0xff] %v2951_v58 }
 0x150   :  { %1989 = vmatpush.msra.mxu2 %v5973_v47  ;;  %2012 = vmatpush.msra.mxu3 %v5974_v15  ;;  %v3140_v46 = vld [vmem:[#allocation2 + $0x4c8] sm:$0xff]  ;;  %v3141_v47 = vld [vmem:[#allocation2 + $0x180] sm:$0xff]  ;;  %v998_v52 = vsel %vm735_vm0, %v678_v45, %v996_v5  ;;  %v999_v50 = vsel %vm737_vm1, %v678_v45, %v996_v5  ;;  %v1009_v61 = vsel %vm752_vm7, %v678_v45, %v996_v5 }
 0x151   :  { %1940 = vmatpush.msra.mxu0 %v5975_v51  ;;  %1963 = vmatpush.msra.mxu1 %v5976_v18  ;;  %v3142_v15 = vld [vmem:[#allocation2 + $0x580] sm:$0xff]  ;;  %v1001_v51 = vsel %vm740_vm2, %v678_v45, %v996_v5  ;;  %v3143_v18 = vld [vmem:[#allocation2 + $0x88] sm:$0xff]  ;;  %2850 = vst.msk [vmem:[%s5574_s2 + $0x18] ss:$4 sm:$0x3] %vm4111_vm6, %v998_v52  ;;  %v1010_v25 = vrot.slane %v1009_v61, 6 }
 0x152   :  { %1990 = vmatpush.msra.mxu2 %v5977_v56  ;;  %2013 = vmatpush.msra.mxu3 %v5978_v57  ;;  %v1000_v56 = vrot.slane %v999_v50, 1  ;;  %v1002_v57 = vrot.slane %v1001_v51, 2  ;;  %1919 = vst [vmem:[#allocation1 + $0x6] ss:$9 sm:$0xff] %v2952_v63  ;;  %v3179_v50 = vld [vmem:[#allocation2 + $0x258] sm:$0xff] }
 0x153   :  { %1941 = vmatpush.msra.mxu0 %v5979_v13  ;;  %1964 = vmatpush.msra.mxu1 %v5980_v16  ;;  %v1003_v13 = vsel %vm743_vm3, %v678_v45, %v996_v5  ;;  %v1005_v16 = vsel %vm746_vm4, %v678_v45, %v996_v5  ;;  %2856 = vst.msk [vmem:[%s5574_s2 + $0xd8] ss:$4 sm:$0x3] %vm4111_vm6, %v1010_v25  ;;  %v3180_v51 = vld [vmem:[#allocation2 + $0x658] sm:$0xff] }
 0x154   :  { %1991 = vmatpush.msra.mxu2 %v5981_v9  ;;  %2014 = vmatpush.msra.mxu3 %v5982_v60  ;;  %v1004_v10 = vrot.slane %v1003_v13, 3  ;;  %v1006_v9 = vrot.slane %v1005_v16, 4  ;;  %v1007_v60 = vsel %vm749_vm5, %v678_v45, %v996_v5  ;;  %2851 = vst.msk [vmem:[%s5574_s2 + $0x38] ss:$4 sm:$0x3] %vm4111_vm6, %v1000_v56  ;;  %v3183_v16 = vld [vmem:[#allocation2 + $0x218] sm:$0xff] }
 0x155   :  { %1942 = vmatpush.msra.mxu0 %v5983_v22  ;;  %1965 = vmatpush.msra.mxu1 %v5984_v11  ;;  %v3147_v22 = vld [vmem:[#allocation2 + $0x48] sm:$0xff]  ;;  %2852 = vst.msk [vmem:[%s5574_s2 + $0x58] ss:$4 sm:$0x3] %vm4111_vm6, %v1002_v57  ;;  %v657_v57 = vpop.f32.mrf.mxu0  ;;  %v680_v13 = vpop.f32.mrf.mxu1  ;;  %v3188_v61 = vld [vmem:[#allocation2 + $0x5d8] sm:$0xff] }
 0x156   :  { %1992 = vmatpush.msra.mxu2 %v5985_v12  ;;  %2015 = vmatpush.msra.mxu3 %v5986_v14  ;;  %v3148_v11 = vld [vmem:[#allocation2 + $0x448] sm:$0xff]  ;;  %v1008_v12 = vrot.slane %v1007_v60, 5  ;;  %v1011_v14 = vsel %vm755_vm8, %v996_v5, %v678_v45  ;;  %2853 = vst.msk [vmem:[%s5574_s2 + $0x78] ss:$4 sm:$0x3] %vm4111_vm6, %v1004_v10  ;;  %v3169_v5 = vld [vmem:[#allocation2 + $0x3d0] sm:$0xff] }
 0x157   :  { %1943 = vmatpush.msra.mxu0 %v5987_v26  ;;  %1966 = vmatpush.msra.mxu1 %v5988_v30  ;;  %v3151_v26 = vld [vmem:[#allocation2 + $0x8] sm:$0xff]  ;;  %v1012_v32 = vrot.slane %v1011_v14, 7  ;;  %2854 = vst.msk [vmem:[%s5574_s2 + $0x98] ss:$4 sm:$0x3] %vm4111_vm6, %v1006_v9  ;;  %v3174_v45 = vld [vmem:[#allocation2 + $0x790] sm:$0xff] }
 0x158   :  { %1993 = vmatpush.msra.mxu2 %v5989_v38  ;;  %2016 = vmatpush.msra.mxu3 %v5990_v40  ;;  %v3152_v30 = vld [vmem:[#allocation2 + $0x408] sm:$0xff]  ;;  %2855 = vst.msk [vmem:[%s5574_s2 + $0xb8] ss:$4 sm:$0x3] %vm4111_vm6, %v1008_v12  ;;  %v3155_v38 = vld [vmem:[#allocation2 + $0xc0] sm:$0xff]  ;;  %v3185_v10 = vld [vmem:[#allocation2 + $0x2d0] sm:$0xff] }
 0x159   :  { %1944 = vmatpush.msra.mxu0 %v5991_v31  ;;  %1967 = vmatpush.msra.mxu1 %v5992_v33  ;;  %v3156_v40 = vld [vmem:[#allocation2 + $0x4c0] sm:$0xff]  ;;  %2857 = vst.msk [vmem:[%s5574_s2 + $0xf8] ss:$4 sm:$0x3] %vm4111_vm6, %v1012_v32  ;;  %v3186_v9 = vld [vmem:[#allocation2 + $0x6d0] sm:$0xff]  ;;  %v3187_v60 = vld [vmem:[#allocation2 + $0x1d8] sm:$0xff] }
 0x15a   :  { %1994 = vmatpush.msra.mxu2 %v5993_v41  ;;  %2017 = vmatpush.msra.mxu3 %v5994_v43  ;;  %v3159_v31 = vld [vmem:[#allocation2 + $0x80] sm:$0xff]  ;;  %v3162_v41 = vld [vmem:[#allocation2 + $0x758] sm:$0xff]  ;;  %v3189_v14 = vld [vmem:[#allocation2 + $0x290] sm:$0xff] }
 0x15b   :  { %1945 = vmatpush.msra.mxu0 %v5995_v59  ;;  %1968 = vmatpush.msra.mxu1 %v5996_v62  ;;  %v3160_v33 = vld [vmem:[#allocation2 + $0x480] sm:$0xff]  ;;  %v2950_v43 = vld [vmem:[%s5573_s1 + $0x22] ss:$4 sm:$0x3] }
 0x15c   :  { %1995 = vmatpush.msra.mxu2 %v3135_v3  ;;  %2018 = vmatpush.msra.mxu3 %v3136_v4  ;;  %v3165_v59 = vld [vmem:[#allocation2 + $0x318] sm:$0xff]  ;;  %v3168_v3 = vld [vmem:[#allocation2 + $0x400] sm:$0xff]  ;;  %v2953_v4 = vld [vmem:[%s5573_s1 + $0x3a] ss:$4 sm:$0x3] }
 0x15d   :  { %1404 = vmatmul.f32.gmra.mxu2 %v4236_v53  ;;  %1427 = vmatmul.f32.gmra.mxu3 %v4238_v8  ;;  %v3166_v62 = vld [vmem:[#allocation2 + $0x718] sm:$0xff]  ;;  %1915 = vst [vmem:[#allocation1 + $0x4] ss:$9 sm:$0xff] %v2950_v43  ;;  %v3197_v43 = vld [vmem:[#allocation2 + $0x210] sm:$0xff] }
 0x15e   :  { %1946 = vmatpush.msra.mxu0 %v3137_v42  ;;  %1969 = vmatpush.msra.mxu1 %v3138_v44  ;;  %v3172_v42 = vld [vmem:[#allocation2 + $0x6d8] sm:$0xff]  ;;  %1921 = vst [vmem:[#allocation1 + $0x7] ss:$9 sm:$0xff] %v2953_v4  ;;  %v3173_v44 = vld [vmem:[#allocation2 + $0x390] sm:$0xff] }
 0x15f   :  { %1996 = vmatpush.msra.mxu2 %v3139_v49  ;;  %2019 = vmatpush.msra.mxu3 %v3140_v46  ;;  %v3175_v49 = vld [vmem:[#allocation2 + $0x298] sm:$0xff]  ;;  %v726_v46 = vpop.f32.mrf.mxu3  ;;  %v3201_v4 = vld [vmem:[#allocation2 + $0x1d0] sm:$0xff] }
 0x160   :  { %1947 = vmatpush.msra.mxu0 %v3141_v47  ;;  %1970 = vmatpush.msra.mxu1 %v3142_v15  ;;  %v3177_v47 = vld [vmem:[#allocation2 + $0x350] sm:$0xff]  ;;  %v3191_v32 = vld [vmem:[#allocation2 + $0x198] sm:$0xff] }
 0x161   :  { %1997 = vmatpush.msra.mxu2 %v3143_v18  ;;  %2020 = vmatpush.msra.mxu3 %v3144_v27  ;;  %v3178_v15 = vld [vmem:[#allocation2 + $0x750] sm:$0xff] }
 0x162   :  { %1948 = vmatpush.msra.mxu0 %v3145_v0  ;;  %1971 = vmatpush.msra.mxu1 %v3146_v1  ;;  %v3181_v18 = vld [vmem:[#allocation2 + $0x310] sm:$0xff]  ;;  %v3184_v0 = vld [vmem:[#allocation2 + $0x618] sm:$0xff]  ;;  %v681_v1 = vadd.f32 %v680_v13, %v657_v57 }
 0x163   :  { %1998 = vmatpush.msra.mxu2 %v3147_v22  ;;  %2021 = vmatpush.msra.mxu3 %v3148_v11  ;;  %v3182_v27 = vld [vmem:[#allocation2 + $0x710] sm:$0xff] }
 0x164   :  { %1949 = vmatpush.msra.mxu0 %v3149_v24  ;;  %1972 = vmatpush.msra.mxu1 %v3150_v20  ;;  %v3190_v24 = vld [vmem:[#allocation2 + $0x690] sm:$0xff] }
 0x165   :  { %1999 = vmatpush.msra.mxu2 %v3151_v26  ;;  %2022 = vmatpush.msra.mxu3 %v3152_v30 }
 0x166   :  { %1358 = vmatmul.f32.gmra.mxu0 %v4236_v53  ;;  %1381 = vmatmul.f32.gmra.mxu1 %v4238_v8 }
 0x167   :  { %1493 = vmatmul.f32.vlgmr.msrb.gmra.mxu2 %v4087_v28  ;;  %1516 = vmatmul.f32.vlgmr.msrb.gmra.mxu3 %v4089_v29 }
 0x168   :  { %2076 = vmatpush.msrb.mxu2 %v3153_v34  ;;  %2099 = vmatpush.msrb.mxu3 %v3154_v35  ;;  %v3192_v34 = vld [vmem:[#allocation2 + $0x598] sm:$0xff] }
 0x169   :  { %1950 = vmatpush.msra.mxu0 %v3155_v38  ;;  %1973 = vmatpush.msra.mxu1 %v3156_v40 }
 0x16a   :  { %2077 = vmatpush.msrb.mxu2 %v3157_v19  ;;  %2100 = vmatpush.msrb.mxu3 %v3158_v21  ;;  %v3194_v19 = vld [vmem:[#allocation2 + $0x650] sm:$0xff] }
 0x16b   :  { %1951 = vmatpush.msra.mxu0 %v3159_v31  ;;  %1974 = vmatpush.msra.mxu1 %v3160_v33  ;;  %v3195_v31 = vld [vmem:[#allocation2 + $0x158] sm:$0xff] }
 0x16c   :  { %2078 = vmatpush.msrb.mxu2 %v3161_v39  ;;  %2101 = vmatpush.msrb.mxu3 %v3162_v41  ;;  %v3196_v33 = vld [vmem:[#allocation2 + $0x558] sm:$0xff] }
 0x16d   :  { %1952 = vmatpush.msra.mxu0 %v3163_v54  ;;  %1975 = vmatpush.msra.mxu1 %v3164_v55  ;;  %v3198_v54 = vld [vmem:[#allocation2 + $0x610] sm:$0xff] }
 0x16e   :  { %2079 = vmatpush.msrb.mxu2 %v3165_v59  ;;  %2102 = vmatpush.msrb.mxu3 %v3166_v62  ;;  %v3199_v59 = vld [vmem:[#allocation2 + $0x118] sm:$0xff] }
 0x16f   :  { %1953 = vmatpush.msra.mxu0 %v3167_v2  ;;  %1976 = vmatpush.msra.mxu1 %v3168_v3  ;;  %v3200_v62 = vld [vmem:[#allocation2 + $0x518] sm:$0xff] }
 0x170   :  { %1447 = vmatmul.f32.vlgmr.msrb.gmra.mxu0 %v4087_v28  ;;  %1470 = vmatmul.f32.vlgmr.msrb.gmra.mxu1 %v4089_v29  ;;  %v3176_v28 = vld [vmem:[#allocation2 + $0x698] sm:$0xff]  ;;  %v703_v29 = vpop.f32.mrf.mxu2 }
 0x171   :  { %2030 = vmatpush.msrb.mxu0 %v3169_v5  ;;  %2053 = vmatpush.msrb.mxu1 %v3170_v6  ;;  %v727_v52 = vadd.f32 %v726_v46, %v703_v29  ;;  %v3202_v5 = vld [vmem:[#allocation2 + $0x5d0] sm:$0xff]  ;;  %v3207_v46 = vld [vmem:[#allocation2 + $0x98] sm:$0xff] }
 0x172   :  { %2080 = vmatpush.msrb.mxu2 %v3171_v7  ;;  %2103 = vmatpush.msrb.mxu3 %v3172_v42  ;;  %v3203_v7 = vld [vmem:[#allocation2 + $0xd8] sm:$0xff] }
 0x173   :  { %2031 = vmatpush.msrb.mxu0 %v3173_v44  ;;  %2054 = vmatpush.msrb.mxu1 %v3174_v45  ;;  %v997_v56 = vrot.slane %v727_v52, 7  ;;  %v3204_v42 = vld [vmem:[#allocation2 + $0x4d8] sm:$0xff]  ;;  %v3205_v44 = vld [vmem:[#allocation2 + $0x190] sm:$0xff] }
 0x174   :  { %2081 = vmatpush.msrb.mxu2 %v3175_v49  ;;  %2104 = vmatpush.msrb.mxu3 %v3176_v28  ;;  %v3206_v45 = vld [vmem:[#allocation2 + $0x590] sm:$0xff] }
 0x175   :  { %2032 = vmatpush.msrb.mxu0 %v3177_v47  ;;  %2055 = vmatpush.msrb.mxu1 %v3178_v15  ;;  %v1013_v22 = vsel %vm735_vm0, %v681_v1, %v997_v56  ;;  %v1014_v11 = vsel %vm737_vm1, %v681_v1, %v997_v56  ;;  %v1016_v12 = vsel %vm740_vm2, %v681_v1, %v997_v56  ;;  %v3208_v47 = vld [vmem:[#allocation2 + $0x498] sm:$0xff] }
 0x176   :  { %2082 = vmatpush.msrb.mxu2 %v3179_v50  ;;  %2105 = vmatpush.msrb.mxu3 %v3180_v51  ;;  %v1015_v20 = vrot.slane %v1014_v11, 1  ;;  %v1017_v25 = vrot.slane %v1016_v12, 2  ;;  %v1018_v26 = vsel %vm743_vm3, %v681_v1, %v997_v56  ;;  %v1020_v30 = vsel %vm746_vm4, %v681_v1, %v997_v56  ;;  %2858 = vst.msk [vmem:[%s5574_s2 + $0x118] ss:$4 sm:$0x3] %vm4111_vm6, %v1013_v22  ;;  %v4756_v22 = vld [vmem:[#allocation1] sm:$0xff] }
 0x177   :  { %2033 = vmatpush.msrb.mxu0 %v3181_v18  ;;  %2056 = vmatpush.msrb.mxu1 %v3182_v27  ;;  %v1019_v35 = vrot.slane %v1018_v26, 3  ;;  %v1021_v36 = vrot.slane %v1020_v30, 4  ;;  %v1022_v38 = vsel %vm749_vm5, %v681_v1, %v997_v56  ;;  %v1024_v40 = vsel %vm752_vm7, %v681_v1, %v997_v56  ;;  %v3209_v18 = vld [vmem:[#allocation2 + $0x150] sm:$0xff]  ;;  %v4758_v11 = vld [vmem:[#allocation1 + $0x9] sm:$0xff] }
 0x178   :  { %2083 = vmatpush.msrb.mxu2 %v3183_v16  ;;  %2106 = vmatpush.msrb.mxu3 %v3184_v0  ;;  %v1023_v21 = vrot.slane %v1022_v38, 5  ;;  %v1026_v23 = vsel %vm755_vm8, %v997_v56, %v681_v1  ;;  %2859 = vst.msk [vmem:[%s5574_s2 + $0x138] ss:$4 sm:$0x3] %vm4111_vm6, %v1015_v20  ;;  %v1025_v37 = vrot.slane %v1024_v40, 6  ;;  %v3210_v27 = vld [vmem:[#allocation2 + $0x550] sm:$0xff] }
 0x179   :  { %2034 = vmatpush.msrb.mxu0 %v3185_v10  ;;  %2057 = vmatpush.msrb.mxu1 %v3186_v9  ;;  %2860 = vst.msk [vmem:[%s5574_s2 + $0x158] ss:$4 sm:$0x3] %vm4111_vm6, %v1017_v25  ;;  %v1027_v55 = vrot.slane %v1026_v23, 7  ;;  %v3211_v0 = vld [vmem:[#allocation2 + $0x58] sm:$0xff]  ;;  %v3218_v25 = vld [vmem:[#allocation2 + $0x7e8] sm:$0xff] }
 0x17a   :  { %2084 = vmatpush.msrb.mxu2 %v3187_v60  ;;  %2107 = vmatpush.msrb.mxu3 %v3188_v61  ;;  %2861 = vst.msk [vmem:[%s5574_s2 + $0x178] ss:$4 sm:$0x3] %vm4111_vm6, %v1019_v35  ;;  %v3212_v1 = vld [vmem:[#allocation2 + $0x458] sm:$0xff]  ;;  %v3213_v60 = vld [vmem:[#allocation2 + $0x110] sm:$0xff]  ;;  %v3221_v35 = vld [vmem:[#allocation2 + $0x3a8] sm:$0xff] }
 0x17b   :  { %2035 = vmatpush.msrb.mxu0 %v3189_v14  ;;  %2058 = vmatpush.msrb.mxu1 %v3190_v24  ;;  %2862 = vst.msk [vmem:[%s5574_s2 + $0x198] ss:$4 sm:$0x3] %vm4111_vm6, %v1021_v36  ;;  %v3214_v61 = vld [vmem:[#allocation2 + $0x510] sm:$0xff]  ;;  %v3215_v14 = vld [vmem:[#allocation2 + $0x18] sm:$0xff]  ;;  %v3222_v36 = vld [vmem:[#allocation2 + $0x7a8] sm:$0xff] }
 0x17c   :  { %2085 = vmatpush.msrb.mxu2 %v3191_v32  ;;  %2108 = vmatpush.msrb.mxu3 %v3192_v34  ;;  %2863 = vst.msk [vmem:[%s5574_s2 + $0x1b8] ss:$4 sm:$0x3] %vm4111_vm6, %v1023_v21  ;;  %v3216_v24 = vld [vmem:[#allocation2 + $0x418] sm:$0xff]  ;;  %v3219_v30 = vld [vmem:[#allocation2 + $0xd0] sm:$0xff]  ;;  %v3225_v21 = vld [vmem:[#allocation2 + $0x368] sm:$0xff] }
 0x17d   :  { %2036 = vmatpush.msrb.mxu0 %v3193_v17  ;;  %2059 = vmatpush.msrb.mxu1 %v3194_v19  ;;  %2864 = vst.msk [vmem:[%s5574_s2 + $0x1d8] ss:$4 sm:$0x3] %vm4111_vm6, %v1025_v37  ;;  %v2955_v26 = vld [vmem:[%s5573_s1 + $0x4a] ss:$4 sm:$0x3] }
 0x17e   :  { %2086 = vmatpush.msrb.mxu2 %v3195_v31  ;;  %2109 = vmatpush.msrb.mxu3 %v3196_v33  ;;  %v1218_v39 = vpop.f32.mrf.mxu2  ;;  %v1241_v41 = vpop.f32.mrf.mxu3  ;;  %2865 = vst.msk [vmem:[%s5574_s2 + $0x1f8] ss:$4 sm:$0x3] %vm4111_vm6, %v1027_v55  ;;  %v3220_v32 = vld [vmem:[#allocation2 + $0x4d0] sm:$0xff]  ;;  %v3226_v23 = vld [vmem:[#allocation2 + $0x768] sm:$0xff] }
 0x17f   :  { %2037 = vmatpush.msrb.mxu0 %v3197_v43  ;;  %2060 = vmatpush.msrb.mxu1 %v3198_v54  ;;  %v1242_v58 = vadd.f32 %v1241_v41, %v1218_v39  ;;  %v2956_v34 = vld [vmem:[%s5573_s1 + $0x52] ss:$4 sm:$0x3]  ;;  %v2957_v38 = vld [vmem:[%s5573_s1 + $0x5a] ss:$4 sm:$0x3] }
 0x180   :  { %2087 = vmatpush.msrb.mxu2 %v3199_v59  ;;  %2110 = vmatpush.msrb.mxu3 %v3200_v62  ;;  %v3223_v40 = vld [vmem:[#allocation2 + $0x90] sm:$0xff]  ;;  %v2958_v19 = vld [vmem:[%s5573_s1 + $0x62] ss:$4 sm:$0x3]  ;;  %1925 = vst [vmem:[#allocation1 + $0x1] ss:$9 sm:$0xff] %v2955_v26 }
 0x181   :  { %1496 = vmatmul.f32.gmra.mxu2 %v4236_v53  ;;  %1519 = vmatmul.f32.gmra.mxu3 %v4238_v8  ;;  %v1527_v63 = vrot.slane %v1242_v58, 7  ;;  %v1172_v2 = vpop.f32.mrf.mxu0  ;;  %v1195_v3 = vpop.f32.mrf.mxu1  ;;  %v3224_v17 = vld [vmem:[#allocation2 + $0x490] sm:$0xff]  ;;  %v2959_v31 = vld [vmem:[%s5573_s1 + $0x6a] ss:$4 sm:$0x3]  ;;  %v3229_v41 = vld [vmem:[#allocation2 + $0x328] sm:$0xff] }
 0x182   :  { %2038 = vmatpush.msrb.mxu0 %v3201_v4  ;;  %2061 = vmatpush.msrb.mxu1 %v3202_v5  ;;  %v1196_v6 = vadd.f32 %v1195_v3, %v1172_v2  ;;  %1926 = vst [vmem:[#allocation1 + $0x2] ss:$9 sm:$0xff] %v2956_v34  ;;  %v3227_v33 = vld [vmem:[#allocation2 + $0x50] sm:$0xff]  ;;  %v2960_v39 = vld [vmem:[%s5573_s1 + $0x72] ss:$4 sm:$0x3] }
 0x183   :  { %2088 = vmatpush.msrb.mxu2 %v3203_v7  ;;  %2111 = vmatpush.msrb.mxu3 %v3204_v42  ;;  %v3228_v37 = vld [vmem:[#allocation2 + $0x450] sm:$0xff]  ;;  %1927 = vst [vmem:[#allocation1 + $0x3] ss:$9 sm:$0xff] %v2957_v38  ;;  %v3230_v43 = vld [vmem:[#allocation2 + $0x728] sm:$0xff]  ;;  %v3233_v59 = vld [vmem:[#allocation2 + $0x3e0] sm:$0xff] }
 0x184   :  { %2039 = vmatpush.msrb.mxu0 %v3205_v44  ;;  %2062 = vmatpush.msrb.mxu1 %v3206_v45  ;;  %v1529_v49 = vsel %vm735_vm0, %v1196_v6, %v1527_v63  ;;  %v1530_v28 = vsel %vm737_vm1, %v1196_v6, %v1527_v63  ;;  %v1532_v29 = vsel %vm740_vm2, %v1196_v6, %v1527_v63  ;;  %v2961_v54 = vld [vmem:[%s5573_s1 + $0x7a] ss:$4 sm:$0x3]  ;;  %v3234_v62 = vld [vmem:[#allocation2 + $0x7e0] sm:$0xff]  ;;  %v3236_v2 = vld [vmem:[#allocation2 + $0x6e8] sm:$0xff] }
 0x185   :  { %2089 = vmatpush.msrb.mxu2 %v3207_v46  ;;  %2112 = vmatpush.msrb.mxu3 %v3208_v47  ;;  %v1531_v15 = vrot.slane %v1530_v28, 1  ;;  %v1533_v52 = vrot.slane %v1532_v29, 2  ;;  %v1534_v50 = vsel %vm743_vm3, %v1196_v6, %v1527_v63  ;;  %v1536_v51 = vsel %vm746_vm4, %v1196_v6, %v1527_v63  ;;  %2882 = vst.msk [vmem:[%s5574_s2 + $0x1] ss:$4 sm:$0x3] %vm4111_vm6, %v1529_v49  ;;  %v3231_v55 = vld [vmem:[#allocation2 + $0x10] sm:$0xff] }
 0x186   :  { %2040 = vmatpush.msrb.mxu0 %v3209_v18  ;;  %2063 = vmatpush.msrb.mxu1 %v3210_v27  ;;  %v1535_v56 = vrot.slane %v1534_v50, 3  ;;  %v1537_v57 = vrot.slane %v1536_v51, 4  ;;  %v1538_v13 = vsel %vm749_vm5, %v1196_v6, %v1527_v63  ;;  %v1540_v16 = vsel %vm752_vm7, %v1196_v6, %v1527_v63  ;;  %1928 = vst [vmem:[#allocation1 + $0x4] ss:$9 sm:$0xff] %v2958_v19  ;;  %v3232_v58 = vld [vmem:[#allocation2 + $0x410] sm:$0xff]  ;;  %v3237_v3 = vld [vmem:[#allocation2 + $0x3a0] sm:$0xff] }
 0x187   :  { %2090 = vmatpush.msrb.mxu2 %v3211_v0  ;;  %2113 = vmatpush.msrb.mxu3 %v3212_v1  ;;  %v1539_v10 = vrot.slane %v1538_v13, 5  ;;  %v1542_v9 = vsel %vm755_vm8, %v1527_v63, %v1196_v6  ;;  %2883 = vst.msk [vmem:[%s5574_s2 + $0x21] ss:$4 sm:$0x3] %vm4111_vm6, %v1531_v15  ;;  %v1541_v12 = vrot.slane %v1540_v16, 6  ;;  %v3235_v63 = vld [vmem:[#allocation2 + $0x2e8] sm:$0xff] }
 0x188   :  { %2041 = vmatpush.msrb.mxu0 %v3213_v60  ;;  %2064 = vmatpush.msrb.mxu1 %v3214_v61  ;;  %2884 = vst.msk [vmem:[%s5574_s2 + $0x41] ss:$4 sm:$0x3] %vm4111_vm6, %v1533_v52  ;;  %v1543_v20 = vrot.slane %v1542_v9, 7  ;;  %v3238_v4 = vld [vmem:[#allocation2 + $0x7a0] sm:$0xff]  ;;  %v3239_v5 = vld [vmem:[#allocation2 + $0x2a8] sm:$0xff] }
 0x189   :  { %2091 = vmatpush.msrb.mxu2 %v3215_v14  ;;  %2114 = vmatpush.msrb.mxu3 %v3216_v24  ;;  %2885 = vst.msk [vmem:[%s5574_s2 + $0x61] ss:$4 sm:$0x3] %vm4111_vm6, %v1535_v56  ;;  %v3240_v6 = vld [vmem:[#allocation2 + $0x6a8] sm:$0xff]  ;;  %v3241_v44 = vld [vmem:[#allocation2 + $0x360] sm:$0xff] }
 0x18a   :  { %1450 = vmatmul.f32.gmra.mxu0 %v4236_v53  ;;  %1473 = vmatmul.f32.gmra.mxu1 %v4238_v8  ;;  %2886 = vst.msk [vmem:[%s5574_s2 + $0x81] ss:$4 sm:$0x3] %vm4111_vm6, %v1537_v57  ;;  %v2954_v53 = vld [vmem:[%s5573_s1 + $0x42] ss:$4 sm:$0x3] }
 0x18b   :  { %2000 = vmatmul.f32.vlgmr.msra.gmra.mxu2 %v4756_v22  ;;  %2023 = vmatmul.f32.vlgmr.msra.gmra.mxu3 %v4758_v11  ;;  %2887 = vst.msk [vmem:[%s5574_s2 + $0xa1] ss:$4 sm:$0x3] %vm4111_vm6, %v1539_v10  ;;  %v3217_v8 = vld [vmem:[#allocation2 + $0x3e8] sm:$0xff]  ;;  %v3242_v45 = vld [vmem:[#allocation2 + $0x760] sm:$0xff] }
 0x18c   :  { %2168 = vmatpush.msra.mxu2 %v3217_v8  ;;  %2191 = vmatpush.msra.mxu3 %v3218_v25  ;;  %2888 = vst.msk [vmem:[%s5574_s2 + $0xc1] ss:$4 sm:$0x3] %vm4111_vm6, %v1541_v12  ;;  %v3243_v28 = vld [vmem:[#allocation2 + $0x268] sm:$0xff]  ;;  %v3245_v46 = vld [vmem:[#allocation2 + $0x320] sm:$0xff] }
 0x18d   :  { %2042 = vmatpush.msrb.mxu0 %v3219_v30  ;;  %2065 = vmatpush.msrb.mxu1 %v3220_v32  ;;  %2889 = vst.msk [vmem:[%s5574_s2 + $0xe1] ss:$4 sm:$0x3] %vm4111_vm6, %v1543_v20  ;;  %v3244_v29 = vld [vmem:[#allocation2 + $0x668] sm:$0xff]  ;;  %v3246_v47 = vld [vmem:[#allocation2 + $0x720] sm:$0xff] }
 0x18e   :  { %2169 = vmatpush.msra.mxu2 %v3221_v35  ;;  %2192 = vmatpush.msra.mxu3 %v3222_v36  ;;  %1924 = vst [vmem:[#allocation1] ss:$9 sm:$0xff] %v2954_v53  ;;  %v3247_v51 = vld [vmem:[#allocation2 + $0x228] sm:$0xff]  ;;  %v3249_v56 = vld [vmem:[#allocation2 + $0x2e0] sm:$0xff] }
 0x18f   :  { %2043 = vmatpush.msrb.mxu0 %v3223_v40  ;;  %2066 = vmatpush.msrb.mxu1 %v3224_v17  ;;  %1929 = vst [vmem:[#allocation1 + $0x5] ss:$9 sm:$0xff] %v2959_v31  ;;  %v3248_v18 = vld [vmem:[#allocation2 + $0x628] sm:$0xff]  ;;  %v3250_v57 = vld [vmem:[#allocation2 + $0x6e0] sm:$0xff] }
 0x190   :  { %2170 = vmatpush.msra.mxu2 %v3225_v21  ;;  %2193 = vmatpush.msra.mxu3 %v3226_v23  ;;  %1930 = vst [vmem:[#allocation1 + $0x6] ss:$9 sm:$0xff] %v2960_v39  ;;  %v3251_v13 = vld [vmem:[#allocation2 + $0x1e8] sm:$0xff]  ;;  %v3253_v9 = vld [vmem:[#allocation2 + $0x2a0] sm:$0xff] }
 0x191   :  { %2044 = vmatpush.msrb.mxu0 %v3227_v33  ;;  %2067 = vmatpush.msrb.mxu1 %v3228_v37  ;;  %1931 = vst [vmem:[#allocation1 + $0x7] ss:$9 sm:$0xff] %v2961_v54  ;;  %v3252_v16 = vld [vmem:[#allocation2 + $0x5e8] sm:$0xff]  ;;  %v3254_v60 = vld [vmem:[#allocation2 + $0x6a0] sm:$0xff] }
 0x192   :  { %2171 = vmatpush.msra.mxu2 %v3229_v41  ;;  %2194 = vmatpush.msra.mxu3 %v3230_v43  ;;  %v3255_v20 = vld [vmem:[#allocation2 + $0x1a8] sm:$0xff]  ;;  %v3257_v35 = vld [vmem:[#allocation2 + $0x260] sm:$0xff] }
 0x193   :  { %2045 = vmatpush.msrb.mxu0 %v3231_v55  ;;  %2068 = vmatpush.msrb.mxu1 %v3232_v58  ;;  %v3256_v53 = vld [vmem:[#allocation2 + $0x5a8] sm:$0xff]  ;;  %v3258_v36 = vld [vmem:[#allocation2 + $0x660] sm:$0xff] }
 0x194   :  { %1954 = vmatmul.f32.vlgmr.msra.gmra.mxu0 %v4756_v22  ;;  %1977 = vmatmul.f32.vlgmr.msra.gmra.mxu1 %v4758_v11  ;;  %v3259_v17 = vld [vmem:[#allocation2 + $0x168] sm:$0xff]  ;;  %v3261_v39 = vld [vmem:[#allocation2 + $0x220] sm:$0xff] }
 0x195   :  { %2122 = vmatpush.msra.mxu0 %v3233_v59  ;;  %2145 = vmatpush.msra.mxu1 %v3234_v62  ;;  %v3260_v19 = vld [vmem:[#allocation2 + $0x568] sm:$0xff]  ;;  %v3262_v41 = vld [vmem:[#allocation2 + $0x620] sm:$0xff] }
 0x196   :  { %2172 = vmatpush.msra.mxu2 %v3235_v63  ;;  %2195 = vmatpush.msra.mxu3 %v3236_v2  ;;  %v3263_v43 = vld [vmem:[#allocation2 + $0x128] sm:$0xff]  ;;  %v3265_v62 = vld [vmem:[#allocation2 + $0x1e0] sm:$0xff] }
 0x197   :  { %2123 = vmatpush.msra.mxu0 %v3237_v3  ;;  %2146 = vmatpush.msra.mxu1 %v3238_v4  ;;  %v3264_v54 = vld [vmem:[#allocation2 + $0x528] sm:$0xff]  ;;  %v3266_v63 = vld [vmem:[#allocation2 + $0x5e0] sm:$0xff] }
 0x198   :  { %2173 = vmatpush.msra.mxu2 %v3239_v5  ;;  %2196 = vmatpush.msra.mxu3 %v3240_v6  ;;  %v1221_v7 = vpop.f32.mrf.mxu2  ;;  %v1244_v42 = vpop.f32.mrf.mxu3  ;;  %v4830_v8 = vld [vmem:[#allocation1] sm:$0xff]  ;;  %v4832_v25 = vld [vmem:[#allocation1 + $0x9] sm:$0xff] }
 0x199   :  { %2124 = vmatpush.msra.mxu0 %v3241_v44  ;;  %2147 = vmatpush.msra.mxu1 %v3242_v45  ;;  %v1245_v49 = vadd.f32 %v1244_v42, %v1221_v7  ;;  %v3267_v3 = vld [vmem:[#allocation2 + $0xe8] sm:$0xff]  ;;  %v3269_v5 = vld [vmem:[#allocation2 + $0x1a0] sm:$0xff] }
 0x19a   :  { %2174 = vmatpush.msra.mxu2 %v3243_v28  ;;  %2197 = vmatpush.msra.mxu3 %v3244_v29  ;;  %v3268_v4 = vld [vmem:[#allocation2 + $0x4e8] sm:$0xff]  ;;  %v3270_v6 = vld [vmem:[#allocation2 + $0x5a0] sm:$0xff] }
 0x19b   :  { %2125 = vmatpush.msra.mxu0 %v3245_v46  ;;  %2148 = vmatpush.msra.mxu1 %v3246_v47  ;;  %v1528_v15 = vrot.slane %v1245_v49, 7  ;;  %v1175_v52 = vpop.f32.mrf.mxu0  ;;  %v1198_v50 = vpop.f32.mrf.mxu1  ;;  %v3271_v45 = vld [vmem:[#allocation2 + $0xa8] sm:$0xff] }
 0x19c   :  { %2175 = vmatpush.msra.mxu2 %v3247_v51  ;;  %2198 = vmatpush.msra.mxu3 %v3248_v18  ;;  %v1199_v27 = vadd.f32 %v1198_v50, %v1175_v52  ;;  %v3272_v49 = vld [vmem:[#allocation2 + $0x4a8] sm:$0xff]  ;;  %v3274_v52 = vld [vmem:[#allocation2 + $0x560] sm:$0xff] }
 0x19d   :  { %2126 = vmatpush.msra.mxu0 %v3249_v56  ;;  %2149 = vmatpush.msra.mxu1 %v3250_v57  ;;  %v3275_v56 = vld [vmem:[#allocation2 + $0x68] sm:$0xff] }
 0x19e   :  { %2176 = vmatpush.msra.mxu2 %v3251_v13  ;;  %2199 = vmatpush.msra.mxu3 %v3252_v16  ;;  %v1544_v0 = vsel %vm735_vm0, %v1199_v27, %v1528_v15  ;;  %v1545_v1 = vsel %vm737_vm1, %v1199_v27, %v1528_v15  ;;  %v1547_v10 = vsel %vm740_vm2, %v1199_v27, %v1528_v15  ;;  %v3276_v57 = vld [vmem:[#allocation2 + $0x468] sm:$0xff] }
 0x19f   :  { %2127 = vmatpush.msra.mxu0 %v3253_v9  ;;  %2150 = vmatpush.msra.mxu1 %v3254_v60  ;;  %v1546_v61 = vrot.slane %v1545_v1, 1  ;;  %v1548_v12 = vrot.slane %v1547_v10, 2  ;;  %v1549_v14 = vsel %vm743_vm3, %v1199_v27, %v1528_v15  ;;  %v1551_v24 = vsel %vm746_vm4, %v1199_v27, %v1528_v15  ;;  %2890 = vst.msk [vmem:[%s5574_s2 + $0x101] ss:$4 sm:$0x3] %vm4111_vm6, %v1544_v0  ;;  %v3277_v10 = vld [vmem:[#allocation2 + $0x120] sm:$0xff] }
 0x1a0   :  { %2177 = vmatpush.msra.mxu2 %v3255_v20  ;;  %2200 = vmatpush.msra.mxu3 %v3256_v53  ;;  %v1550_v26 = vrot.slane %v1549_v14, 3  ;;  %v1552_v30 = vrot.slane %v1551_v24, 4  ;;  %v1553_v32 = vsel %vm749_vm5, %v1199_v27, %v1528_v15  ;;  %v1555_v34 = vsel %vm752_vm7, %v1199_v27, %v1528_v15  ;;  %v3278_v9 = vld [vmem:[#allocation2 + $0x520] sm:$0xff]  ;;  %v3279_v60 = vld [vmem:[#allocation2 + $0x28] sm:$0xff]  ;;  %v3282_v14 = vld [vmem:[#allocation2 + $0x7f8] sm:$0xff] }
 0x1a1   :  { %2128 = vmatpush.msra.mxu0 %v3257_v35  ;;  %2151 = vmatpush.msra.mxu1 %v3258_v36  ;;  %v1554_v38 = vrot.slane %v1553_v32, 5  ;;  %v1557_v40 = vsel %vm755_vm8, %v1528_v15, %v1199_v27  ;;  %2891 = vst.msk [vmem:[%s5574_s2 + $0x121] ss:$4 sm:$0x3] %vm4111_vm6, %v1546_v61  ;;  %v1556_v21 = vrot.slane %v1555_v34, 6  ;;  %v3273_v15 = vld [vmem:[#allocation2 + $0x160] sm:$0xff] }
 0x1a2   :  { %2178 = vmatpush.msra.mxu2 %v3259_v17  ;;  %2201 = vmatpush.msra.mxu3 %v3260_v19  ;;  %2892 = vst.msk [vmem:[%s5574_s2 + $0x141] ss:$4 sm:$0x3] %vm4111_vm6, %v1548_v12  ;;  %v1310_v23 = vpop.f32.mrf.mxu2  ;;  %v1333_v31 = vpop.f32.mrf.mxu3  ;;  %v1558_v33 = vrot.slane %v1557_v40, 7  ;;  %v3280_v61 = vld [vmem:[#allocation2 + $0x428] sm:$0xff]  ;;  %v3281_v12 = vld [vmem:[#allocation2 + $0x3f8] sm:$0xff] }
 0x1a3   :  { %2003 = vmatmul.f32.gmra.mxu2 %v4830_v8  ;;  %2026 = vmatmul.f32.gmra.mxu3 %v4832_v25  ;;  %2893 = vst.msk [vmem:[%s5574_s2 + $0x161] ss:$4 sm:$0x3] %vm4111_vm6, %v1550_v26  ;;  %v1334_v37 = vadd.f32 %v1333_v31, %v1310_v23  ;;  %v3283_v24 = vld [vmem:[#allocation2 + $0xe0] sm:$0xff]  ;;  %v3285_v53 = vld [vmem:[#allocation2 + $0x3b8] sm:$0xff]  ;;  %v3297_v23 = vld [vmem:[#allocation2 + $0x3f0] sm:$0xff] }
 0x1a4   :  { %2129 = vmatpush.msra.mxu0 %v3261_v39  ;;  %2152 = vmatpush.msra.mxu1 %v3262_v41  ;;  %2894 = vst.msk [vmem:[%s5574_s2 + $0x181] ss:$4 sm:$0x3] %vm4111_vm6, %v1552_v30  ;;  %v3284_v20 = vld [vmem:[#allocation2 + $0x4e0] sm:$0xff]  ;;  %v3286_v26 = vld [vmem:[#allocation2 + $0x7b8] sm:$0xff]  ;;  %v3298_v31 = vld [vmem:[#allocation2 + $0x7f0] sm:$0xff] }
 0x1a5   :  { %2179 = vmatpush.msra.mxu2 %v3263_v43  ;;  %2202 = vmatpush.msra.mxu3 %v3264_v54  ;;  %2895 = vst.msk [vmem:[%s5574_s2 + $0x1a1] ss:$4 sm:$0x3] %vm4111_vm6, %v1554_v38  ;;  %v1611_v55 = vrot.slane %v1334_v37, 7  ;;  %v1264_v58 = vpop.f32.mrf.mxu0  ;;  %v1287_v59 = vpop.f32.mrf.mxu1  ;;  %v3287_v30 = vld [vmem:[#allocation2 + $0xa0] sm:$0xff]  ;;  %v3289_v34 = vld [vmem:[#allocation2 + $0x378] sm:$0xff] }
 0x1a6   :  { %2130 = vmatpush.msra.mxu0 %v3265_v62  ;;  %2153 = vmatpush.msra.mxu1 %v3266_v63  ;;  %2896 = vst.msk [vmem:[%s5574_s2 + $0x1c1] ss:$4 sm:$0x3] %vm4111_vm6, %v1556_v21  ;;  %v1288_v2 = vadd.f32 %v1287_v59, %v1264_v58  ;;  %v3288_v32 = vld [vmem:[#allocation2 + $0x4a0] sm:$0xff]  ;;  %v3290_v35 = vld [vmem:[#allocation2 + $0x778] sm:$0xff]  ;;  %v3301_v39 = vld [vmem:[#allocation2 + $0x3b0] sm:$0xff] }
 0x1a7   :  { %2180 = vmatpush.msra.mxu2 %v3267_v3  ;;  %2203 = vmatpush.msra.mxu3 %v3268_v4  ;;  %2897 = vst.msk [vmem:[%s5574_s2 + $0x1e1] ss:$4 sm:$0x3] %vm4111_vm6, %v1558_v33  ;;  %v3291_v36 = vld [vmem:[#allocation2 + $0x60] sm:$0xff]  ;;  %v3293_v40 = vld [vmem:[#allocation2 + $0x338] sm:$0xff]  ;;  %v3302_v41 = vld [vmem:[#allocation2 + $0x7b0] sm:$0xff] }
 0x1a8   :  { %2131 = vmatpush.msra.mxu0 %v3269_v5  ;;  %2154 = vmatpush.msra.mxu1 %v3270_v6  ;;  %v1613_v7 = vsel %vm735_vm0, %v1288_v2, %v1611_v55  ;;  %v1614_v42 = vsel %vm737_vm1, %v1288_v2, %v1611_v55  ;;  %v1616_v44 = vsel %vm740_vm2, %v1288_v2, %v1611_v55  ;;  %v3292_v38 = vld [vmem:[#allocation2 + $0x460] sm:$0xff]  ;;  %v3294_v17 = vld [vmem:[#allocation2 + $0x738] sm:$0xff]  ;;  %v3305_v62 = vld [vmem:[#allocation2 + $0x370] sm:$0xff] }
 0x1a9   :  { %2181 = vmatpush.msra.mxu2 %v3271_v45  ;;  %2204 = vmatpush.msra.mxu3 %v3272_v49  ;;  %v1615_v28 = vrot.slane %v1614_v42, 1  ;;  %v1617_v29 = vrot.slane %v1616_v44, 2  ;;  %v1618_v46 = vsel %vm743_vm3, %v1288_v2, %v1611_v55  ;;  %v1620_v47 = vsel %vm746_vm4, %v1288_v2, %v1611_v55  ;;  %2898 = vst.msk [vmem:[%s5574_s2 + $0x9] ss:$4 sm:$0x3] %vm4111_vm6, %v1613_v7  ;;  %v3295_v19 = vld [vmem:[#allocation2 + $0x20] sm:$0xff] }
 0x1aa   :  { %2132 = vmatpush.msra.mxu0 %v3273_v15  ;;  %2155 = vmatpush.msra.mxu1 %v3274_v52  ;;  %v1619_v50 = vrot.slane %v1618_v46, 3  ;;  %v1621_v51 = vrot.slane %v1620_v47, 4  ;;  %v1622_v18 = vsel %vm749_vm5, %v1288_v2, %v1611_v55  ;;  %v1624_v27 = vsel %vm752_vm7, %v1288_v2, %v1611_v55  ;;  %v3296_v21 = vld [vmem:[#allocation2 + $0x420] sm:$0xff]  ;;  %v3299_v33 = vld [vmem:[#allocation2 + $0x2f8] sm:$0xff]  ;;  %v3306_v63 = vld [vmem:[#allocation2 + $0x770] sm:$0xff] }
 0x1ab   :  { %2182 = vmatpush.msra.mxu2 %v3275_v56  ;;  %2205 = vmatpush.msra.mxu3 %v3276_v57  ;;  %v1623_v13 = vrot.slane %v1622_v18, 5  ;;  %v1626_v16 = vsel %vm755_vm8, %v1611_v55, %v1288_v2  ;;  %2899 = vst.msk [vmem:[%s5574_s2 + $0x29] ss:$4 sm:$0x3] %vm4111_vm6, %v1615_v28  ;;  %v1625_v0 = vrot.slane %v1624_v27, 6  ;;  %v3300_v37 = vld [vmem:[#allocation2 + $0x6f8] sm:$0xff] }
 0x1ac   :  { %1957 = vmatmul.f32.gmra.mxu0 %v4830_v8  ;;  %1980 = vmatmul.f32.gmra.mxu1 %v4832_v25  ;;  %2900 = vst.msk [vmem:[%s5574_s2 + $0x49] ss:$4 sm:$0x3] %vm4111_vm6, %v1617_v29  ;;  %v1627_v1 = vrot.slane %v1626_v16, 7  ;;  %v3303_v55 = vld [vmem:[#allocation2 + $0x2b8] sm:$0xff]  ;;  %v3309_v7 = vld [vmem:[#allocation2 + $0x330] sm:$0xff] }
 0x1ad   :  { %2092 = vmatmul.f32.vlgmr.msrb.gmra.mxu2 %v4756_v22  ;;  %2115 = vmatmul.f32.vlgmr.msrb.gmra.mxu3 %v4758_v11  ;;  %2901 = vst.msk [vmem:[%s5574_s2 + $0x69] ss:$4 sm:$0x3] %vm4111_vm6, %v1619_v50  ;;  %v3304_v58 = vld [vmem:[#allocation2 + $0x6b8] sm:$0xff]  ;;  %v3310_v42 = vld [vmem:[#allocation2 + $0x730] sm:$0xff] }
 0x1ae   :  { %2133 = vmatpush.msra.mxu0 %v3277_v10  ;;  %2156 = vmatpush.msra.mxu1 %v3278_v9  ;;  %2902 = vst.msk [vmem:[%s5574_s2 + $0x89] ss:$4 sm:$0x3] %vm4111_vm6, %v1621_v51  ;;  %v3307_v2 = vld [vmem:[#allocation2 + $0x278] sm:$0xff]  ;;  %v3313_v51 = vld [vmem:[#allocation2 + $0x2f0] sm:$0xff] }
 0x1af   :  { %2183 = vmatpush.msra.mxu2 %v3279_v60  ;;  %2206 = vmatpush.msra.mxu3 %v3280_v61  ;;  %2903 = vst.msk [vmem:[%s5574_s2 + $0xa9] ss:$4 sm:$0x3] %vm4111_vm6, %v1623_v13  ;;  %v3308_v3 = vld [vmem:[#allocation2 + $0x678] sm:$0xff]  ;;  %v3314_v18 = vld [vmem:[#allocation2 + $0x6f0] sm:$0xff] }
 0x1b0   :  { %2904 = vst.msk [vmem:[%s5574_s2 + $0xc9] ss:$4 sm:$0x3] %vm4111_vm6, %v1625_v0  ;;  %2134 = vmatpush.msra.mxu0 %v3283_v24  ;;  %2157 = vmatpush.msra.mxu1 %v3284_v20  ;;  %v3311_v45 = vld [vmem:[#allocation2 + $0x238] sm:$0xff]  ;;  %v3317_v9 = vld [vmem:[#allocation2 + $0x2b0] sm:$0xff] }
 0x1b1   :  { %2260 = vmatpush.msrb.mxu2 %v3281_v12  ;;  %2283 = vmatpush.msrb.mxu3 %v3282_v14  ;;  %2905 = vst.msk [vmem:[%s5574_s2 + $0xe9] ss:$4 sm:$0x3] %vm4111_vm6, %v1627_v1  ;;  %v3312_v49 = vld [vmem:[#allocation2 + $0x638] sm:$0xff]  ;;  %v3318_v60 = vld [vmem:[#allocation2 + $0x6b0] sm:$0xff] }
 0x1b2   :  { %2135 = vmatpush.msra.mxu0 %v3287_v30  ;;  %2158 = vmatpush.msra.mxu1 %v3288_v32  ;;  %v3315_v16 = vld [vmem:[#allocation2 + $0x1f8] sm:$0xff]  ;;  %v3321_v30 = vld [vmem:[#allocation2 + $0x270] sm:$0xff] }
 0x1b3   :  { %2261 = vmatpush.msrb.mxu2 %v3285_v53  ;;  %2284 = vmatpush.msrb.mxu3 %v3286_v26  ;;  %v3316_v0 = vld [vmem:[#allocation2 + $0x5f8] sm:$0xff]  ;;  %v3322_v32 = vld [vmem:[#allocation2 + $0x670] sm:$0xff] }
 0x1b4   :  { %2136 = vmatpush.msra.mxu0 %v3291_v36  ;;  %2159 = vmatpush.msra.mxu1 %v3292_v38  ;;  %v3319_v24 = vld [vmem:[#allocation2 + $0x1b8] sm:$0xff] }
 0x1b5   :  { %2262 = vmatpush.msrb.mxu2 %v3289_v34  ;;  %2285 = vmatpush.msrb.mxu3 %v3290_v35  ;;  %v3320_v20 = vld [vmem:[#allocation2 + $0x5b8] sm:$0xff] }
 0x1b6   :  { %2046 = vmatmul.f32.vlgmr.msrb.gmra.mxu0 %v4756_v22  ;;  %2069 = vmatmul.f32.vlgmr.msrb.gmra.mxu1 %v4758_v11  ;;  %v3323_v34 = vld [vmem:[#allocation2 + $0x178] sm:$0xff] }
 0x1b7   :  { %2263 = vmatpush.msrb.mxu2 %v3293_v40  ;;  %2286 = vmatpush.msrb.mxu3 %v3294_v17  ;;  %v3324_v35 = vld [vmem:[#allocation2 + $0x578] sm:$0xff]  ;;  %v3325_v17 = vld [vmem:[#allocation2 + $0x230] sm:$0xff] }
 0x1b8   :  { %2095 = vmatmul.f32.gmra.mxu2 %v4830_v8  ;;  %2118 = vmatmul.f32.gmra.mxu3 %v4832_v25 }
 0x1b9   :  { %2137 = vmatpush.msra.mxu0 %v3295_v19  ;;  %2160 = vmatpush.msra.mxu1 %v3296_v21  ;;  %v3326_v19 = vld [vmem:[#allocation2 + $0x630] sm:$0xff] }
 0x1ba   :  { %2264 = vmatpush.msrb.mxu2 %v3299_v33  ;;  %2287 = vmatpush.msrb.mxu3 %v3300_v37 }
 0x1bb   :  { %2214 = vmatpush.msrb.mxu0 %v3297_v23  ;;  %2237 = vmatpush.msrb.mxu1 %v3298_v31  ;;  %v3327_v23 = vld [vmem:[#allocation2 + $0x138] sm:$0xff] }
 0x1bc   :  { %v1313_v43 = vpop.f32.mrf.mxu2  ;;  %v1336_v54 = vpop.f32.mrf.mxu3  ;;  %2265 = vmatpush.msrb.mxu2 %v3303_v55  ;;  %2288 = vmatpush.msrb.mxu3 %v3304_v58  ;;  %v3328_v31 = vld [vmem:[#allocation2 + $0x538] sm:$0xff]  ;;  %v3329_v58 = vld [vmem:[#allocation2 + $0x1f0] sm:$0xff] }
 0x1bd   :  { %2215 = vmatpush.msrb.mxu0 %v3301_v39  ;;  %2238 = vmatpush.msrb.mxu1 %v3302_v41  ;;  %v1337_v59 = vadd.f32 %v1336_v54, %v1313_v43 }
 0x1be   :  { %2266 = vmatpush.msrb.mxu2 %v3307_v2  ;;  %2289 = vmatpush.msrb.mxu3 %v3308_v3 }
 0x1bf   :  { %2216 = vmatpush.msrb.mxu0 %v3305_v62  ;;  %2239 = vmatpush.msrb.mxu1 %v3306_v63  ;;  %v1612_v4 = vrot.slane %v1337_v59, 7  ;;  %v1267_v5 = vpop.f32.mrf.mxu0  ;;  %v1290_v6 = vpop.f32.mrf.mxu1  ;;  %v3330_v59 = vld [vmem:[#allocation2 + $0x5f0] sm:$0xff] }
 0x1c0   :  { %v1291_v44 = vadd.f32 %v1290_v6, %v1267_v5  ;;  %2267 = vmatpush.msrb.mxu2 %v3311_v45  ;;  %2290 = vmatpush.msrb.mxu3 %v3312_v49  ;;  %v3332_v5 = vld [vmem:[#allocation2 + $0x4f8] sm:$0xff] }
 0x1c1   :  { %2217 = vmatpush.msrb.mxu0 %v3309_v7  ;;  %2240 = vmatpush.msrb.mxu1 %v3310_v42  ;;  %v3333_v42 = vld [vmem:[#allocation2 + $0x1b0] sm:$0xff]  ;;  %v3335_v49 = vld [vmem:[#allocation2 + $0xb8] sm:$0xff] }
 0x1c2   :  { %2049 = vmatmul.f32.gmra.mxu0 %v4830_v8  ;;  %2072 = vmatmul.f32.gmra.mxu1 %v4832_v25  ;;  %v1628_v28 = vsel %vm735_vm0, %v1291_v44, %v1612_v4  ;;  %v1629_v29 = vsel %vm737_vm1, %v1291_v44, %v1612_v4  ;;  %v1631_v46 = vsel %vm740_vm2, %v1291_v44, %v1612_v4 }
 0x1c3   :  { %2184 = vmatmul.f32.vlgmr.msra.gmra.mxu2 %v4756_v22  ;;  %2207 = vmatmul.f32.vlgmr.msra.gmra.mxu3 %v4758_v11  ;;  %v1630_v47 = vrot.slane %v1629_v29, 1  ;;  %v1632_v15 = vrot.slane %v1631_v46, 2  ;;  %v1633_v52 = vsel %vm743_vm3, %v1291_v44, %v1612_v4  ;;  %v1635_v50 = vsel %vm746_vm4, %v1291_v44, %v1612_v4  ;;  %2906 = vst.msk [vmem:[%s5574_s2 + $0x109] ss:$4 sm:$0x3] %vm4111_vm6, %v1628_v28  ;;  %v3336_v28 = vld [vmem:[#allocation2 + $0x4b8] sm:$0xff] }
 0x1c4   :  { %2218 = vmatpush.msrb.mxu0 %v3313_v51  ;;  %2241 = vmatpush.msrb.mxu1 %v3314_v18  ;;  %v1634_v27 = vrot.slane %v1633_v52, 3  ;;  %v1636_v56 = vrot.slane %v1635_v50, 4  ;;  %v1637_v57 = vsel %vm749_vm5, %v1291_v44, %v1612_v4  ;;  %v1639_v13 = vsel %vm752_vm7, %v1291_v44, %v1612_v4  ;;  %v3337_v46 = vld [vmem:[#allocation2 + $0x170] sm:$0xff]  ;;  %v3340_v52 = vld [vmem:[#allocation2 + $0x478] sm:$0xff] }
 0x1c5   :  { %2268 = vmatpush.msrb.mxu2 %v3315_v16  ;;  %2291 = vmatpush.msrb.mxu3 %v3316_v0  ;;  %v1638_v1 = vrot.slane %v1637_v57, 5  ;;  %v1641_v10 = vsel %vm755_vm8, %v1612_v4, %v1291_v44  ;;  %2907 = vst.msk [vmem:[%s5574_s2 + $0x129] ss:$4 sm:$0x3] %vm4111_vm6, %v1630_v47  ;;  %v1640_v61 = vrot.slane %v1639_v13, 6  ;;  %v3331_v4 = vld [vmem:[#allocation2 + $0xf8] sm:$0xff] }
 0x1c6   :  { %2219 = vmatpush.msrb.mxu0 %v3317_v9  ;;  %2242 = vmatpush.msrb.mxu1 %v3318_v60  ;;  %2908 = vst.msk [vmem:[%s5574_s2 + $0x149] ss:$4 sm:$0x3] %vm4111_vm6, %v1632_v15  ;;  %v1402_v12 = vpop.f32.mrf.mxu2  ;;  %v1425_v14 = vpop.f32.mrf.mxu3  ;;  %v1642_v53 = vrot.slane %v1641_v10, 7  ;;  %v3334_v44 = vld [vmem:[#allocation2 + $0x5b0] sm:$0xff]  ;;  %v3339_v15 = vld [vmem:[#allocation2 + $0x78] sm:$0xff] }
 0x1c7   :  { %2269 = vmatpush.msrb.mxu2 %v3319_v24  ;;  %2292 = vmatpush.msrb.mxu3 %v3320_v20  ;;  %2909 = vst.msk [vmem:[%s5574_s2 + $0x169] ss:$4 sm:$0x3] %vm4111_vm6, %v1634_v27  ;;  %v1426_v26 = vadd.f32 %v1425_v14, %v1402_v12  ;;  %v3338_v47 = vld [vmem:[#allocation2 + $0x570] sm:$0xff]  ;;  %v3343_v18 = vld [vmem:[#allocation2 + $0x38] sm:$0xff] }
 0x1c8   :  { %2220 = vmatpush.msrb.mxu0 %v3321_v30  ;;  %2243 = vmatpush.msrb.mxu1 %v3322_v32  ;;  %2910 = vst.msk [vmem:[%s5574_s2 + $0x189] ss:$4 sm:$0x3] %vm4111_vm6, %v1636_v56  ;;  %v3341_v50 = vld [vmem:[#allocation2 + $0x130] sm:$0xff]  ;;  %v3344_v27 = vld [vmem:[#allocation2 + $0x438] sm:$0xff] }
 0x1c9   :  { %2270 = vmatpush.msrb.mxu2 %v3323_v34  ;;  %2293 = vmatpush.msrb.mxu3 %v3324_v35  ;;  %2911 = vst.msk [vmem:[%s5574_s2 + $0x1a9] ss:$4 sm:$0x3] %vm4111_vm6, %v1638_v1  ;;  %v1695_v36 = vrot.slane %v1426_v26, 7  ;;  %v1356_v38 = vpop.f32.mrf.mxu0  ;;  %v1379_v40 = vpop.f32.mrf.mxu1  ;;  %v3342_v51 = vld [vmem:[#allocation2 + $0x530] sm:$0xff] }
 0x1ca   :  { %2221 = vmatpush.msrb.mxu0 %v3325_v17  ;;  %2244 = vmatpush.msrb.mxu1 %v3326_v19  ;;  %2912 = vst.msk [vmem:[%s5574_s2 + $0x1c9] ss:$4 sm:$0x3] %vm4111_vm6, %v1640_v61  ;;  %v1380_v21 = vadd.f32 %v1379_v40, %v1356_v38  ;;  %v3345_v56 = vld [vmem:[#allocation2 + $0xf0] sm:$0xff] }
 0x1cb   :  { %2271 = vmatpush.msrb.mxu2 %v3327_v23  ;;  %2294 = vmatpush.msrb.mxu3 %v3328_v31  ;;  %2913 = vst.msk [vmem:[%s5574_s2 + $0x1e9] ss:$4 sm:$0x3] %vm4111_vm6, %v1642_v53  ;;  %v3346_v57 = vld [vmem:[#allocation2 + $0x4f0] sm:$0xff] }
 0x1cc   :  { %2138 = vmatmul.f32.vlgmr.msra.gmra.mxu0 %v4756_v22  ;;  %2161 = vmatmul.f32.vlgmr.msra.gmra.mxu1 %v4758_v11  ;;  %v1697_v33 = vsel %vm735_vm0, %v1380_v21, %v1695_v36  ;;  %v1698_v37 = vsel %vm737_vm1, %v1380_v21, %v1695_v36  ;;  %v1700_v39 = vsel %vm740_vm2, %v1380_v21, %v1695_v36  ;;  %v3347_v13 = vld [vmem:[#allocation2 + $0xb0] sm:$0xff] }
 0x1cd   :  { %2187 = vmatmul.f32.gmra.mxu2 %v4830_v8  ;;  %2210 = vmatmul.f32.gmra.mxu3 %v4832_v25  ;;  %v1699_v41 = vrot.slane %v1698_v37, 1  ;;  %v1701_v43 = vrot.slane %v1700_v39, 2  ;;  %v1702_v54 = vsel %vm743_vm3, %v1380_v21, %v1695_v36  ;;  %v1704_v55 = vsel %vm746_vm4, %v1380_v21, %v1695_v36  ;;  %2914 = vst.msk [vmem:[%s5574_s2 + $0x11] ss:$4 sm:$0x3] %vm4111_vm6, %v1697_v33  ;;  %v3348_v16 = vld [vmem:[#allocation2 + $0x4b0] sm:$0xff] }
 0x1ce   :  { %2222 = vmatpush.msrb.mxu0 %v3329_v58  ;;  %2245 = vmatpush.msrb.mxu1 %v3330_v59  ;;  %v1703_v62 = vrot.slane %v1702_v54, 3  ;;  %v1705_v63 = vrot.slane %v1704_v55, 4  ;;  %v1706_v2 = vsel %vm749_vm5, %v1380_v21, %v1695_v36  ;;  %v1708_v3 = vsel %vm752_vm7, %v1380_v21, %v1695_v36  ;;  %v3349_v0 = vld [vmem:[#allocation2 + $0x70] sm:$0xff] }
 0x1cf   :  { %2272 = vmatpush.msrb.mxu2 %v3331_v4  ;;  %2295 = vmatpush.msrb.mxu3 %v3332_v5  ;;  %v1707_v6 = vrot.slane %v1706_v2, 5  ;;  %v1710_v7 = vsel %vm755_vm8, %v1695_v36, %v1380_v21  ;;  %2915 = vst.msk [vmem:[%s5574_s2 + $0x31] ss:$4 sm:$0x3] %vm4111_vm6, %v1699_v41  ;;  %v1709_v45 = vrot.slane %v1708_v3, 6  ;;  %v3350_v1 = vld [vmem:[#allocation2 + $0x470] sm:$0xff] }
 0x1d0   :  { %2223 = vmatpush.msrb.mxu0 %v3333_v42  ;;  %2246 = vmatpush.msrb.mxu1 %v3334_v44  ;;  %2916 = vst.msk [vmem:[%s5574_s2 + $0x51] ss:$4 sm:$0x3] %vm4111_vm6, %v1701_v43  ;;  %v1711_v29 = vrot.slane %v1710_v7, 7  ;;  %v3351_v10 = vld [vmem:[#allocation2 + $0x30] sm:$0xff] }
 0x1d1   :  { %2273 = vmatpush.msrb.mxu2 %v3335_v49  ;;  %2296 = vmatpush.msrb.mxu3 %v3336_v28  ;;  %2917 = vst.msk [vmem:[%s5574_s2 + $0x71] ss:$4 sm:$0x3] %vm4111_vm6, %v1703_v62  ;;  %v3352_v9 = vld [vmem:[#allocation2 + $0x430] sm:$0xff] }
 0x1d2   :  { %2224 = vmatpush.msrb.mxu0 %v3337_v46  ;;  %2247 = vmatpush.msrb.mxu1 %v3338_v47  ;;  %2918 = vst.msk [vmem:[%s5574_s2 + $0x91] ss:$4 sm:$0x3] %vm4111_vm6, %v1705_v63 }
 0x1d3   :  { %2274 = vmatpush.msrb.mxu2 %v3339_v15  ;;  %2297 = vmatpush.msrb.mxu3 %v3340_v52  ;;  %2919 = vst.msk [vmem:[%s5574_s2 + $0xb1] ss:$4 sm:$0x3] %vm4111_vm6, %v1707_v6 }
 0x1d4   :  { %2225 = vmatpush.msrb.mxu0 %v3341_v50  ;;  %2248 = vmatpush.msrb.mxu1 %v3342_v51  ;;  %2920 = vst.msk [vmem:[%s5574_s2 + $0xd1] ss:$4 sm:$0x3] %vm4111_vm6, %v1709_v45 }
 0x1d5   :  { %2275 = vmatpush.msrb.mxu2 %v3343_v18  ;;  %2298 = vmatpush.msrb.mxu3 %v3344_v27  ;;  %2921 = vst.msk [vmem:[%s5574_s2 + $0xf1] ss:$4 sm:$0x3] %vm4111_vm6, %v1711_v29 }
 0x1d6   :  { %2141 = vmatmul.f32.gmra.mxu0 %v4830_v8  ;;  %2164 = vmatmul.f32.gmra.mxu1 %v4832_v25 }
 0x1d7   :  { %2276 = vmatmul.f32.vlgmr.msrb.gmra.mxu2 %v4756_v22  ;;  %2299 = vmatmul.f32.vlgmr.msrb.gmra.mxu3 %v4758_v11 }
 0x1d8   :  { %2226 = vmatpush.msrb.mxu0 %v3345_v56  ;;  %2249 = vmatpush.msrb.mxu1 %v3346_v57 }
 0x1da   :  { %2227 = vmatpush.msrb.mxu0 %v3347_v13  ;;  %2250 = vmatpush.msrb.mxu1 %v3348_v16 }
 0x1dc   :  { %2228 = vmatpush.msrb.mxu0 %v3349_v0  ;;  %2251 = vmatpush.msrb.mxu1 %v3350_v1 }
 0x1de   :  { %2229 = vmatpush.msrb.mxu0 %v3351_v10  ;;  %2252 = vmatpush.msrb.mxu1 %v3352_v9 }
 0x1df   :  { %2230 = vmatmul.f32.vlgmr.msrb.gmra.mxu0 %v4756_v22  ;;  %2253 = vmatmul.f32.vlgmr.msrb.gmra.mxu1 %v4758_v11 }
 0x1e0   :  { %2279 = vmatmul.f32.gmra.mxu2 %v4830_v8  ;;  %2302 = vmatmul.f32.gmra.mxu3 %v4832_v25  ;;  %v1405_v60 = vpop.f32.mrf.mxu2  ;;  %v1428_v61 = vpop.f32.mrf.mxu3 }
 0x1e1   :  { %v1429_v12 = vadd.f32 %v1428_v61, %v1405_v60 }
 0x1e3   :  { %v1696_v14 = vrot.slane %v1429_v12, 7  ;;  %v1359_v24 = vpop.f32.mrf.mxu0  ;;  %v1382_v20 = vpop.f32.mrf.mxu1 }
 0x1e4   :  { %v1383_v53 = vadd.f32 %v1382_v20, %v1359_v24 }
 0x1e6   :  { %v1712_v26 = vsel %vm735_vm0, %v1383_v53, %v1696_v14  ;;  %v1713_v30 = vsel %vm737_vm1, %v1383_v53, %v1696_v14  ;;  %v1715_v32 = vsel %vm740_vm2, %v1383_v53, %v1696_v14  ;;  %v1717_v22 = vsel %vm743_vm3, %v1383_v53, %v1696_v14 }
 0x1e7   :  { %2233 = vmatmul.f32.gmra.mxu0 %v4830_v8  ;;  %2256 = vmatmul.f32.gmra.mxu1 %v4832_v25  ;;  %v1714_v11 = vrot.slane %v1713_v30, 1  ;;  %v1716_v34 = vrot.slane %v1715_v32, 2  ;;  %v1718_v35 = vrot.slane %v1717_v22, 3  ;;  %v1719_v36 = vsel %vm746_vm4, %v1383_v53, %v1696_v14  ;;  %2922 = vst.msk [vmem:[%s5574_s2 + $0x111] ss:$4 sm:$0x3] %vm4111_vm6, %v1712_v26 }
 0x1e8   :  { %v1720_v38 = vrot.slane %v1719_v36, 4  ;;  %v1721_v40 = vsel %vm749_vm5, %v1383_v53, %v1696_v14  ;;  %v1723_v17 = vsel %vm752_vm7, %v1383_v53, %v1696_v14  ;;  %v1725_v8 = vsel %vm755_vm8, %v1696_v14, %v1383_v53 }
 0x1e9   :  { %v1722_v19 = vrot.slane %v1721_v40, 5  ;;  %2923 = vst.msk [vmem:[%s5574_s2 + $0x131] ss:$4 sm:$0x3] %vm4111_vm6, %v1714_v11  ;;  %v1724_v25 = vrot.slane %v1723_v17, 6  ;;  %v1726_v31 = vrot.slane %v1725_v8, 7 }
 0x1ea   :  { %2924 = vst.msk [vmem:[%s5574_s2 + $0x151] ss:$4 sm:$0x3] %vm4111_vm6, %v1716_v34  ;;  %v1494_v21 = vpop.f32.mrf.mxu2  ;;  %v1517_v23 = vpop.f32.mrf.mxu3 }
 0x1eb   :  { %2925 = vst.msk [vmem:[%s5574_s2 + $0x171] ss:$4 sm:$0x3] %vm4111_vm6, %v1718_v35  ;;  %v1518_v33 = vadd.f32 %v1517_v23, %v1494_v21 }
 0x1ec   :  { %2926 = vst.msk [vmem:[%s5574_s2 + $0x191] ss:$4 sm:$0x3] %vm4111_vm6, %v1720_v38 }
 0x1ed   :  { %2927 = vst.msk [vmem:[%s5574_s2 + $0x1b1] ss:$4 sm:$0x3] %vm4111_vm6, %v1722_v19  ;;  %v1779_v37 = vrot.slane %v1518_v33, 7  ;;  %v1448_v39 = vpop.f32.mrf.mxu0  ;;  %v1471_v41 = vpop.f32.mrf.mxu1 }
 0x1ee   :  { %2928 = vst.msk [vmem:[%s5574_s2 + $0x1d1] ss:$4 sm:$0x3] %vm4111_vm6, %v1724_v25  ;;  %v1472_v43 = vadd.f32 %v1471_v41, %v1448_v39 }
 0x1ef   :  { %2929 = vst.msk [vmem:[%s5574_s2 + $0x1f1] ss:$4 sm:$0x3] %vm4111_vm6, %v1726_v31 }
 0x1f0   :  { %v1781_v54 = vsel %vm735_vm0, %v1472_v43, %v1779_v37  ;;  %v1782_v55 = vsel %vm737_vm1, %v1472_v43, %v1779_v37  ;;  %v1784_v58 = vsel %vm740_vm2, %v1472_v43, %v1779_v37  ;;  %v1786_v59 = vsel %vm743_vm3, %v1472_v43, %v1779_v37 }
 0x1f1   :  { %v1783_v62 = vrot.slane %v1782_v55, 1  ;;  %v1785_v63 = vrot.slane %v1784_v58, 2  ;;  %v1787_v2 = vrot.slane %v1786_v59, 3  ;;  %v1788_v3 = vsel %vm746_vm4, %v1472_v43, %v1779_v37  ;;  %2930 = vst.msk [vmem:[%s5574_s2 + $0x19] ss:$4 sm:$0x3] %vm4111_vm6, %v1781_v54 }
 0x1f2   :  { %v1789_v4 = vrot.slane %v1788_v3, 4  ;;  %v1790_v5 = vsel %vm749_vm5, %v1472_v43, %v1779_v37  ;;  %v1792_v6 = vsel %vm752_vm7, %v1472_v43, %v1779_v37  ;;  %v1794_v7 = vsel %vm755_vm8, %v1779_v37, %v1472_v43 }
 0x1f3   :  { %v1791_v42 = vrot.slane %v1790_v5, 5  ;;  %2931 = vst.msk [vmem:[%s5574_s2 + $0x39] ss:$4 sm:$0x3] %vm4111_vm6, %v1783_v62  ;;  %v1793_v44 = vrot.slane %v1792_v6, 6  ;;  %v1795_v45 = vrot.slane %v1794_v7, 7 }
 0x1f4   :  { %2932 = vst.msk [vmem:[%s5574_s2 + $0x59] ss:$4 sm:$0x3] %vm4111_vm6, %v1785_v63 }
 0x1f5   :  { %2933 = vst.msk [vmem:[%s5574_s2 + $0x79] ss:$4 sm:$0x3] %vm4111_vm6, %v1787_v2 }
 0x1f6   :  { %2934 = vst.msk [vmem:[%s5574_s2 + $0x99] ss:$4 sm:$0x3] %vm4111_vm6, %v1789_v4 }
 0x1f7   :  { %2935 = vst.msk [vmem:[%s5574_s2 + $0xb9] ss:$4 sm:$0x3] %vm4111_vm6, %v1791_v42 }
 0x1f8   :  { %2936 = vst.msk [vmem:[%s5574_s2 + $0xd9] ss:$4 sm:$0x3] %vm4111_vm6, %v1793_v44 }
 0x1f9   :  { %2937 = vst.msk [vmem:[%s5574_s2 + $0xf9] ss:$4 sm:$0x3] %vm4111_vm6, %v1795_v45 }
 0x204   :  { %v1497_v49 = vpop.f32.mrf.mxu2  ;;  %v1520_v28 = vpop.f32.mrf.mxu3 }
 0x205   :  { %v1521_v29 = vadd.f32 %v1520_v28, %v1497_v49 }
 0x207   :  { %v1780_v46 = vrot.slane %v1521_v29, 7  ;;  %v1451_v47 = vpop.f32.mrf.mxu0  ;;  %v1474_v15 = vpop.f32.mrf.mxu1 }
 0x208   :  { %v1475_v52 = vadd.f32 %v1474_v15, %v1451_v47 }
 0x20a   :  { %v1796_v50 = vsel %vm735_vm0, %v1475_v52, %v1780_v46  ;;  %v1797_v51 = vsel %vm737_vm1, %v1475_v52, %v1780_v46  ;;  %v1799_v18 = vsel %vm740_vm2, %v1475_v52, %v1780_v46  ;;  %v1801_v27 = vsel %vm743_vm3, %v1475_v52, %v1780_v46 }
 0x20b   :  { %v1798_v56 = vrot.slane %v1797_v51, 1  ;;  %v1800_v57 = vrot.slane %v1799_v18, 2  ;;  %v1802_v13 = vrot.slane %v1801_v27, 3  ;;  %v1803_v16 = vsel %vm746_vm4, %v1475_v52, %v1780_v46  ;;  %2938 = vst.msk [vmem:[%s5574_s2 + $0x119] ss:$4 sm:$0x3] %vm4111_vm6, %v1796_v50 }
 0x20c   :  { %v1804_v0 = vrot.slane %v1803_v16, 4  ;;  %v1805_v1 = vsel %vm749_vm5, %v1475_v52, %v1780_v46  ;;  %v1807_v10 = vsel %vm752_vm7, %v1475_v52, %v1780_v46  ;;  %v1809_v9 = vsel %vm755_vm8, %v1780_v46, %v1475_v52 }
 0x20d   :  { %v1806_v60 = vrot.slane %v1805_v1, 5  ;;  %2939 = vst.msk [vmem:[%s5574_s2 + $0x139] ss:$4 sm:$0x3] %vm4111_vm6, %v1798_v56  ;;  %v1808_v61 = vrot.slane %v1807_v10, 6  ;;  %v1810_v24 = vrot.slane %v1809_v9, 7 }
 0x20e   :  { %2940 = vst.msk [vmem:[%s5574_s2 + $0x159] ss:$4 sm:$0x3] %vm4111_vm6, %v1800_v57  ;;  %v2001_v12 = vpop.f32.mrf.mxu2  ;;  %v2024_v14 = vpop.f32.mrf.mxu3 }
 0x20f   :  { %2941 = vst.msk [vmem:[%s5574_s2 + $0x179] ss:$4 sm:$0x3] %vm4111_vm6, %v1802_v13  ;;  %v2025_v20 = vadd.f32 %v2024_v14, %v2001_v12 }
 0x210   :  { %2942 = vst.msk [vmem:[%s5574_s2 + $0x199] ss:$4 sm:$0x3] %vm4111_vm6, %v1804_v0 }
 0x211   :  { %2943 = vst.msk [vmem:[%s5574_s2 + $0x1b9] ss:$4 sm:$0x3] %vm4111_vm6, %v1806_v60  ;;  %v2310_v53 = vrot.slane %v2025_v20, 7  ;;  %v1955_v26 = vpop.f32.mrf.mxu0  ;;  %v1978_v30 = vpop.f32.mrf.mxu1 }
 0x212   :  { %2944 = vst.msk [vmem:[%s5574_s2 + $0x1d9] ss:$4 sm:$0x3] %vm4111_vm6, %v1808_v61  ;;  %v1979_v32 = vadd.f32 %v1978_v30, %v1955_v26 }
 0x213   :  { %2945 = vst.msk [vmem:[%s5574_s2 + $0x1f9] ss:$4 sm:$0x3] %vm4111_vm6, %v1810_v24 }
 0x214   :  { %v2312_v22 = vsel %vm735_vm0, %v1979_v32, %v2310_v53  ;;  %v2313_v11 = vsel %vm737_vm1, %v1979_v32, %v2310_v53  ;;  %v2315_v34 = vsel %vm740_vm2, %v1979_v32, %v2310_v53  ;;  %v2317_v35 = vsel %vm743_vm3, %v1979_v32, %v2310_v53 }
 0x215   :  { %v2314_v36 = vrot.slane %v2313_v11, 1  ;;  %v2316_v38 = vrot.slane %v2315_v34, 2  ;;  %v2318_v40 = vrot.slane %v2317_v35, 3  ;;  %v2319_v17 = vsel %vm746_vm4, %v1979_v32, %v2310_v53  ;;  %2962 = vst.msk [vmem:[%s5574_s2 + $0x2] ss:$4 sm:$0x3] %vm4111_vm6, %v2312_v22 }
 0x216   :  { %v2320_v8 = vrot.slane %v2319_v17, 4  ;;  %v2321_v19 = vsel %vm749_vm5, %v1979_v32, %v2310_v53  ;;  %v2323_v25 = vsel %vm752_vm7, %v1979_v32, %v2310_v53  ;;  %v2325_v21 = vsel %vm755_vm8, %v2310_v53, %v1979_v32 }
 0x217   :  { %v2322_v23 = vrot.slane %v2321_v19, 5  ;;  %2963 = vst.msk [vmem:[%s5574_s2 + $0x22] ss:$4 sm:$0x3] %vm4111_vm6, %v2314_v36  ;;  %v2324_v31 = vrot.slane %v2323_v25, 6  ;;  %v2326_v33 = vrot.slane %v2325_v21, 7 }
 0x218   :  { %2964 = vst.msk [vmem:[%s5574_s2 + $0x42] ss:$4 sm:$0x3] %vm4111_vm6, %v2316_v38 }
 0x219   :  { %2965 = vst.msk [vmem:[%s5574_s2 + $0x62] ss:$4 sm:$0x3] %vm4111_vm6, %v2318_v40 }
 0x21a   :  { %2966 = vst.msk [vmem:[%s5574_s2 + $0x82] ss:$4 sm:$0x3] %vm4111_vm6, %v2320_v8 }
 0x21b   :  { %2967 = vst.msk [vmem:[%s5574_s2 + $0xa2] ss:$4 sm:$0x3] %vm4111_vm6, %v2322_v23 }
 0x21c   :  { %2968 = vst.msk [vmem:[%s5574_s2 + $0xc2] ss:$4 sm:$0x3] %vm4111_vm6, %v2324_v31 }
 0x21d   :  { %2969 = vst.msk [vmem:[%s5574_s2 + $0xe2] ss:$4 sm:$0x3] %vm4111_vm6, %v2326_v33 }
 0x226   :  { %v2004_v37 = vpop.f32.mrf.mxu2  ;;  %v2027_v39 = vpop.f32.mrf.mxu3 }
 0x227   :  { %v2028_v41 = vadd.f32 %v2027_v39, %v2004_v37 }
 0x229   :  { %v2311_v43 = vrot.slane %v2028_v41, 7  ;;  %v1958_v54 = vpop.f32.mrf.mxu0  ;;  %v1981_v55 = vpop.f32.mrf.mxu1 }
 0x22a   :  { %v1982_v58 = vadd.f32 %v1981_v55, %v1958_v54 }
 0x22c   :  { %v2327_v59 = vsel %vm735_vm0, %v1982_v58, %v2311_v43  ;;  %v2328_v62 = vsel %vm737_vm1, %v1982_v58, %v2311_v43  ;;  %v2330_v63 = vsel %vm740_vm2, %v1982_v58, %v2311_v43  ;;  %v2332_v2 = vsel %vm743_vm3, %v1982_v58, %v2311_v43 }
 0x22d   :  { %v2329_v3 = vrot.slane %v2328_v62, 1  ;;  %v2331_v4 = vrot.slane %v2330_v63, 2  ;;  %v2333_v5 = vrot.slane %v2332_v2, 3  ;;  %v2334_v6 = vsel %vm746_vm4, %v1982_v58, %v2311_v43  ;;  %2970 = vst.msk [vmem:[%s5574_s2 + $0x102] ss:$4 sm:$0x3] %vm4111_vm6, %v2327_v59 }
 0x22e   :  { %v2335_v7 = vrot.slane %v2334_v6, 4  ;;  %v2336_v42 = vsel %vm749_vm5, %v1982_v58, %v2311_v43  ;;  %v2338_v44 = vsel %vm752_vm7, %v1982_v58, %v2311_v43  ;;  %v2340_v45 = vsel %vm755_vm8, %v2311_v43, %v1982_v58 }
 0x22f   :  { %v2337_v49 = vrot.slane %v2336_v42, 5  ;;  %2971 = vst.msk [vmem:[%s5574_s2 + $0x122] ss:$4 sm:$0x3] %vm4111_vm6, %v2329_v3  ;;  %v2339_v28 = vrot.slane %v2338_v44, 6  ;;  %v2341_v47 = vrot.slane %v2340_v45, 7 }
 0x230   :  { %2972 = vst.msk [vmem:[%s5574_s2 + $0x142] ss:$4 sm:$0x3] %vm4111_vm6, %v2331_v4  ;;  %v2093_v29 = vpop.f32.mrf.mxu2  ;;  %v2116_v46 = vpop.f32.mrf.mxu3 }
 0x231   :  { %2973 = vst.msk [vmem:[%s5574_s2 + $0x162] ss:$4 sm:$0x3] %vm4111_vm6, %v2333_v5  ;;  %v2117_v15 = vadd.f32 %v2116_v46, %v2093_v29 }
 0x232   :  { %2974 = vst.msk [vmem:[%s5574_s2 + $0x182] ss:$4 sm:$0x3] %vm4111_vm6, %v2335_v7 }
 0x233   :  { %2975 = vst.msk [vmem:[%s5574_s2 + $0x1a2] ss:$4 sm:$0x3] %vm4111_vm6, %v2337_v49  ;;  %v2394_v52 = vrot.slane %v2117_v15, 7  ;;  %v2047_v50 = vpop.f32.mrf.mxu0  ;;  %v2070_v51 = vpop.f32.mrf.mxu1 }
 0x234   :  { %2976 = vst.msk [vmem:[%s5574_s2 + $0x1c2] ss:$4 sm:$0x3] %vm4111_vm6, %v2339_v28  ;;  %v2071_v18 = vadd.f32 %v2070_v51, %v2047_v50 }
 0x235   :  { %2977 = vst.msk [vmem:[%s5574_s2 + $0x1e2] ss:$4 sm:$0x3] %vm4111_vm6, %v2341_v47 }
 0x236   :  { %v2396_v27 = vsel %vm735_vm0, %v2071_v18, %v2394_v52  ;;  %v2397_v56 = vsel %vm737_vm1, %v2071_v18, %v2394_v52  ;;  %v2399_v57 = vsel %vm740_vm2, %v2071_v18, %v2394_v52  ;;  %v2401_v13 = vsel %vm743_vm3, %v2071_v18, %v2394_v52 }
 0x237   :  { %v2398_v16 = vrot.slane %v2397_v56, 1  ;;  %v2400_v0 = vrot.slane %v2399_v57, 2  ;;  %v2402_v1 = vrot.slane %v2401_v13, 3  ;;  %v2403_v10 = vsel %vm746_vm4, %v2071_v18, %v2394_v52  ;;  %2978 = vst.msk [vmem:[%s5574_s2 + $0xa] ss:$4 sm:$0x3] %vm4111_vm6, %v2396_v27 }
 0x238   :  { %v2404_v9 = vrot.slane %v2403_v10, 4  ;;  %v2405_v60 = vsel %vm749_vm5, %v2071_v18, %v2394_v52  ;;  %v2407_v61 = vsel %vm752_vm7, %v2071_v18, %v2394_v52  ;;  %v2409_v12 = vsel %vm755_vm8, %v2394_v52, %v2071_v18 }
 0x239   :  { %v2406_v14 = vrot.slane %v2405_v60, 5  ;;  %2979 = vst.msk [vmem:[%s5574_s2 + $0x2a] ss:$4 sm:$0x3] %vm4111_vm6, %v2398_v16  ;;  %v2408_v24 = vrot.slane %v2407_v61, 6  ;;  %v2410_v26 = vrot.slane %v2409_v12, 7 }
 0x23a   :  { %2980 = vst.msk [vmem:[%s5574_s2 + $0x4a] ss:$4 sm:$0x3] %vm4111_vm6, %v2400_v0 }
 0x23b   :  { %v2096_v20 = vpop.f32.mrf.mxu2  ;;  %v2119_v53 = vpop.f32.mrf.mxu3  ;;  %2981 = vst.msk [vmem:[%s5574_s2 + $0x6a] ss:$4 sm:$0x3] %vm4111_vm6, %v2402_v1 }
 0x23c   :  { %v2120_v30 = vadd.f32 %v2119_v53, %v2096_v20  ;;  %2982 = vst.msk [vmem:[%s5574_s2 + $0x8a] ss:$4 sm:$0x3] %vm4111_vm6, %v2404_v9 }
 0x23d   :  { %2983 = vst.msk [vmem:[%s5574_s2 + $0xaa] ss:$4 sm:$0x3] %vm4111_vm6, %v2406_v14 }
 0x23e   :  { %v2395_v32 = vrot.slane %v2120_v30, 7  ;;  %2984 = vst.msk [vmem:[%s5574_s2 + $0xca] ss:$4 sm:$0x3] %vm4111_vm6, %v2408_v24 }
 0x23f   :  { %v2050_v22 = vpop.f32.mrf.mxu0  ;;  %v2073_v11 = vpop.f32.mrf.mxu1  ;;  %2985 = vst.msk [vmem:[%s5574_s2 + $0xea] ss:$4 sm:$0x3] %vm4111_vm6, %v2410_v26 }
 0x240   :  { %v2074_v34 = vadd.f32 %v2073_v11, %v2050_v22 }
 0x242   :  { %v2411_v35 = vsel %vm735_vm0, %v2074_v34, %v2395_v32  ;;  %v2412_v36 = vsel %vm737_vm1, %v2074_v34, %v2395_v32  ;;  %v2414_v38 = vsel %vm740_vm2, %v2074_v34, %v2395_v32  ;;  %v2416_v40 = vsel %vm743_vm3, %v2074_v34, %v2395_v32 }
 0x243   :  { %v2413_v17 = vrot.slane %v2412_v36, 1  ;;  %v2415_v8 = vrot.slane %v2414_v38, 2  ;;  %v2417_v19 = vrot.slane %v2416_v40, 3  ;;  %v2418_v25 = vsel %vm746_vm4, %v2074_v34, %v2395_v32  ;;  %2986 = vst.msk [vmem:[%s5574_s2 + $0x10a] ss:$4 sm:$0x3] %vm4111_vm6, %v2411_v35 }
 0x244   :  { %v2419_v21 = vrot.slane %v2418_v25, 4  ;;  %v2420_v23 = vsel %vm749_vm5, %v2074_v34, %v2395_v32  ;;  %v2422_v31 = vsel %vm752_vm7, %v2074_v34, %v2395_v32  ;;  %v2424_v33 = vsel %vm755_vm8, %v2395_v32, %v2074_v34 }
 0x245   :  { %v2421_v37 = vrot.slane %v2420_v23, 5  ;;  %2987 = vst.msk [vmem:[%s5574_s2 + $0x12a] ss:$4 sm:$0x3] %vm4111_vm6, %v2413_v17  ;;  %v2423_v39 = vrot.slane %v2422_v31, 6  ;;  %v2425_v54 = vrot.slane %v2424_v33, 7 }
 0x246   :  { %2988 = vst.msk [vmem:[%s5574_s2 + $0x14a] ss:$4 sm:$0x3] %vm4111_vm6, %v2415_v8  ;;  %v2185_v41 = vpop.f32.mrf.mxu2  ;;  %v2208_v43 = vpop.f32.mrf.mxu3 }
 0x247   :  { %2989 = vst.msk [vmem:[%s5574_s2 + $0x16a] ss:$4 sm:$0x3] %vm4111_vm6, %v2417_v19  ;;  %v2209_v55 = vadd.f32 %v2208_v43, %v2185_v41 }
 0x248   :  { %2990 = vst.msk [vmem:[%s5574_s2 + $0x18a] ss:$4 sm:$0x3] %vm4111_vm6, %v2419_v21 }
 0x249   :  { %2991 = vst.msk [vmem:[%s5574_s2 + $0x1aa] ss:$4 sm:$0x3] %vm4111_vm6, %v2421_v37  ;;  %v2478_v58 = vrot.slane %v2209_v55, 7  ;;  %v2139_v59 = vpop.f32.mrf.mxu0  ;;  %v2162_v62 = vpop.f32.mrf.mxu1 }
 0x24a   :  { %2992 = vst.msk [vmem:[%s5574_s2 + $0x1ca] ss:$4 sm:$0x3] %vm4111_vm6, %v2423_v39  ;;  %v2163_v63 = vadd.f32 %v2162_v62, %v2139_v59 }
 0x24b   :  { %2993 = vst.msk [vmem:[%s5574_s2 + $0x1ea] ss:$4 sm:$0x3] %vm4111_vm6, %v2425_v54 }
 0x24c   :  { %v2480_v2 = vsel %vm735_vm0, %v2163_v63, %v2478_v58  ;;  %v2481_v3 = vsel %vm737_vm1, %v2163_v63, %v2478_v58  ;;  %v2483_v4 = vsel %vm740_vm2, %v2163_v63, %v2478_v58  ;;  %v2485_v5 = vsel %vm743_vm3, %v2163_v63, %v2478_v58 }
 0x24d   :  { %v2482_v6 = vrot.slane %v2481_v3, 1  ;;  %v2484_v7 = vrot.slane %v2483_v4, 2  ;;  %v2486_v42 = vrot.slane %v2485_v5, 3  ;;  %v2487_v44 = vsel %vm746_vm4, %v2163_v63, %v2478_v58  ;;  %2994 = vst.msk [vmem:[%s5574_s2 + $0x12] ss:$4 sm:$0x3] %vm4111_vm6, %v2480_v2 }
 0x24e   :  { %v2488_v45 = vrot.slane %v2487_v44, 4  ;;  %v2489_v49 = vsel %vm749_vm5, %v2163_v63, %v2478_v58  ;;  %v2491_v28 = vsel %vm752_vm7, %v2163_v63, %v2478_v58  ;;  %v2493_v29 = vsel %vm755_vm8, %v2478_v58, %v2163_v63 }
 0x24f   :  { %v2490_v46 = vrot.slane %v2489_v49, 5  ;;  %2995 = vst.msk [vmem:[%s5574_s2 + $0x32] ss:$4 sm:$0x3] %vm4111_vm6, %v2482_v6  ;;  %v2492_v47 = vrot.slane %v2491_v28, 6  ;;  %v2494_v50 = vrot.slane %v2493_v29, 7 }
 0x250   :  { %2996 = vst.msk [vmem:[%s5574_s2 + $0x52] ss:$4 sm:$0x3] %vm4111_vm6, %v2484_v7  ;;  %v2188_v15 = vpop.f32.mrf.mxu2  ;;  %v2211_v52 = vpop.f32.mrf.mxu3 }
 0x251   :  { %2997 = vst.msk [vmem:[%s5574_s2 + $0x72] ss:$4 sm:$0x3] %vm4111_vm6, %v2486_v42  ;;  %v2212_v51 = vadd.f32 %v2211_v52, %v2188_v15 }
 0x252   :  { %2998 = vst.msk [vmem:[%s5574_s2 + $0x92] ss:$4 sm:$0x3] %vm4111_vm6, %v2488_v45 }
 0x253   :  { %2999 = vst.msk [vmem:[%s5574_s2 + $0xb2] ss:$4 sm:$0x3] %vm4111_vm6, %v2490_v46  ;;  %v2479_v18 = vrot.slane %v2212_v51, 7  ;;  %v2142_v27 = vpop.f32.mrf.mxu0  ;;  %v2165_v56 = vpop.f32.mrf.mxu1 }
 0x254   :  { %3000 = vst.msk [vmem:[%s5574_s2 + $0xd2] ss:$4 sm:$0x3] %vm4111_vm6, %v2492_v47  ;;  %v2166_v57 = vadd.f32 %v2165_v56, %v2142_v27 }
 0x255   :  { %3001 = vst.msk [vmem:[%s5574_s2 + $0xf2] ss:$4 sm:$0x3] %vm4111_vm6, %v2494_v50 }
 0x256   :  { %v2495_v13 = vsel %vm735_vm0, %v2166_v57, %v2479_v18  ;;  %v2496_v16 = vsel %vm737_vm1, %v2166_v57, %v2479_v18  ;;  %v2498_v0 = vsel %vm740_vm2, %v2166_v57, %v2479_v18  ;;  %v2500_v1 = vsel %vm743_vm3, %v2166_v57, %v2479_v18 }
 0x257   :  { %v2497_v10 = vrot.slane %v2496_v16, 1  ;;  %v2499_v9 = vrot.slane %v2498_v0, 2  ;;  %v2501_v60 = vrot.slane %v2500_v1, 3  ;;  %v2502_v61 = vsel %vm746_vm4, %v2166_v57, %v2479_v18  ;;  %3002 = vst.msk [vmem:[%s5574_s2 + $0x112] ss:$4 sm:$0x3] %vm4111_vm6, %v2495_v13 }
 0x258   :  { %v2503_v12 = vrot.slane %v2502_v61, 4  ;;  %v2504_v14 = vsel %vm749_vm5, %v2166_v57, %v2479_v18  ;;  %v2506_v24 = vsel %vm752_vm7, %v2166_v57, %v2479_v18  ;;  %v2508_v20 = vsel %vm755_vm8, %v2479_v18, %v2166_v57 }
 0x259   :  { %v2505_v53 = vrot.slane %v2504_v14, 5  ;;  %3003 = vst.msk [vmem:[%s5574_s2 + $0x132] ss:$4 sm:$0x3] %vm4111_vm6, %v2497_v10  ;;  %v2507_v26 = vrot.slane %v2506_v24, 6  ;;  %v2509_v22 = vrot.slane %v2508_v20, 7 }
 0x25a   :  { %3004 = vst.msk [vmem:[%s5574_s2 + $0x152] ss:$4 sm:$0x3] %vm4111_vm6, %v2499_v9  ;;  %v2277_v30 = vpop.f32.mrf.mxu2  ;;  %v2300_v32 = vpop.f32.mrf.mxu3 }
 0x25b   :  { %3005 = vst.msk [vmem:[%s5574_s2 + $0x172] ss:$4 sm:$0x3] %vm4111_vm6, %v2501_v60  ;;  %v2301_v11 = vadd.f32 %v2300_v32, %v2277_v30 }
 0x25c   :  { %3006 = vst.msk [vmem:[%s5574_s2 + $0x192] ss:$4 sm:$0x3] %vm4111_vm6, %v2503_v12  ;;  %v2231_v34 = vpop.f32.mrf.mxu0  ;;  %v2254_v35 = vpop.f32.mrf.mxu1 }
 0x25d   :  { %3007 = vst.msk [vmem:[%s5574_s2 + $0x1b2] ss:$4 sm:$0x3] %vm4111_vm6, %v2505_v53  ;;  %v2562_v36 = vrot.slane %v2301_v11, 7  ;;  %v2255_v38 = vadd.f32 %v2254_v35, %v2231_v34 }
 0x25e   :  { %3008 = vst.msk [vmem:[%s5574_s2 + $0x1d2] ss:$4 sm:$0x3] %vm4111_vm6, %v2507_v26 }
 0x25f   :  { %3009 = vst.msk [vmem:[%s5574_s2 + $0x1f2] ss:$4 sm:$0x3] %vm4111_vm6, %v2509_v22  ;;  %v2564_v40 = vsel %vm735_vm0, %v2255_v38, %v2562_v36  ;;  %v2565_v17 = vsel %vm737_vm1, %v2255_v38, %v2562_v36  ;;  %v2567_v8 = vsel %vm740_vm2, %v2255_v38, %v2562_v36  ;;  %v2569_v19 = vsel %vm743_vm3, %v2255_v38, %v2562_v36 }
 0x260   :  { %v2566_v25 = vrot.slane %v2565_v17, 1  ;;  %v2568_v21 = vrot.slane %v2567_v8, 2  ;;  %v2570_v23 = vrot.slane %v2569_v19, 3  ;;  %v2571_v31 = vsel %vm746_vm4, %v2255_v38, %v2562_v36  ;;  %3010 = vst.msk [vmem:[%s5574_s2 + $0x1a] ss:$4 sm:$0x3] %vm4111_vm6, %v2564_v40 }
 0x261   :  { %v2572_v33 = vrot.slane %v2571_v31, 4  ;;  %v2573_v37 = vsel %vm749_vm5, %v2255_v38, %v2562_v36  ;;  %v2575_v39 = vsel %vm752_vm7, %v2255_v38, %v2562_v36  ;;  %v2577_v41 = vsel %vm755_vm8, %v2562_v36, %v2255_v38 }
 0x262   :  { %v2574_v43 = vrot.slane %v2573_v37, 5  ;;  %3011 = vst.msk [vmem:[%s5574_s2 + $0x3a] ss:$4 sm:$0x3] %vm4111_vm6, %v2566_v25  ;;  %v2576_v54 = vrot.slane %v2575_v39, 6  ;;  %v2578_v59 = vrot.slane %v2577_v41, 7 }
 0x263   :  { %3012 = vst.msk [vmem:[%s5574_s2 + $0x5a] ss:$4 sm:$0x3] %vm4111_vm6, %v2568_v21  ;;  %v2280_v55 = vpop.f32.mrf.mxu2  ;;  %v2303_v58 = vpop.f32.mrf.mxu3 }
 0x264   :  { %3013 = vst.msk [vmem:[%s5574_s2 + $0x7a] ss:$4 sm:$0x3] %vm4111_vm6, %v2570_v23  ;;  %v2304_v62 = vadd.f32 %v2303_v58, %v2280_v55  ;;  %v2234_v63 = vpop.f32.mrf.mxu0  ;;  %v2257_v2 = vpop.f32.mrf.mxu1 }
 0x265   :  { %3014 = vst.msk [vmem:[%s5574_s2 + $0x9a] ss:$4 sm:$0x3] %vm4111_vm6, %v2572_v33  ;;  %v2258_v3 = vadd.f32 %v2257_v2, %v2234_v63 }
 0x266   :  { %3015 = vst.msk [vmem:[%s5574_s2 + $0xba] ss:$4 sm:$0x3] %vm4111_vm6, %v2574_v43  ;;  %v2563_v4 = vrot.slane %v2304_v62, 7 }
 0x267   :  { %3016 = vst.msk [vmem:[%s5574_s2 + $0xda] ss:$4 sm:$0x3] %vm4111_vm6, %v2576_v54 }
 0x268   :  { %3017 = vst.msk [vmem:[%s5574_s2 + $0xfa] ss:$4 sm:$0x3] %vm4111_vm6, %v2578_v59  ;;  %v2579_v5 = vsel %vm735_vm0, %v2258_v3, %v2563_v4  ;;  %v2580_v6 = vsel %vm737_vm1, %v2258_v3, %v2563_v4  ;;  %v2582_v7 = vsel %vm740_vm2, %v2258_v3, %v2563_v4  ;;  %v2584_v42 = vsel %vm743_vm3, %v2258_v3, %v2563_v4 }
 0x269   :  { %v2581_v44 = vrot.slane %v2580_v6, 1  ;;  %v2583_v45 = vrot.slane %v2582_v7, 2  ;;  %v2585_v49 = vrot.slane %v2584_v42, 3  ;;  %v2586_v28 = vsel %vm746_vm4, %v2258_v3, %v2563_v4  ;;  %3018 = vst.msk [vmem:[%s5574_s2 + $0x11a] ss:$4 sm:$0x3] %vm4111_vm6, %v2579_v5 }
 0x26a   :  { %v2587_v29 = vrot.slane %v2586_v28, 4  ;;  %v2588_v46 = vsel %vm749_vm5, %v2258_v3, %v2563_v4  ;;  %v2590_v47 = vsel %vm752_vm7, %v2258_v3, %v2563_v4  ;;  %v2592_v15 = vsel %vm755_vm8, %v2563_v4, %v2258_v3 }
 0x26b   :  { %v2589_v52 = vrot.slane %v2588_v46, 5  ;;  %3019 = vst.msk [vmem:[%s5574_s2 + $0x13a] ss:$4 sm:$0x3] %vm4111_vm6, %v2581_v44  ;;  %v2591_v50 = vrot.slane %v2590_v47, 6  ;;  %v2593_v51 = vrot.slane %v2592_v15, 7 }
 0x26c   :  { %3020 = vst.msk [vmem:[%s5574_s2 + $0x15a] ss:$4 sm:$0x3] %vm4111_vm6, %v2583_v45 }
 0x26d   :  { %3021 = vst.msk [vmem:[%s5574_s2 + $0x17a] ss:$4 sm:$0x3] %vm4111_vm6, %v2585_v49 }
 0x26e   :  { %3022 = vst.msk [vmem:[%s5574_s2 + $0x19a] ss:$4 sm:$0x3] %vm4111_vm6, %v2587_v29 }
 0x26f   :  { %3023 = vst.msk [vmem:[%s5574_s2 + $0x1ba] ss:$4 sm:$0x3] %vm4111_vm6, %v2589_v52 }
 0x270   :  { %3024 = vst.msk [vmem:[%s5574_s2 + $0x1da] ss:$4 sm:$0x3] %vm4111_vm6, %v2591_v50 }
 0x271   :  { %3025 = vst.msk [vmem:[%s5574_s2 + $0x1fa] ss:$4 sm:$0x3] %vm4111_vm6, %v2593_v51 }
 0x272   :  { %2646 = vsyncpa [#allocation3], 1 }

</bundles_post_ra>
